<compile_context>
chip_gen: v6e
topology: v6e:2x2x1
jax: 0.10.0
libtpu: 0.0.40
codegen_flags: <defaults>
</compile_context>

<pallas_src>
import math

import jax
import jax.numpy as jnp
from jax.experimental import pallas as pl
from jax.experimental.pallas import tpu as pltpu

# ---------------- small, module-consistent config ----------------
IMG = 16          # img_size
PATCH = 4         # patch_size
IN_CHANS = 3
NUM_CLASSES = 10
EMBED_DIM = 32
DEPTH = 2
NUM_HEADS = 4
MLP_RATIO = 2.0
LN_EPS = 1e-5     # nn.LayerNorm default

P_TOK = (IMG // PATCH) ** 2      # 16 patches per image
N_TOK = P_TOK + 1                # 17 = + cls token
N_PAD = 24                       # token count padded to a multiple of 8 sublanes
HEAD_DIM = EMBED_DIM // NUM_HEADS
MLP_HIDDEN = int(EMBED_DIM * MLP_RATIO)
PATCH_FEATS = IN_CHANS * PATCH * PATCH
HEAD_PAD = 128                   # lane-dense head-output width (real classes in [:10])
NEG_INF = -1e30

PER_BLOCK = 11                   # refs per transformer block


# ---------------- in-kernel math helpers ----------------
def _erf(x):
    # Abramowitz & Stegun 7.1.26 polynomial, |err| ~ 1.5e-7 vs exact erf
    # (close to, but not bit-identical with, torch nn.GELU()'s exact erf).
    p = 0.3275911
    a1, a2, a3, a4, a5 = 0.254829592, -0.284496736, 1.421413741, -1.453152027, 1.061405429
    ax = jnp.abs(x)
    t = 1.0 / (1.0 + p * ax)
    poly = ((((a5 * t + a4) * t + a3) * t + a2) * t + a1) * t
    e = 1.0 - poly * jnp.exp(-ax * ax)
    return jnp.where(x >= 0, e, -e)


def _gelu(x):
    # TODO(synk): swap for lax.erf once erf lowering in Mosaic is guaranteed.
    return 0.5 * x * (1.0 + _erf(x * (1.0 / math.sqrt(2.0))))


def _layernorm(x, gamma, beta):
    mu = jnp.mean(x, axis=-1, keepdims=True)
    xc = x - mu
    var = jnp.mean(xc * xc, axis=-1, keepdims=True)
    return xc * jax.lax.rsqrt(var + LN_EPS) * gamma + beta


# ---------------- single fused forward kernel ----------------
def _vit_fwd_kernel(*refs):
    out_ref = refs[-1]
    in_refs = refs[:-1]
    patches_ref, w_patch_ref, pos_cls_ref = in_refs[:3]
    blk_refs = in_refs[3:3 + DEPTH * PER_BLOCK]
    ln_g_ref, ln_b_ref, w_head_ref, b_head_ref = in_refs[3 + DEPTH * PER_BLOCK:]

    bn = patches_ref.shape[0]           # B * N_PAD (static)
    B = bn // N_PAD

    # patch projection; cls token, pos-embed and conv bias are pre-folded into the
    # (N_PAD, D) pos_cls table and broadcast over the batch in-kernel.
    x = jnp.dot(patches_ref[...], w_patch_ref[...],
                preferred_element_type=jnp.float32)                      # (B*N_PAD, D)
    x = (x.reshape(B, N_PAD, EMBED_DIM) + pos_cls_ref[...]).reshape(bn, EMBED_DIM)

    # key-padding mask: padded key columns (>= N_TOK) get -inf so neither real nor
    # cls tokens ever attend to the garbage padded query rows.  Broadcast ONCE.
    col = jax.lax.broadcasted_iota(jnp.int32, (N_PAD, N_PAD), 1)
    kmask = jnp.where(col < N_TOK, 0.0, NEG_INF).astype(jnp.float32)     # (N_PAD, N_PAD)
    kmask_b = jnp.broadcast_to(kmask, (B, N_PAD, N_PAD))                 # hoisted broadcast

    scale = HEAD_DIM ** -0.5

    for blk in range(DEPTH):                                             # static unroll
        (ln1g, ln1b, wqkv, wproj, bproj,
         ln2g, ln2b, wfc1, bfc1, wfc2, bfc2) = blk_refs[blk * PER_BLOCK:(blk + 1) * PER_BLOCK]

        # ---- pre-LN multi-head self-attention ----
        h = _layernorm(x, ln1g[...], ln1b[...])                          # (B*N_PAD, D)

        # ONE fused, lane-dense QKV projection: (48, 32) x (32, 96)
        qkv = jnp.dot(h, wqkv[...], preferred_element_type=jnp.float32)  # (B*N_PAD, 3D)
        q = qkv[:, :EMBED_DIM] * scale                                   # fold softmax scale once
        k = qkv[:, EMBED_DIM:2 * EMBED_DIM]
        v = qkv[:, 2 * EMBED_DIM:]
        # 24 % 8 == 0 -> sublane-tile-aligned reshapes (no relayout)
        q3 = q.reshape(B, N_PAD, EMBED_DIM)
        k3 = k.reshape(B, N_PAD, EMBED_DIM)
        v3 = v.reshape(B, N_PAD, EMBED_DIM)

        o_heads = []
        for hh in range(NUM_HEADS):                                      # static unroll
            sl = slice(hh * HEAD_DIM, (hh + 1) * HEAD_DIM)               # static lane slice
            qh, kh, vh = q3[:, :, sl], k3[:, :, sl], v3[:, :, sl]
            s = jnp.einsum("bqd,bkd->bqk", qh, kh,
                           preferred_element_type=jnp.float32) + kmask_b
            # softmax with the divide moved to the EUP via reciprocal
            m = jnp.max(s, axis=-1, keepdims=True)
            e = jnp.exp(s - m)
            p = e * pl.reciprocal(jnp.sum(e, axis=-1, keepdims=True), approx=False)
            oh = jnp.einsum("bqk,bkd->bqd", p, vh,
                            preferred_element_type=jnp.float32)          # (B, N_PAD, dh)
            o_heads.append(oh.reshape(bn, HEAD_DIM))

        # lane-contiguous head concat -> ONE (48, 32) x (32, 32) output projection
        o = jnp.concatenate(o_heads, axis=-1)                            # (B*N_PAD, D)
        x = x + jnp.dot(o, wproj[...], preferred_element_type=jnp.float32) + bproj[...]

        # ---- pre-LN MLP ----
        h2 = _layernorm(x, ln2g[...], ln2b[...])
        f1 = jnp.dot(h2, wfc1[...], preferred_element_type=jnp.float32) + bfc1[...]
        f2 = jnp.dot(_gelu(f1), wfc2[...], preferred_element_type=jnp.float32) + bfc2[...]
        x = x + f2

    # ---- final LayerNorm + classification head, cls token only ----
    # (strided row-select is tiny at this size; see review note)
    cls = x.reshape(B, N_PAD, EMBED_DIM)[:, 0, :]                        # (B, D)
    cls = _layernorm(cls, ln_g_ref[...], ln_b_ref[...])
    out_ref[...] = (jnp.dot(cls, w_head_ref[...], preferred_element_type=jnp.float32)
                    + b_head_ref[...]).astype(out_ref.dtype)


# ---------------- wrapper (weight plumbing in XLA, hot path in one Pallas call) ----------------
def vit_forward(x, params):
    B = x.shape[0]
    hp = IMG // PATCH

    # NCHW -> (B, P_TOK, C*p*p) patchify; single tiny relayout feeding the one fused kernel
    patches = x.reshape(B, IN_CHANS, hp, PATCH, hp, PATCH)
    patches = patches.transpose(0, 2, 4, 1, 3, 5).reshape(B, P_TOK, PATCH_FEATS)
    # row 0 = cls slot, rows N_TOK..N_PAD-1 = padding; both all-zero
    patches = jnp.pad(patches, ((0, 0), (1, N_PAD - 1 - P_TOK), (0, 0)))
    patches_flat = patches.reshape(B * N_PAD, PATCH_FEATS)

    # fold cls token, pos-embed and conv bias into one per-token additive table (N_PAD, D);
    # passed ONCE (not tiled by batch) and broadcast inside the kernel.
    pos = params["pos_embed"][0]                                         # (N_TOK, D)
    pos_cls = jnp.concatenate([
        params["cls_token"].reshape(1, EMBED_DIM) + pos[0:1],            # cls row
        pos[1:] + params["b_patch"],                                     # patch rows
        jnp.zeros((N_PAD - N_TOK, EMBED_DIM), jnp.float32),              # pad rows
    ], axis=0)

    args = [patches_flat, params["w_patch"], pos_cls]
    for blk in params["blocks"]:
        # (ln1g, ln1b, wqkv, wproj, bproj, ln2g, ln2b, wfc1, bfc1, wfc2, bfc2)
        # NOTE: W_qkv columns must be ordered [q|k|v] with head-contiguous sub-columns
        # (i.e. PyTorch qkv weight transposed) -- true for the in-file init; verify when
        # importing a real timm/PyTorch checkpoint.
        args += list(blk)

    # lane-dense (128-wide) head; real classes live in the first NUM_CLASSES lanes
    w_head = jnp.pad(params["w_head"], ((0, 0), (0, HEAD_PAD - NUM_CLASSES)))
    b_head = jnp.pad(params["b_head"], ((0, 0), (0, HEAD_PAD - NUM_CLASSES)))
    args += [params["ln_g"], params["ln_b"], w_head, b_head]

    out = pl.pallas_call(
        _vit_fwd_kernel,
        out_shape=jax.ShapeDtypeStruct((B, HEAD_PAD), jnp.float32),
        # explicit VMEM budget (working set is ~0.2 MiB; fits every generation incl. v7x)
        compiler_params=pltpu.CompilerParams(vmem_limit_bytes=16 * 1024 * 1024),
    )(*args)
    return out[:, :NUM_CLASSES]                                          # head(x)[:, 0]


# ---------------- deterministic parameter init ----------------
def init_params(key):
    ks = jax.random.split(key, 4 + DEPTH)

    def nrm(k, shape, std=0.02):
        return jax.random.normal(k, shape, jnp.float32) * std

    params = {
        "w_patch": nrm(ks[0], (PATCH_FEATS, EMBED_DIM)),
        "b_patch": jnp.zeros((1, EMBED_DIM), jnp.float32),
        "cls_token": jnp.zeros((1, 1, EMBED_DIM), jnp.float32),
        "pos_embed": nrm(ks[1], (1, N_TOK, EMBED_DIM)),
        "ln_g": jnp.ones((1, EMBED_DIM), jnp.float32),
        "ln_b": jnp.zeros((1, EMBED_DIM), jnp.float32),
        "w_head": nrm(ks[2], (EMBED_DIM, NUM_CLASSES)),
        "b_head": jnp.zeros((1, NUM_CLASSES), jnp.float32),
    }
    blocks = []
    for i in range(DEPTH):
        bk = jax.random.split(ks[3 + i], 4)
        blocks.append((
            jnp.ones((1, EMBED_DIM), jnp.float32),          # ln1 gamma
            jnp.zeros((1, EMBED_DIM), jnp.float32),         # ln1 beta
            nrm(bk[0], (EMBED_DIM, 3 * EMBED_DIM)),         # W_qkv  (qkv_bias=False)
            nrm(bk[1], (EMBED_DIM, EMBED_DIM)),             # W_proj
            jnp.zeros((1, EMBED_DIM), jnp.float32),         # b_proj
            jnp.ones((1, EMBED_DIM), jnp.float32),          # ln2 gamma
            jnp.zeros((1, EMBED_DIM), jnp.float32),         # ln2 beta
            nrm(bk[2], (EMBED_DIM, MLP_HIDDEN)),            # W_fc1
            jnp.zeros((1, MLP_HIDDEN), jnp.float32),        # b_fc1
            nrm(bk[3], (MLP_HIDDEN, EMBED_DIM)),            # W_fc2
            jnp.zeros((1, EMBED_DIM), jnp.float32),         # b_fc2
        ))
    params["blocks"] = blocks
    return params


if __name__ == "__main__":
    key = jax.random.PRNGKey(0)
    pkey, xkey = jax.random.split(key)
    params = init_params(pkey)
    x = jax.random.normal(xkey, (2, IN_CHANS, IMG, IMG), jnp.float32)   # NCHW, like PyTorch

    logits = jax.jit(vit_forward)(x, params)
    logits = jax.block_until_ready(logits)
    assert logits.shape == (2, NUM_CLASSES), logits.shape
    assert bool(jnp.all(jnp.isfinite(logits)))
    print("KERNEL_OK")
</pallas_src>

<mosaic_0001>
module attributes {stable_mosaic.version = 11 : i64} {
  func.func @_vit_fwd_kernel(%arg0: memref<48x48xf32, #tpu.memory_space<vmem>>, %arg1: memref<48x32xf32, #tpu.memory_space<vmem>>, %arg2: memref<24x32xf32, #tpu.memory_space<vmem>>, %arg3: memref<1x32xf32, #tpu.memory_space<vmem>>, %arg4: memref<1x32xf32, #tpu.memory_space<vmem>>, %arg5: memref<32x96xf32, #tpu.memory_space<vmem>>, %arg6: memref<32x32xf32, #tpu.memory_space<vmem>>, %arg7: memref<1x32xf32, #tpu.memory_space<vmem>>, %arg8: memref<1x32xf32, #tpu.memory_space<vmem>>, %arg9: memref<1x32xf32, #tpu.memory_space<vmem>>, %arg10: memref<32x64xf32, #tpu.memory_space<vmem>>, %arg11: memref<1x64xf32, #tpu.memory_space<vmem>>, %arg12: memref<64x32xf32, #tpu.memory_space<vmem>>, %arg13: memref<1x32xf32, #tpu.memory_space<vmem>>, %arg14: memref<1x32xf32, #tpu.memory_space<vmem>>, %arg15: memref<1x32xf32, #tpu.memory_space<vmem>>, %arg16: memref<32x96xf32, #tpu.memory_space<vmem>>, %arg17: memref<32x32xf32, #tpu.memory_space<vmem>>, %arg18: memref<1x32xf32, #tpu.memory_space<vmem>>, %arg19: memref<1x32xf32, #tpu.memory_space<vmem>>, %arg20: memref<1x32xf32, #tpu.memory_space<vmem>>, %arg21: memref<32x64xf32, #tpu.memory_space<vmem>>, %arg22: memref<1x64xf32, #tpu.memory_space<vmem>>, %arg23: memref<64x32xf32, #tpu.memory_space<vmem>>, %arg24: memref<1x32xf32, #tpu.memory_space<vmem>>, %arg25: memref<1x32xf32, #tpu.memory_space<vmem>>, %arg26: memref<1x32xf32, #tpu.memory_space<vmem>>, %arg27: memref<32x128xf32, #tpu.memory_space<vmem>>, %arg28: memref<1x128xf32, #tpu.memory_space<vmem>>, %arg29: memref<2x128xf32, #tpu.memory_space<vmem>>) attributes {dimension_semantics = [], scalar_prefetch = 0 : i64, scratch_operands = 0 : i64, tpu.core_type = #tpu.core_type<tc>} {
    %c0 = arith.constant 0 : index
    %c0_0 = arith.constant 0 : index
    %0 = vector.load %arg0[%c0, %c0_0] : memref<48x48xf32, #tpu.memory_space<vmem>>, vector<48x48xf32>
    %c0_1 = arith.constant 0 : index
    %c0_2 = arith.constant 0 : index
    %1 = vector.load %arg1[%c0_1, %c0_2] : memref<48x32xf32, #tpu.memory_space<vmem>>, vector<48x32xf32>
    %cst = arith.constant dense<0.000000e+00> : vector<48x32xf32>
    %2 = tpu.matmul %0, %1, %cst {dimension_numbers = #tpu.dot_dimension_numbers<[1], [0], [0], [1], [0, 0, 1, 1], [], []>} : vector<48x48xf32>, vector<48x32xf32>, vector<48x32xf32> -> vector<48x32xf32>
    %3 = vector.shape_cast %2 : vector<48x32xf32> to vector<2x24x32xf32>
    %c0_3 = arith.constant 0 : index
    %c0_4 = arith.constant 0 : index
    %4 = vector.load %arg2[%c0_3, %c0_4] : memref<24x32xf32, #tpu.memory_space<vmem>>, vector<24x32xf32>
    %5 = vector.shape_cast %4 : vector<24x32xf32> to vector<1x24x32xf32>
    %6 = vector.broadcast %5 : vector<1x24x32xf32> to vector<2x24x32xf32>
    %7 = arith.addf %3, %6 : vector<2x24x32xf32>
    %8 = vector.shape_cast %7 : vector<2x24x32xf32> to vector<48x32xf32>
    %9 = tpu.iota {dimensions = array<i32: 1>} : vector<24x24xi32>
    %c17_i32 = arith.constant 17 : i32
    %10 = vector.broadcast %c17_i32 : i32 to vector<24x24xi32>
    %11 = arith.cmpi slt, %9, %10 : vector<24x24xi32>
    %cst_5 = arith.constant 0.000000e+00 : f32
    %cst_6 = arith.constant -1.000000e+30 : f32
    %12 = vector.broadcast %cst_5 : f32 to vector<24x24xf32>
    %13 = vector.broadcast %cst_6 : f32 to vector<24x24xf32>
    %14 = arith.select %11, %12, %13 : vector<24x24xi1>, vector<24x24xf32>
    %15 = vector.shape_cast %14 : vector<24x24xf32> to vector<1x24x24xf32>
    %16 = vector.broadcast %15 : vector<1x24x24xf32> to vector<2x24x24xf32>
    %c0_7 = arith.constant 0 : index
    %c0_8 = arith.constant 0 : index
    %17 = vector.load %arg3[%c0_7, %c0_8] : memref<1x32xf32, #tpu.memory_space<vmem>>, vector<1x32xf32>
    %c0_9 = arith.constant 0 : index
    %c0_10 = arith.constant 0 : index
    %18 = vector.load %arg4[%c0_9, %c0_10] : memref<1x32xf32, #tpu.memory_space<vmem>>, vector<1x32xf32>
    %cst_11 = arith.constant dense<0.000000e+00> : vector<48xf32>
    %19 = vector.multi_reduction <add>, %8, %cst_11 [1] : vector<48x32xf32> to vector<48xf32>
    %20 = vector.shape_cast %19 : vector<48xf32> to vector<48x1xf32>
    %cst_12 = arith.constant 3.200000e+01 : f32
    %21 = vector.broadcast %cst_12 : f32 to vector<48x1xf32>
    %22 = arith.divf %20, %21 : vector<48x1xf32>
    %23 = vector.broadcast %22 : vector<48x1xf32> to vector<48x32xf32>
    %24 = arith.subf %8, %23 : vector<48x32xf32>
    %25 = arith.mulf %24, %24 : vector<48x32xf32>
    %cst_13 = arith.constant dense<0.000000e+00> : vector<48xf32>
    %26 = vector.multi_reduction <add>, %25, %cst_13 [1] : vector<48x32xf32> to vector<48xf32>
    %27 = vector.shape_cast %26 : vector<48xf32> to vector<48x1xf32>
    %cst_14 = arith.constant 3.200000e+01 : f32
    %28 = vector.broadcast %cst_14 : f32 to vector<48x1xf32>
    %29 = arith.divf %27, %28 : vector<48x1xf32>
    %cst_15 = arith.constant 9.99999974E-6 : f32
    %30 = vector.broadcast %cst_15 : f32 to vector<48x1xf32>
    %31 = arith.addf %29, %30 : vector<48x1xf32>
    %32 = math.rsqrt %31 : vector<48x1xf32>
    %33 = vector.broadcast %32 : vector<48x1xf32> to vector<48x32xf32>
    %34 = arith.mulf %24, %33 : vector<48x32xf32>
    %35 = vector.broadcast %17 : vector<1x32xf32> to vector<48x32xf32>
    %36 = arith.mulf %34, %35 : vector<48x32xf32>
    %37 = vector.broadcast %18 : vector<1x32xf32> to vector<48x32xf32>
    %38 = arith.addf %36, %37 : vector<48x32xf32>
    %c0_16 = arith.constant 0 : index
    %c0_17 = arith.constant 0 : index
    %39 = vector.load %arg5[%c0_16, %c0_17] : memref<32x96xf32, #tpu.memory_space<vmem>>, vector<32x96xf32>
    %cst_18 = arith.constant dense<0.000000e+00> : vector<48x96xf32>
    %40 = tpu.matmul %38, %39, %cst_18 {dimension_numbers = #tpu.dot_dimension_numbers<[1], [0], [0], [1], [0, 0, 1, 1], [], []>} : vector<48x32xf32>, vector<32x96xf32>, vector<48x96xf32> -> vector<48x96xf32>
    %41 = vector.extract_strided_slice %40 {offsets = [0, 0], sizes = [48, 32], strides = [1, 1]} : vector<48x96xf32> to vector<48x32xf32>
    %cst_19 = arith.constant 0.353553385 : f32
    %42 = vector.broadcast %cst_19 : f32 to vector<48x32xf32>
    %43 = arith.mulf %41, %42 : vector<48x32xf32>
    %44 = vector.extract_strided_slice %40 {offsets = [0, 32], sizes = [48, 32], strides = [1, 1]} : vector<48x96xf32> to vector<48x32xf32>
    %45 = vector.extract_strided_slice %40 {offsets = [0, 64], sizes = [48, 32], strides = [1, 1]} : vector<48x96xf32> to vector<48x32xf32>
    %46 = vector.shape_cast %43 : vector<48x32xf32> to vector<2x24x32xf32>
    %47 = vector.shape_cast %44 : vector<48x32xf32> to vector<2x24x32xf32>
    %48 = vector.shape_cast %45 : vector<48x32xf32> to vector<2x24x32xf32>
    %49 = vector.extract_strided_slice %46 {offsets = [0, 0, 0], sizes = [2, 24, 8], strides = [1, 1, 1]} : vector<2x24x32xf32> to vector<2x24x8xf32>
    %50 = vector.extract_strided_slice %47 {offsets = [0, 0, 0], sizes = [2, 24, 8], strides = [1, 1, 1]} : vector<2x24x32xf32> to vector<2x24x8xf32>
    %51 = vector.extract_strided_slice %48 {offsets = [0, 0, 0], sizes = [2, 24, 8], strides = [1, 1, 1]} : vector<2x24x32xf32> to vector<2x24x8xf32>
    "tpu.trace_start"() <{level = 10 : i32, message = "bqd,bkd->bqk"}> : () -> ()
    %cst_20 = arith.constant dense<0.000000e+00> : vector<2x24x24xf32>
    %52 = tpu.matmul %49, %50, %cst_20 {dimension_numbers = #tpu.dot_dimension_numbers<[2], [2], [1], [1], [0, 0, 0, 1, 1, 1], [0], [0]>} : vector<2x24x8xf32>, vector<2x24x8xf32>, vector<2x24x24xf32> -> vector<2x24x24xf32>
    "tpu.trace_stop"() : () -> ()
    %53 = arith.addf %52, %16 : vector<2x24x24xf32>
    %cst_21 = arith.constant dense<0xFF800000> : vector<2x24xf32>
    %54 = vector.multi_reduction <maximumf>, %53, %cst_21 [2] : vector<2x24x24xf32> to vector<2x24xf32>
    %55 = vector.shape_cast %54 : vector<2x24xf32> to vector<2x24x1xf32>
    %56 = vector.broadcast %55 : vector<2x24x1xf32> to vector<2x24x24xf32>
    %57 = arith.subf %53, %56 : vector<2x24x24xf32>
    %58 = math.exp %57 : vector<2x24x24xf32>
    %cst_22 = arith.constant dense<0.000000e+00> : vector<2x24xf32>
    %59 = vector.multi_reduction <add>, %58, %cst_22 [2] : vector<2x24x24xf32> to vector<2x24xf32>
    %60 = vector.shape_cast %59 : vector<2x24xf32> to vector<2x24x1xf32>
    %61 = tpu.reciprocal %60 : vector<2x24x1xf32> -> vector<2x24x1xf32>
    %62 = vector.broadcast %61 : vector<2x24x1xf32> to vector<2x24x24xf32>
    %63 = arith.mulf %58, %62 : vector<2x24x24xf32>
    "tpu.trace_start"() <{level = 10 : i32, message = "bqk,bkd->bqd"}> : () -> ()
    %cst_23 = arith.constant dense<0.000000e+00> : vector<2x24x8xf32>
    %64 = tpu.matmul %63, %51, %cst_23 {dimension_numbers = #tpu.dot_dimension_numbers<[2], [1], [1], [2], [0, 0, 0, 1, 1, 2], [0], [0]>} : vector<2x24x24xf32>, vector<2x24x8xf32>, vector<2x24x8xf32> -> vector<2x24x8xf32>
    "tpu.trace_stop"() : () -> ()
    %65 = vector.shape_cast %64 : vector<2x24x8xf32> to vector<48x8xf32>
    %66 = vector.extract_strided_slice %46 {offsets = [0, 0, 8], sizes = [2, 24, 8], strides = [1, 1, 1]} : vector<2x24x32xf32> to vector<2x24x8xf32>
    %67 = vector.extract_strided_slice %47 {offsets = [0, 0, 8], sizes = [2, 24, 8], strides = [1, 1, 1]} : vector<2x24x32xf32> to vector<2x24x8xf32>
    %68 = vector.extract_strided_slice %48 {offsets = [0, 0, 8], sizes = [2, 24, 8], strides = [1, 1, 1]} : vector<2x24x32xf32> to vector<2x24x8xf32>
    "tpu.trace_start"() <{level = 10 : i32, message = "bqd,bkd->bqk"}> : () -> ()
    %cst_24 = arith.constant dense<0.000000e+00> : vector<2x24x24xf32>
    %69 = tpu.matmul %66, %67, %cst_24 {dimension_numbers = #tpu.dot_dimension_numbers<[2], [2], [1], [1], [0, 0, 0, 1, 1, 1], [0], [0]>} : vector<2x24x8xf32>, vector<2x24x8xf32>, vector<2x24x24xf32> -> vector<2x24x24xf32>
    "tpu.trace_stop"() : () -> ()
    %70 = arith.addf %69, %16 : vector<2x24x24xf32>
    %cst_25 = arith.constant dense<0xFF800000> : vector<2x24xf32>
    %71 = vector.multi_reduction <maximumf>, %70, %cst_25 [2] : vector<2x24x24xf32> to vector<2x24xf32>
    %72 = vector.shape_cast %71 : vector<2x24xf32> to vector<2x24x1xf32>
    %73 = vector.broadcast %72 : vector<2x24x1xf32> to vector<2x24x24xf32>
    %74 = arith.subf %70, %73 : vector<2x24x24xf32>
    %75 = math.exp %74 : vector<2x24x24xf32>
    %cst_26 = arith.constant dense<0.000000e+00> : vector<2x24xf32>
    %76 = vector.multi_reduction <add>, %75, %cst_26 [2] : vector<2x24x24xf32> to vector<2x24xf32>
    %77 = vector.shape_cast %76 : vector<2x24xf32> to vector<2x24x1xf32>
    %78 = tpu.reciprocal %77 : vector<2x24x1xf32> -> vector<2x24x1xf32>
    %79 = vector.broadcast %78 : vector<2x24x1xf32> to vector<2x24x24xf32>
    %80 = arith.mulf %75, %79 : vector<2x24x24xf32>
    "tpu.trace_start"() <{level = 10 : i32, message = "bqk,bkd->bqd"}> : () -> ()
    %cst_27 = arith.constant dense<0.000000e+00> : vector<2x24x8xf32>
    %81 = tpu.matmul %80, %68, %cst_27 {dimension_numbers = #tpu.dot_dimension_numbers<[2], [1], [1], [2], [0, 0, 0, 1, 1, 2], [0], [0]>} : vector<2x24x24xf32>, vector<2x24x8xf32>, vector<2x24x8xf32> -> vector<2x24x8xf32>
    "tpu.trace_stop"() : () -> ()
    %82 = vector.shape_cast %81 : vector<2x24x8xf32> to vector<48x8xf32>
    %83 = vector.extract_strided_slice %46 {offsets = [0, 0, 16], sizes = [2, 24, 8], strides = [1, 1, 1]} : vector<2x24x32xf32> to vector<2x24x8xf32>
    %84 = vector.extract_strided_slice %47 {offsets = [0, 0, 16], sizes = [2, 24, 8], strides = [1, 1, 1]} : vector<2x24x32xf32> to vector<2x24x8xf32>
    %85 = vector.extract_strided_slice %48 {offsets = [0, 0, 16], sizes = [2, 24, 8], strides = [1, 1, 1]} : vector<2x24x32xf32> to vector<2x24x8xf32>
    "tpu.trace_start"() <{level = 10 : i32, message = "bqd,bkd->bqk"}> : () -> ()
    %cst_28 = arith.constant dense<0.000000e+00> : vector<2x24x24xf32>
    %86 = tpu.matmul %83, %84, %cst_28 {dimension_numbers = #tpu.dot_dimension_numbers<[2], [2], [1], [1], [0, 0, 0, 1, 1, 1], [0], [0]>} : vector<2x24x8xf32>, vector<2x24x8xf32>, vector<2x24x24xf32> -> vector<2x24x24xf32>
    "tpu.trace_stop"() : () -> ()
    %87 = arith.addf %86, %16 : vector<2x24x24xf32>
    %cst_29 = arith.constant dense<0xFF800000> : vector<2x24xf32>
    %88 = vector.multi_reduction <maximumf>, %87, %cst_29 [2] : vector<2x24x24xf32> to vector<2x24xf32>
    %89 = vector.shape_cast %88 : vector<2x24xf32> to vector<2x24x1xf32>
    %90 = vector.broadcast %89 : vector<2x24x1xf32> to vector<2x24x24xf32>
    %91 = arith.subf %87, %90 : vector<2x24x24xf32>
    %92 = math.exp %91 : vector<2x24x24xf32>
    %cst_30 = arith.constant dense<0.000000e+00> : vector<2x24xf32>
    %93 = vector.multi_reduction <add>, %92, %cst_30 [2] : vector<2x24x24xf32> to vector<2x24xf32>
    %94 = vector.shape_cast %93 : vector<2x24xf32> to vector<2x24x1xf32>
    %95 = tpu.reciprocal %94 : vector<2x24x1xf32> -> vector<2x24x1xf32>
    %96 = vector.broadcast %95 : vector<2x24x1xf32> to vector<2x24x24xf32>
    %97 = arith.mulf %92, %96 : vector<2x24x24xf32>
    "tpu.trace_start"() <{level = 10 : i32, message = "bqk,bkd->bqd"}> : () -> ()
    %cst_31 = arith.constant dense<0.000000e+00> : vector<2x24x8xf32>
    %98 = tpu.matmul %97, %85, %cst_31 {dimension_numbers = #tpu.dot_dimension_numbers<[2], [1], [1], [2], [0, 0, 0, 1, 1, 2], [0], [0]>} : vector<2x24x24xf32>, vector<2x24x8xf32>, vector<2x24x8xf32> -> vector<2x24x8xf32>
    "tpu.trace_stop"() : () -> ()
    %99 = vector.shape_cast %98 : vector<2x24x8xf32> to vector<48x8xf32>
    %100 = vector.extract_strided_slice %46 {offsets = [0, 0, 24], sizes = [2, 24, 8], strides = [1, 1, 1]} : vector<2x24x32xf32> to vector<2x24x8xf32>
    %101 = vector.extract_strided_slice %47 {offsets = [0, 0, 24], sizes = [2, 24, 8], strides = [1, 1, 1]} : vector<2x24x32xf32> to vector<2x24x8xf32>
    %102 = vector.extract_strided_slice %48 {offsets = [0, 0, 24], sizes = [2, 24, 8], strides = [1, 1, 1]} : vector<2x24x32xf32> to vector<2x24x8xf32>
    "tpu.trace_start"() <{level = 10 : i32, message = "bqd,bkd->bqk"}> : () -> ()
    %cst_32 = arith.constant dense<0.000000e+00> : vector<2x24x24xf32>
    %103 = tpu.matmul %100, %101, %cst_32 {dimension_numbers = #tpu.dot_dimension_numbers<[2], [2], [1], [1], [0, 0, 0, 1, 1, 1], [0], [0]>} : vector<2x24x8xf32>, vector<2x24x8xf32>, vector<2x24x24xf32> -> vector<2x24x24xf32>
    "tpu.trace_stop"() : () -> ()
    %104 = arith.addf %103, %16 : vector<2x24x24xf32>
    %cst_33 = arith.constant dense<0xFF800000> : vector<2x24xf32>
    %105 = vector.multi_reduction <maximumf>, %104, %cst_33 [2] : vector<2x24x24xf32> to vector<2x24xf32>
    %106 = vector.shape_cast %105 : vector<2x24xf32> to vector<2x24x1xf32>
    %107 = vector.broadcast %106 : vector<2x24x1xf32> to vector<2x24x24xf32>
    %108 = arith.subf %104, %107 : vector<2x24x24xf32>
    %109 = math.exp %108 : vector<2x24x24xf32>
    %cst_34 = arith.constant dense<0.000000e+00> : vector<2x24xf32>
    %110 = vector.multi_reduction <add>, %109, %cst_34 [2] : vector<2x24x24xf32> to vector<2x24xf32>
    %111 = vector.shape_cast %110 : vector<2x24xf32> to vector<2x24x1xf32>
    %112 = tpu.reciprocal %111 : vector<2x24x1xf32> -> vector<2x24x1xf32>
    %113 = vector.broadcast %112 : vector<2x24x1xf32> to vector<2x24x24xf32>
    %114 = arith.mulf %109, %113 : vector<2x24x24xf32>
    "tpu.trace_start"() <{level = 10 : i32, message = "bqk,bkd->bqd"}> : () -> ()
    %cst_35 = arith.constant dense<0.000000e+00> : vector<2x24x8xf32>
    %115 = tpu.matmul %114, %102, %cst_35 {dimension_numbers = #tpu.dot_dimension_numbers<[2], [1], [1], [2], [0, 0, 0, 1, 1, 2], [0], [0]>} : vector<2x24x24xf32>, vector<2x24x8xf32>, vector<2x24x8xf32> -> vector<2x24x8xf32>
    "tpu.trace_stop"() : () -> ()
    %116 = vector.shape_cast %115 : vector<2x24x8xf32> to vector<48x8xf32>
    %117 = tpu.concatenate %65, %82, %99, %116 in 1 : vector<48x8xf32>, vector<48x8xf32>, vector<48x8xf32>, vector<48x8xf32> -> vector<48x32xf32>
    %c0_36 = arith.constant 0 : index
    %c0_37 = arith.constant 0 : index
    %118 = vector.load %arg6[%c0_36, %c0_37] : memref<32x32xf32, #tpu.memory_space<vmem>>, vector<32x32xf32>
    %cst_38 = arith.constant dense<0.000000e+00> : vector<48x32xf32>
    %119 = tpu.matmul %117, %118, %cst_38 {dimension_numbers = #tpu.dot_dimension_numbers<[1], [0], [0], [1], [0, 0, 1, 1], [], []>} : vector<48x32xf32>, vector<32x32xf32>, vector<48x32xf32> -> vector<48x32xf32>
    %120 = arith.addf %8, %119 : vector<48x32xf32>
    %c0_39 = arith.constant 0 : index
    %c0_40 = arith.constant 0 : index
    %121 = vector.load %arg7[%c0_39, %c0_40] : memref<1x32xf32, #tpu.memory_space<vmem>>, vector<1x32xf32>
    %122 = vector.broadcast %121 : vector<1x32xf32> to vector<48x32xf32>
    %123 = arith.addf %120, %122 : vector<48x32xf32>
    %c0_41 = arith.constant 0 : index
    %c0_42 = arith.constant 0 : index
    %124 = vector.load %arg8[%c0_41, %c0_42] : memref<1x32xf32, #tpu.memory_space<vmem>>, vector<1x32xf32>
    %c0_43 = arith.constant 0 : index
    %c0_44 = arith.constant 0 : index
    %125 = vector.load %arg9[%c0_43, %c0_44] : memref<1x32xf32, #tpu.memory_space<vmem>>, vector<1x32xf32>
    %cst_45 = arith.constant dense<0.000000e+00> : vector<48xf32>
    %126 = vector.multi_reduction <add>, %123, %cst_45 [1] : vector<48x32xf32> to vector<48xf32>
    %127 = vector.shape_cast %126 : vector<48xf32> to vector<48x1xf32>
    %cst_46 = arith.constant 3.200000e+01 : f32
    %128 = vector.broadcast %cst_46 : f32 to vector<48x1xf32>
    %129 = arith.divf %127, %128 : vector<48x1xf32>
    %130 = vector.broadcast %129 : vector<48x1xf32> to vector<48x32xf32>
    %131 = arith.subf %123, %130 : vector<48x32xf32>
    %132 = arith.mulf %131, %131 : vector<48x32xf32>
    %cst_47 = arith.constant dense<0.000000e+00> : vector<48xf32>
    %133 = vector.multi_reduction <add>, %132, %cst_47 [1] : vector<48x32xf32> to vector<48xf32>
    %134 = vector.shape_cast %133 : vector<48xf32> to vector<48x1xf32>
    %cst_48 = arith.constant 3.200000e+01 : f32
    %135 = vector.broadcast %cst_48 : f32 to vector<48x1xf32>
    %136 = arith.divf %134, %135 : vector<48x1xf32>
    %cst_49 = arith.constant 9.99999974E-6 : f32
    %137 = vector.broadcast %cst_49 : f32 to vector<48x1xf32>
    %138 = arith.addf %136, %137 : vector<48x1xf32>
    %139 = math.rsqrt %138 : vector<48x1xf32>
    %140 = vector.broadcast %139 : vector<48x1xf32> to vector<48x32xf32>
    %141 = arith.mulf %131, %140 : vector<48x32xf32>
    %142 = vector.broadcast %124 : vector<1x32xf32> to vector<48x32xf32>
    %143 = arith.mulf %141, %142 : vector<48x32xf32>
    %144 = vector.broadcast %125 : vector<1x32xf32> to vector<48x32xf32>
    %145 = arith.addf %143, %144 : vector<48x32xf32>
    %c0_50 = arith.constant 0 : index
    %c0_51 = arith.constant 0 : index
    %146 = vector.load %arg10[%c0_50, %c0_51] : memref<32x64xf32, #tpu.memory_space<vmem>>, vector<32x64xf32>
    %cst_52 = arith.constant dense<0.000000e+00> : vector<48x64xf32>
    %147 = tpu.matmul %145, %146, %cst_52 {dimension_numbers = #tpu.dot_dimension_numbers<[1], [0], [0], [1], [0, 0, 1, 1], [], []>} : vector<48x32xf32>, vector<32x64xf32>, vector<48x64xf32> -> vector<48x64xf32>
    %c0_53 = arith.constant 0 : index
    %c0_54 = arith.constant 0 : index
    %148 = vector.load %arg11[%c0_53, %c0_54] : memref<1x64xf32, #tpu.memory_space<vmem>>, vector<1x64xf32>
    %149 = vector.broadcast %148 : vector<1x64xf32> to vector<48x64xf32>
    %150 = arith.addf %147, %149 : vector<48x64xf32>
    %cst_55 = arith.constant 5.000000e-01 : f32
    %151 = vector.broadcast %cst_55 : f32 to vector<48x64xf32>
    %152 = arith.mulf %151, %150 : vector<48x64xf32>
    %cst_56 = arith.constant 0.707106769 : f32
    %153 = vector.broadcast %cst_56 : f32 to vector<48x64xf32>
    %154 = arith.mulf %150, %153 : vector<48x64xf32>
    %155 = math.absf %154 : vector<48x64xf32>
    %cst_57 = arith.constant 0.327591091 : f32
    %156 = vector.broadcast %cst_57 : f32 to vector<48x64xf32>
    %157 = arith.mulf %156, %155 : vector<48x64xf32>
    %cst_58 = arith.constant 1.000000e+00 : f32
    %158 = vector.broadcast %cst_58 : f32 to vector<48x64xf32>
    %159 = arith.addf %158, %157 : vector<48x64xf32>
    %cst_59 = arith.constant 1.000000e+00 : f32
    %160 = vector.broadcast %cst_59 : f32 to vector<48x64xf32>
    %161 = arith.divf %160, %159 : vector<48x64xf32>
    %cst_60 = arith.constant 1.06140542 : f32
    %162 = vector.broadcast %cst_60 : f32 to vector<48x64xf32>
    %163 = arith.mulf %162, %161 : vector<48x64xf32>
    %cst_61 = arith.constant -1.45315206 : f32
    %164 = vector.broadcast %cst_61 : f32 to vector<48x64xf32>
    %165 = arith.addf %163, %164 : vector<48x64xf32>
    %166 = arith.mulf %165, %161 : vector<48x64xf32>
    %cst_62 = arith.constant 1.42141378 : f32
    %167 = vector.broadcast %cst_62 : f32 to vector<48x64xf32>
    %168 = arith.addf %166, %167 : vector<48x64xf32>
    %169 = arith.mulf %168, %161 : vector<48x64xf32>
    %cst_63 = arith.constant -0.284496725 : f32
    %170 = vector.broadcast %cst_63 : f32 to vector<48x64xf32>
    %171 = arith.addf %169, %170 : vector<48x64xf32>
    %172 = arith.mulf %171, %161 : vector<48x64xf32>
    %cst_64 = arith.constant 0.254829586 : f32
    %173 = vector.broadcast %cst_64 : f32 to vector<48x64xf32>
    %174 = arith.addf %172, %173 : vector<48x64xf32>
    %175 = arith.mulf %174, %161 : vector<48x64xf32>
    %cst_65 = arith.constant 0.000000e+00 : f32
    %176 = vector.broadcast %cst_65 : f32 to vector<48x64xf32>
    %177 = arith.subf %176, %155 : vector<48x64xf32>
    %178 = arith.mulf %177, %155 : vector<48x64xf32>
    %179 = math.exp %178 : vector<48x64xf32>
    %180 = arith.mulf %175, %179 : vector<48x64xf32>
    %cst_66 = arith.constant 1.000000e+00 : f32
    %181 = vector.broadcast %cst_66 : f32 to vector<48x64xf32>
    %182 = arith.subf %181, %180 : vector<48x64xf32>
    %cst_67 = arith.constant 0.000000e+00 : f32
    %183 = vector.broadcast %cst_67 : f32 to vector<48x64xf32>
    %184 = arith.cmpf oge, %154, %183 : vector<48x64xf32>
    %cst_68 = arith.constant 0.000000e+00 : f32
    %185 = vector.broadcast %cst_68 : f32 to vector<48x64xf32>
    %186 = arith.subf %185, %182 : vector<48x64xf32>
    %187 = arith.select %184, %182, %186 : vector<48x64xi1>, vector<48x64xf32>
    %cst_69 = arith.constant 1.000000e+00 : f32
    %188 = vector.broadcast %cst_69 : f32 to vector<48x64xf32>
    %189 = arith.addf %188, %187 : vector<48x64xf32>
    %190 = arith.mulf %152, %189 : vector<48x64xf32>
    %c0_70 = arith.constant 0 : index
    %c0_71 = arith.constant 0 : index
    %191 = vector.load %arg12[%c0_70, %c0_71] : memref<64x32xf32, #tpu.memory_space<vmem>>, vector<64x32xf32>
    %cst_72 = arith.constant dense<0.000000e+00> : vector<48x32xf32>
    %192 = tpu.matmul %190, %191, %cst_72 {dimension_numbers = #tpu.dot_dimension_numbers<[1], [0], [0], [1], [0, 0, 1, 1], [], []>} : vector<48x64xf32>, vector<64x32xf32>, vector<48x32xf32> -> vector<48x32xf32>
    %c0_73 = arith.constant 0 : index
    %c0_74 = arith.constant 0 : index
    %193 = vector.load %arg13[%c0_73, %c0_74] : memref<1x32xf32, #tpu.memory_space<vmem>>, vector<1x32xf32>
    %194 = vector.broadcast %193 : vector<1x32xf32> to vector<48x32xf32>
    %195 = arith.addf %192, %194 : vector<48x32xf32>
    %196 = arith.addf %123, %195 : vector<48x32xf32>
    %c0_75 = arith.constant 0 : index
    %c0_76 = arith.constant 0 : index
    %197 = vector.load %arg14[%c0_75, %c0_76] : memref<1x32xf32, #tpu.memory_space<vmem>>, vector<1x32xf32>
    %c0_77 = arith.constant 0 : index
    %c0_78 = arith.constant 0 : index
    %198 = vector.load %arg15[%c0_77, %c0_78] : memref<1x32xf32, #tpu.memory_space<vmem>>, vector<1x32xf32>
    %cst_79 = arith.constant dense<0.000000e+00> : vector<48xf32>
    %199 = vector.multi_reduction <add>, %196, %cst_79 [1] : vector<48x32xf32> to vector<48xf32>
    %200 = vector.shape_cast %199 : vector<48xf32> to vector<48x1xf32>
    %cst_80 = arith.constant 3.200000e+01 : f32
    %201 = vector.broadcast %cst_80 : f32 to vector<48x1xf32>
    %202 = arith.divf %200, %201 : vector<48x1xf32>
    %203 = vector.broadcast %202 : vector<48x1xf32> to vector<48x32xf32>
    %204 = arith.subf %196, %203 : vector<48x32xf32>
    %205 = arith.mulf %204, %204 : vector<48x32xf32>
    %cst_81 = arith.constant dense<0.000000e+00> : vector<48xf32>
    %206 = vector.multi_reduction <add>, %205, %cst_81 [1] : vector<48x32xf32> to vector<48xf32>
    %207 = vector.shape_cast %206 : vector<48xf32> to vector<48x1xf32>
    %cst_82 = arith.constant 3.200000e+01 : f32
    %208 = vector.broadcast %cst_82 : f32 to vector<48x1xf32>
    %209 = arith.divf %207, %208 : vector<48x1xf32>
    %cst_83 = arith.constant 9.99999974E-6 : f32
    %210 = vector.broadcast %cst_83 : f32 to vector<48x1xf32>
    %211 = arith.addf %209, %210 : vector<48x1xf32>
    %212 = math.rsqrt %211 : vector<48x1xf32>
    %213 = vector.broadcast %212 : vector<48x1xf32> to vector<48x32xf32>
    %214 = arith.mulf %204, %213 : vector<48x32xf32>
    %215 = vector.broadcast %197 : vector<1x32xf32> to vector<48x32xf32>
    %216 = arith.mulf %214, %215 : vector<48x32xf32>
    %217 = vector.broadcast %198 : vector<1x32xf32> to vector<48x32xf32>
    %218 = arith.addf %216, %217 : vector<48x32xf32>
    %c0_84 = arith.constant 0 : index
    %c0_85 = arith.constant 0 : index
    %219 = vector.load %arg16[%c0_84, %c0_85] : memref<32x96xf32, #tpu.memory_space<vmem>>, vector<32x96xf32>
    %cst_86 = arith.constant dense<0.000000e+00> : vector<48x96xf32>
    %220 = tpu.matmul %218, %219, %cst_86 {dimension_numbers = #tpu.dot_dimension_numbers<[1], [0], [0], [1], [0, 0, 1, 1], [], []>} : vector<48x32xf32>, vector<32x96xf32>, vector<48x96xf32> -> vector<48x96xf32>
    %221 = vector.extract_strided_slice %220 {offsets = [0, 0], sizes = [48, 32], strides = [1, 1]} : vector<48x96xf32> to vector<48x32xf32>
    %cst_87 = arith.constant 0.353553385 : f32
    %222 = vector.broadcast %cst_87 : f32 to vector<48x32xf32>
    %223 = arith.mulf %221, %222 : vector<48x32xf32>
    %224 = vector.extract_strided_slice %220 {offsets = [0, 32], sizes = [48, 32], strides = [1, 1]} : vector<48x96xf32> to vector<48x32xf32>
    %225 = vector.extract_strided_slice %220 {offsets = [0, 64], sizes = [48, 32], strides = [1, 1]} : vector<48x96xf32> to vector<48x32xf32>
    %226 = vector.shape_cast %223 : vector<48x32xf32> to vector<2x24x32xf32>
    %227 = vector.shape_cast %224 : vector<48x32xf32> to vector<2x24x32xf32>
    %228 = vector.shape_cast %225 : vector<48x32xf32> to vector<2x24x32xf32>
    %229 = vector.extract_strided_slice %226 {offsets = [0, 0, 0], sizes = [2, 24, 8], strides = [1, 1, 1]} : vector<2x24x32xf32> to vector<2x24x8xf32>
    %230 = vector.extract_strided_slice %227 {offsets = [0, 0, 0], sizes = [2, 24, 8], strides = [1, 1, 1]} : vector<2x24x32xf32> to vector<2x24x8xf32>
    %231 = vector.extract_strided_slice %228 {offsets = [0, 0, 0], sizes = [2, 24, 8], strides = [1, 1, 1]} : vector<2x24x32xf32> to vector<2x24x8xf32>
    "tpu.trace_start"() <{level = 10 : i32, message = "bqd,bkd->bqk"}> : () -> ()
    %cst_88 = arith.constant dense<0.000000e+00> : vector<2x24x24xf32>
    %232 = tpu.matmul %229, %230, %cst_88 {dimension_numbers = #tpu.dot_dimension_numbers<[2], [2], [1], [1], [0, 0, 0, 1, 1, 1], [0], [0]>} : vector<2x24x8xf32>, vector<2x24x8xf32>, vector<2x24x24xf32> -> vector<2x24x24xf32>
    "tpu.trace_stop"() : () -> ()
    %233 = arith.addf %232, %16 : vector<2x24x24xf32>
    %cst_89 = arith.constant dense<0xFF800000> : vector<2x24xf32>
    %234 = vector.multi_reduction <maximumf>, %233, %cst_89 [2] : vector<2x24x24xf32> to vector<2x24xf32>
    %235 = vector.shape_cast %234 : vector<2x24xf32> to vector<2x24x1xf32>
    %236 = vector.broadcast %235 : vector<2x24x1xf32> to vector<2x24x24xf32>
    %237 = arith.subf %233, %236 : vector<2x24x24xf32>
    %238 = math.exp %237 : vector<2x24x24xf32>
    %cst_90 = arith.constant dense<0.000000e+00> : vector<2x24xf32>
    %239 = vector.multi_reduction <add>, %238, %cst_90 [2] : vector<2x24x24xf32> to vector<2x24xf32>
    %240 = vector.shape_cast %239 : vector<2x24xf32> to vector<2x24x1xf32>
    %241 = tpu.reciprocal %240 : vector<2x24x1xf32> -> vector<2x24x1xf32>
    %242 = vector.broadcast %241 : vector<2x24x1xf32> to vector<2x24x24xf32>
    %243 = arith.mulf %238, %242 : vector<2x24x24xf32>
    "tpu.trace_start"() <{level = 10 : i32, message = "bqk,bkd->bqd"}> : () -> ()
    %cst_91 = arith.constant dense<0.000000e+00> : vector<2x24x8xf32>
    %244 = tpu.matmul %243, %231, %cst_91 {dimension_numbers = #tpu.dot_dimension_numbers<[2], [1], [1], [2], [0, 0, 0, 1, 1, 2], [0], [0]>} : vector<2x24x24xf32>, vector<2x24x8xf32>, vector<2x24x8xf32> -> vector<2x24x8xf32>
    "tpu.trace_stop"() : () -> ()
    %245 = vector.shape_cast %244 : vector<2x24x8xf32> to vector<48x8xf32>
    %246 = vector.extract_strided_slice %226 {offsets = [0, 0, 8], sizes = [2, 24, 8], strides = [1, 1, 1]} : vector<2x24x32xf32> to vector<2x24x8xf32>
    %247 = vector.extract_strided_slice %227 {offsets = [0, 0, 8], sizes = [2, 24, 8], strides = [1, 1, 1]} : vector<2x24x32xf32> to vector<2x24x8xf32>
    %248 = vector.extract_strided_slice %228 {offsets = [0, 0, 8], sizes = [2, 24, 8], strides = [1, 1, 1]} : vector<2x24x32xf32> to vector<2x24x8xf32>
    "tpu.trace_start"() <{level = 10 : i32, message = "bqd,bkd->bqk"}> : () -> ()
    %cst_92 = arith.constant dense<0.000000e+00> : vector<2x24x24xf32>
    %249 = tpu.matmul %246, %247, %cst_92 {dimension_numbers = #tpu.dot_dimension_numbers<[2], [2], [1], [1], [0, 0, 0, 1, 1, 1], [0], [0]>} : vector<2x24x8xf32>, vector<2x24x8xf32>, vector<2x24x24xf32> -> vector<2x24x24xf32>
    "tpu.trace_stop"() : () -> ()
    %250 = arith.addf %249, %16 : vector<2x24x24xf32>
    %cst_93 = arith.constant dense<0xFF800000> : vector<2x24xf32>
    %251 = vector.multi_reduction <maximumf>, %250, %cst_93 [2] : vector<2x24x24xf32> to vector<2x24xf32>
    %252 = vector.shape_cast %251 : vector<2x24xf32> to vector<2x24x1xf32>
    %253 = vector.broadcast %252 : vector<2x24x1xf32> to vector<2x24x24xf32>
    %254 = arith.subf %250, %253 : vector<2x24x24xf32>
    %255 = math.exp %254 : vector<2x24x24xf32>
    %cst_94 = arith.constant dense<0.000000e+00> : vector<2x24xf32>
    %256 = vector.multi_reduction <add>, %255, %cst_94 [2] : vector<2x24x24xf32> to vector<2x24xf32>
    %257 = vector.shape_cast %256 : vector<2x24xf32> to vector<2x24x1xf32>
    %258 = tpu.reciprocal %257 : vector<2x24x1xf32> -> vector<2x24x1xf32>
    %259 = vector.broadcast %258 : vector<2x24x1xf32> to vector<2x24x24xf32>
    %260 = arith.mulf %255, %259 : vector<2x24x24xf32>
    "tpu.trace_start"() <{level = 10 : i32, message = "bqk,bkd->bqd"}> : () -> ()
    %cst_95 = arith.constant dense<0.000000e+00> : vector<2x24x8xf32>
    %261 = tpu.matmul %260, %248, %cst_95 {dimension_numbers = #tpu.dot_dimension_numbers<[2], [1], [1], [2], [0, 0, 0, 1, 1, 2], [0], [0]>} : vector<2x24x24xf32>, vector<2x24x8xf32>, vector<2x24x8xf32> -> vector<2x24x8xf32>
    "tpu.trace_stop"() : () -> ()
    %262 = vector.shape_cast %261 : vector<2x24x8xf32> to vector<48x8xf32>
    %263 = vector.extract_strided_slice %226 {offsets = [0, 0, 16], sizes = [2, 24, 8], strides = [1, 1, 1]} : vector<2x24x32xf32> to vector<2x24x8xf32>
    %264 = vector.extract_strided_slice %227 {offsets = [0, 0, 16], sizes = [2, 24, 8], strides = [1, 1, 1]} : vector<2x24x32xf32> to vector<2x24x8xf32>
    %265 = vector.extract_strided_slice %228 {offsets = [0, 0, 16], sizes = [2, 24, 8], strides = [1, 1, 1]} : vector<2x24x32xf32> to vector<2x24x8xf32>
    "tpu.trace_start"() <{level = 10 : i32, message = "bqd,bkd->bqk"}> : () -> ()
    %cst_96 = arith.constant dense<0.000000e+00> : vector<2x24x24xf32>
    %266 = tpu.matmul %263, %264, %cst_96 {dimension_numbers = #tpu.dot_dimension_numbers<[2], [2], [1], [1], [0, 0, 0, 1, 1, 1], [0], [0]>} : vector<2x24x8xf32>, vector<2x24x8xf32>, vector<2x24x24xf32> -> vector<2x24x24xf32>
    "tpu.trace_stop"() : () -> ()
    %267 = arith.addf %266, %16 : vector<2x24x24xf32>
    %cst_97 = arith.constant dense<0xFF800000> : vector<2x24xf32>
    %268 = vector.multi_reduction <maximumf>, %267, %cst_97 [2] : vector<2x24x24xf32> to vector<2x24xf32>
    %269 = vector.shape_cast %268 : vector<2x24xf32> to vector<2x24x1xf32>
    %270 = vector.broadcast %269 : vector<2x24x1xf32> to vector<2x24x24xf32>
    %271 = arith.subf %267, %270 : vector<2x24x24xf32>
    %272 = math.exp %271 : vector<2x24x24xf32>
    %cst_98 = arith.constant dense<0.000000e+00> : vector<2x24xf32>
    %273 = vector.multi_reduction <add>, %272, %cst_98 [2] : vector<2x24x24xf32> to vector<2x24xf32>
    %274 = vector.shape_cast %273 : vector<2x24xf32> to vector<2x24x1xf32>
    %275 = tpu.reciprocal %274 : vector<2x24x1xf32> -> vector<2x24x1xf32>
    %276 = vector.broadcast %275 : vector<2x24x1xf32> to vector<2x24x24xf32>
    %277 = arith.mulf %272, %276 : vector<2x24x24xf32>
    "tpu.trace_start"() <{level = 10 : i32, message = "bqk,bkd->bqd"}> : () -> ()
    %cst_99 = arith.constant dense<0.000000e+00> : vector<2x24x8xf32>
    %278 = tpu.matmul %277, %265, %cst_99 {dimension_numbers = #tpu.dot_dimension_numbers<[2], [1], [1], [2], [0, 0, 0, 1, 1, 2], [0], [0]>} : vector<2x24x24xf32>, vector<2x24x8xf32>, vector<2x24x8xf32> -> vector<2x24x8xf32>
    "tpu.trace_stop"() : () -> ()
    %279 = vector.shape_cast %278 : vector<2x24x8xf32> to vector<48x8xf32>
    %280 = vector.extract_strided_slice %226 {offsets = [0, 0, 24], sizes = [2, 24, 8], strides = [1, 1, 1]} : vector<2x24x32xf32> to vector<2x24x8xf32>
    %281 = vector.extract_strided_slice %227 {offsets = [0, 0, 24], sizes = [2, 24, 8], strides = [1, 1, 1]} : vector<2x24x32xf32> to vector<2x24x8xf32>
    %282 = vector.extract_strided_slice %228 {offsets = [0, 0, 24], sizes = [2, 24, 8], strides = [1, 1, 1]} : vector<2x24x32xf32> to vector<2x24x8xf32>
    "tpu.trace_start"() <{level = 10 : i32, message = "bqd,bkd->bqk"}> : () -> ()
    %cst_100 = arith.constant dense<0.000000e+00> : vector<2x24x24xf32>
    %283 = tpu.matmul %280, %281, %cst_100 {dimension_numbers = #tpu.dot_dimension_numbers<[2], [2], [1], [1], [0, 0, 0, 1, 1, 1], [0], [0]>} : vector<2x24x8xf32>, vector<2x24x8xf32>, vector<2x24x24xf32> -> vector<2x24x24xf32>
    "tpu.trace_stop"() : () -> ()
    %284 = arith.addf %283, %16 : vector<2x24x24xf32>
    %cst_101 = arith.constant dense<0xFF800000> : vector<2x24xf32>
    %285 = vector.multi_reduction <maximumf>, %284, %cst_101 [2] : vector<2x24x24xf32> to vector<2x24xf32>
    %286 = vector.shape_cast %285 : vector<2x24xf32> to vector<2x24x1xf32>
    %287 = vector.broadcast %286 : vector<2x24x1xf32> to vector<2x24x24xf32>
    %288 = arith.subf %284, %287 : vector<2x24x24xf32>
    %289 = math.exp %288 : vector<2x24x24xf32>
    %cst_102 = arith.constant dense<0.000000e+00> : vector<2x24xf32>
    %290 = vector.multi_reduction <add>, %289, %cst_102 [2] : vector<2x24x24xf32> to vector<2x24xf32>
    %291 = vector.shape_cast %290 : vector<2x24xf32> to vector<2x24x1xf32>
    %292 = tpu.reciprocal %291 : vector<2x24x1xf32> -> vector<2x24x1xf32>
    %293 = vector.broadcast %292 : vector<2x24x1xf32> to vector<2x24x24xf32>
    %294 = arith.mulf %289, %293 : vector<2x24x24xf32>
    "tpu.trace_start"() <{level = 10 : i32, message = "bqk,bkd->bqd"}> : () -> ()
    %cst_103 = arith.constant dense<0.000000e+00> : vector<2x24x8xf32>
    %295 = tpu.matmul %294, %282, %cst_103 {dimension_numbers = #tpu.dot_dimension_numbers<[2], [1], [1], [2], [0, 0, 0, 1, 1, 2], [0], [0]>} : vector<2x24x24xf32>, vector<2x24x8xf32>, vector<2x24x8xf32> -> vector<2x24x8xf32>
    "tpu.trace_stop"() : () -> ()
    %296 = vector.shape_cast %295 : vector<2x24x8xf32> to vector<48x8xf32>
    %297 = tpu.concatenate %245, %262, %279, %296 in 1 : vector<48x8xf32>, vector<48x8xf32>, vector<48x8xf32>, vector<48x8xf32> -> vector<48x32xf32>
    %c0_104 = arith.constant 0 : index
    %c0_105 = arith.constant 0 : index
    %298 = vector.load %arg17[%c0_104, %c0_105] : memref<32x32xf32, #tpu.memory_space<vmem>>, vector<32x32xf32>
    %cst_106 = arith.constant dense<0.000000e+00> : vector<48x32xf32>
    %299 = tpu.matmul %297, %298, %cst_106 {dimension_numbers = #tpu.dot_dimension_numbers<[1], [0], [0], [1], [0, 0, 1, 1], [], []>} : vector<48x32xf32>, vector<32x32xf32>, vector<48x32xf32> -> vector<48x32xf32>
    %300 = arith.addf %196, %299 : vector<48x32xf32>
    %c0_107 = arith.constant 0 : index
    %c0_108 = arith.constant 0 : index
    %301 = vector.load %arg18[%c0_107, %c0_108] : memref<1x32xf32, #tpu.memory_space<vmem>>, vector<1x32xf32>
    %302 = vector.broadcast %301 : vector<1x32xf32> to vector<48x32xf32>
    %303 = arith.addf %300, %302 : vector<48x32xf32>
    %c0_109 = arith.constant 0 : index
    %c0_110 = arith.constant 0 : index
    %304 = vector.load %arg19[%c0_109, %c0_110] : memref<1x32xf32, #tpu.memory_space<vmem>>, vector<1x32xf32>
    %c0_111 = arith.constant 0 : index
    %c0_112 = arith.constant 0 : index
    %305 = vector.load %arg20[%c0_111, %c0_112] : memref<1x32xf32, #tpu.memory_space<vmem>>, vector<1x32xf32>
    %cst_113 = arith.constant dense<0.000000e+00> : vector<48xf32>
    %306 = vector.multi_reduction <add>, %303, %cst_113 [1] : vector<48x32xf32> to vector<48xf32>
    %307 = vector.shape_cast %306 : vector<48xf32> to vector<48x1xf32>
    %cst_114 = arith.constant 3.200000e+01 : f32
    %308 = vector.broadcast %cst_114 : f32 to vector<48x1xf32>
    %309 = arith.divf %307, %308 : vector<48x1xf32>
    %310 = vector.broadcast %309 : vector<48x1xf32> to vector<48x32xf32>
    %311 = arith.subf %303, %310 : vector<48x32xf32>
    %312 = arith.mulf %311, %311 : vector<48x32xf32>
    %cst_115 = arith.constant dense<0.000000e+00> : vector<48xf32>
    %313 = vector.multi_reduction <add>, %312, %cst_115 [1] : vector<48x32xf32> to vector<48xf32>
    %314 = vector.shape_cast %313 : vector<48xf32> to vector<48x1xf32>
    %cst_116 = arith.constant 3.200000e+01 : f32
    %315 = vector.broadcast %cst_116 : f32 to vector<48x1xf32>
    %316 = arith.divf %314, %315 : vector<48x1xf32>
    %cst_117 = arith.constant 9.99999974E-6 : f32
    %317 = vector.broadcast %cst_117 : f32 to vector<48x1xf32>
    %318 = arith.addf %316, %317 : vector<48x1xf32>
    %319 = math.rsqrt %318 : vector<48x1xf32>
    %320 = vector.broadcast %319 : vector<48x1xf32> to vector<48x32xf32>
    %321 = arith.mulf %311, %320 : vector<48x32xf32>
    %322 = vector.broadcast %304 : vector<1x32xf32> to vector<48x32xf32>
    %323 = arith.mulf %321, %322 : vector<48x32xf32>
    %324 = vector.broadcast %305 : vector<1x32xf32> to vector<48x32xf32>
    %325 = arith.addf %323, %324 : vector<48x32xf32>
    %c0_118 = arith.constant 0 : index
    %c0_119 = arith.constant 0 : index
    %326 = vector.load %arg21[%c0_118, %c0_119] : memref<32x64xf32, #tpu.memory_space<vmem>>, vector<32x64xf32>
    %cst_120 = arith.constant dense<0.000000e+00> : vector<48x64xf32>
    %327 = tpu.matmul %325, %326, %cst_120 {dimension_numbers = #tpu.dot_dimension_numbers<[1], [0], [0], [1], [0, 0, 1, 1], [], []>} : vector<48x32xf32>, vector<32x64xf32>, vector<48x64xf32> -> vector<48x64xf32>
    %c0_121 = arith.constant 0 : index
    %c0_122 = arith.constant 0 : index
    %328 = vector.load %arg22[%c0_121, %c0_122] : memref<1x64xf32, #tpu.memory_space<vmem>>, vector<1x64xf32>
    %329 = vector.broadcast %328 : vector<1x64xf32> to vector<48x64xf32>
    %330 = arith.addf %327, %329 : vector<48x64xf32>
    %cst_123 = arith.constant 5.000000e-01 : f32
    %331 = vector.broadcast %cst_123 : f32 to vector<48x64xf32>
    %332 = arith.mulf %331, %330 : vector<48x64xf32>
    %cst_124 = arith.constant 0.707106769 : f32
    %333 = vector.broadcast %cst_124 : f32 to vector<48x64xf32>
    %334 = arith.mulf %330, %333 : vector<48x64xf32>
    %335 = math.absf %334 : vector<48x64xf32>
    %cst_125 = arith.constant 0.327591091 : f32
    %336 = vector.broadcast %cst_125 : f32 to vector<48x64xf32>
    %337 = arith.mulf %336, %335 : vector<48x64xf32>
    %cst_126 = arith.constant 1.000000e+00 : f32
    %338 = vector.broadcast %cst_126 : f32 to vector<48x64xf32>
    %339 = arith.addf %338, %337 : vector<48x64xf32>
    %cst_127 = arith.constant 1.000000e+00 : f32
    %340 = vector.broadcast %cst_127 : f32 to vector<48x64xf32>
    %341 = arith.divf %340, %339 : vector<48x64xf32>
    %cst_128 = arith.constant 1.06140542 : f32
    %342 = vector.broadcast %cst_128 : f32 to vector<48x64xf32>
    %343 = arith.mulf %342, %341 : vector<48x64xf32>
    %cst_129 = arith.constant -1.45315206 : f32
    %344 = vector.broadcast %cst_129 : f32 to vector<48x64xf32>
    %345 = arith.addf %343, %344 : vector<48x64xf32>
    %346 = arith.mulf %345, %341 : vector<48x64xf32>
    %cst_130 = arith.constant 1.42141378 : f32
    %347 = vector.broadcast %cst_130 : f32 to vector<48x64xf32>
    %348 = arith.addf %346, %347 : vector<48x64xf32>
    %349 = arith.mulf %348, %341 : vector<48x64xf32>
    %cst_131 = arith.constant -0.284496725 : f32
    %350 = vector.broadcast %cst_131 : f32 to vector<48x64xf32>
    %351 = arith.addf %349, %350 : vector<48x64xf32>
    %352 = arith.mulf %351, %341 : vector<48x64xf32>
    %cst_132 = arith.constant 0.254829586 : f32
    %353 = vector.broadcast %cst_132 : f32 to vector<48x64xf32>
    %354 = arith.addf %352, %353 : vector<48x64xf32>
    %355 = arith.mulf %354, %341 : vector<48x64xf32>
    %cst_133 = arith.constant 0.000000e+00 : f32
    %356 = vector.broadcast %cst_133 : f32 to vector<48x64xf32>
    %357 = arith.subf %356, %335 : vector<48x64xf32>
    %358 = arith.mulf %357, %335 : vector<48x64xf32>
    %359 = math.exp %358 : vector<48x64xf32>
    %360 = arith.mulf %355, %359 : vector<48x64xf32>
    %cst_134 = arith.constant 1.000000e+00 : f32
    %361 = vector.broadcast %cst_134 : f32 to vector<48x64xf32>
    %362 = arith.subf %361, %360 : vector<48x64xf32>
    %cst_135 = arith.constant 0.000000e+00 : f32
    %363 = vector.broadcast %cst_135 : f32 to vector<48x64xf32>
    %364 = arith.cmpf oge, %334, %363 : vector<48x64xf32>
    %cst_136 = arith.constant 0.000000e+00 : f32
    %365 = vector.broadcast %cst_136 : f32 to vector<48x64xf32>
    %366 = arith.subf %365, %362 : vector<48x64xf32>
    %367 = arith.select %364, %362, %366 : vector<48x64xi1>, vector<48x64xf32>
    %cst_137 = arith.constant 1.000000e+00 : f32
    %368 = vector.broadcast %cst_137 : f32 to vector<48x64xf32>
    %369 = arith.addf %368, %367 : vector<48x64xf32>
    %370 = arith.mulf %332, %369 : vector<48x64xf32>
    %c0_138 = arith.constant 0 : index
    %c0_139 = arith.constant 0 : index
    %371 = vector.load %arg23[%c0_138, %c0_139] : memref<64x32xf32, #tpu.memory_space<vmem>>, vector<64x32xf32>
    %cst_140 = arith.constant dense<0.000000e+00> : vector<48x32xf32>
    %372 = tpu.matmul %370, %371, %cst_140 {dimension_numbers = #tpu.dot_dimension_numbers<[1], [0], [0], [1], [0, 0, 1, 1], [], []>} : vector<48x64xf32>, vector<64x32xf32>, vector<48x32xf32> -> vector<48x32xf32>
    %c0_141 = arith.constant 0 : index
    %c0_142 = arith.constant 0 : index
    %373 = vector.load %arg24[%c0_141, %c0_142] : memref<1x32xf32, #tpu.memory_space<vmem>>, vector<1x32xf32>
    %374 = vector.broadcast %373 : vector<1x32xf32> to vector<48x32xf32>
    %375 = arith.addf %372, %374 : vector<48x32xf32>
    %376 = arith.addf %303, %375 : vector<48x32xf32>
    %377 = vector.shape_cast %376 : vector<48x32xf32> to vector<2x24x32xf32>
    %378 = vector.extract_strided_slice %377 {offsets = [0, 0, 0], sizes = [2, 1, 32], strides = [1, 1, 1]} : vector<2x24x32xf32> to vector<2x1x32xf32>
    %379 = vector.shape_cast %378 : vector<2x1x32xf32> to vector<2x32xf32>
    %c0_143 = arith.constant 0 : index
    %c0_144 = arith.constant 0 : index
    %380 = vector.load %arg25[%c0_143, %c0_144] : memref<1x32xf32, #tpu.memory_space<vmem>>, vector<1x32xf32>
    %c0_145 = arith.constant 0 : index
    %c0_146 = arith.constant 0 : index
    %381 = vector.load %arg26[%c0_145, %c0_146] : memref<1x32xf32, #tpu.memory_space<vmem>>, vector<1x32xf32>
    %cst_147 = arith.constant dense<0.000000e+00> : vector<2xf32>
    %382 = vector.multi_reduction <add>, %379, %cst_147 [1] : vector<2x32xf32> to vector<2xf32>
    %383 = vector.shape_cast %382 : vector<2xf32> to vector<2x1xf32>
    %cst_148 = arith.constant 3.200000e+01 : f32
    %384 = vector.broadcast %cst_148 : f32 to vector<2x1xf32>
    %385 = arith.divf %383, %384 : vector<2x1xf32>
    %386 = vector.broadcast %385 : vector<2x1xf32> to vector<2x32xf32>
    %387 = arith.subf %379, %386 : vector<2x32xf32>
    %388 = arith.mulf %387, %387 : vector<2x32xf32>
    %cst_149 = arith.constant dense<0.000000e+00> : vector<2xf32>
    %389 = vector.multi_reduction <add>, %388, %cst_149 [1] : vector<2x32xf32> to vector<2xf32>
    %390 = vector.shape_cast %389 : vector<2xf32> to vector<2x1xf32>
    %cst_150 = arith.constant 3.200000e+01 : f32
    %391 = vector.broadcast %cst_150 : f32 to vector<2x1xf32>
    %392 = arith.divf %390, %391 : vector<2x1xf32>
    %cst_151 = arith.constant 9.99999974E-6 : f32
    %393 = vector.broadcast %cst_151 : f32 to vector<2x1xf32>
    %394 = arith.addf %392, %393 : vector<2x1xf32>
    %395 = math.rsqrt %394 : vector<2x1xf32>
    %396 = vector.broadcast %395 : vector<2x1xf32> to vector<2x32xf32>
    %397 = arith.mulf %387, %396 : vector<2x32xf32>
    %398 = vector.broadcast %380 : vector<1x32xf32> to vector<2x32xf32>
    %399 = arith.mulf %397, %398 : vector<2x32xf32>
    %400 = vector.broadcast %381 : vector<1x32xf32> to vector<2x32xf32>
    %401 = arith.addf %399, %400 : vector<2x32xf32>
    %c0_152 = arith.constant 0 : index
    %c0_153 = arith.constant 0 : index
    %402 = vector.load %arg27[%c0_152, %c0_153] : memref<32x128xf32, #tpu.memory_space<vmem>>, vector<32x128xf32>
    %cst_154 = arith.constant dense<0.000000e+00> : vector<2x128xf32>
    %403 = tpu.matmul %401, %402, %cst_154 {dimension_numbers = #tpu.dot_dimension_numbers<[1], [0], [0], [1], [0, 0, 1, 1], [], []>} : vector<2x32xf32>, vector<32x128xf32>, vector<2x128xf32> -> vector<2x128xf32>
    %c0_155 = arith.constant 0 : index
    %c0_156 = arith.constant 0 : index
    %404 = vector.load %arg28[%c0_155, %c0_156] : memref<1x128xf32, #tpu.memory_space<vmem>>, vector<1x128xf32>
    %405 = vector.broadcast %404 : vector<1x128xf32> to vector<2x128xf32>
    %406 = arith.addf %403, %405 : vector<2x128xf32>
    %c0_157 = arith.constant 0 : index
    %c0_158 = arith.constant 0 : index
    %407 = vector.load %arg29[%c0_157, %c0_158] : memref<2x128xf32, #tpu.memory_space<vmem>>, vector<2x128xf32>
    tpu.vector_store %arg29[%c0_157, %c0_158], %406 {strides = array<i32>} : memref<2x128xf32, #tpu.memory_space<vmem>>, vector<2x128xf32>,
    return
  }
}

</mosaic_0001>

<bundles_post_ra>
// kernel: vit_forward.1
= control target key start
LH: loop header
LB: loop body
LE: loop exit
PB: predicated region body
PF: predicated region fallthrough
CT: control target
= control target key end

     0   :  { %s7701_s6 = smov 1   ;;  %s7702_s10 = smov 2   ;;  %s9603_s0 = inlined_call_operand.smem [shape: u32[30], index: -1, kind: input, shape index: {}] }
   0x1   :  { %s7756_s5 = sld [smem:[%s9603_s0]]   ;;  %s7703_s14 = smov 3  }
   0x2   :  { %s7761_s9 = sld [smem:[%s9603_s0 + %s7701_s6]]   ;;  %s7704_s18 = smov 4  }
   0x3   :  { %s7766_s13 = sld [smem:[%s9603_s0 + %s7702_s10]]   ;;  %s7705_s22 = smov 5  }
   0x4   :  { %s7771_s17 = sld [smem:[%s9603_s0 + %s7703_s14]]   ;;  %s7706_s26 = smov 6  }
   0x5   :  { %s7776_s21 = sld [smem:[%s9603_s0 + %s7704_s18]]   ;;  %s7707_s30 = smov 7  }
   0x6   :  { %s7781_s25 = sld [smem:[%s9603_s0 + %s7705_s22]]   ;;  %s7708_s4 = smov 8  }
   0x7   :  { %s7786_s29 = sld [smem:[%s9603_s0 + %s7706_s26]]   ;;  %s7709_s10 = smov 9  }
   0x8   :  { %s7791_s3 = sld [smem:[%s9603_s0 + %s7707_s30]]   ;;  %s7710_s15 = smov 10  }
   0x9   :  { %s7796_s8 = sld [smem:[%s9603_s0 + %s7708_s4]]   ;;  %s7711_s20 = smov 11  }
   0xa   :  { %s7801_s14 = sld [smem:[%s9603_s0 + %s7709_s10]]   ;;  %s7712_s26 = smov 12  }
   0xb   :  { %s7806_s19 = sld [smem:[%s9603_s0 + %s7710_s15]]   ;;  %s7713_s1 = smov 13  }
   0xc   :  { %s7811_s24 = sld [smem:[%s9603_s0 + %s7711_s20]]   ;;  %s7714_s7 = smov 14  }
   0xd   :  { %s7816_s30 = sld [smem:[%s9603_s0 + %s7712_s26]]   ;;  %s7715_s15 = smov 15  }
   0xe   :  { %s7821_s6 = sld [smem:[%s9603_s0 + %s7713_s1]]   ;;  %s7716_s22 = smov 16  }
   0xf   :  { %s7826_s12 = sld [smem:[%s9603_s0 + %s7714_s7]]   ;;  %s7717_s28 = smov 17  }
  0x10   :  { %s7831_s20 = sld [smem:[%s9603_s0 + %s7715_s15]]   ;;  %s7718_s7 = smov 18  }
  0x11   :  { %s7836_s27 = sld [smem:[%s9603_s0 + %s7716_s22]]   ;;  %s7719_s15 = smov 19  }
  0x12   :  { %s7841_s4 = sld [smem:[%s9603_s0 + %s7717_s28]]   ;;  %s7720_s22 = smov 20  }
  0x13   :  { %s7721_s28 = smov 21  }
  0x15   :  { %9608 = sst [smem:[#allocation5_spill]] %s7826_s12 }
  0x16   :  { %9609 = sst [smem:[#allocation6_spill]] %s7831_s20 }
  0x17   :  { %9610 = sst [smem:[#allocation7_spill]] %s7836_s27 }
  0x18   :  { %9611 = sst [smem:[#allocation8_spill]] %s7841_s4 }
  0x19   :  { %s7846_s12 = sld [smem:[%s9603_s0 + %s7718_s7]]   ;;  %s7722_s7 = smov 22  }
  0x1a   :  { %s7851_s20 = sld [smem:[%s9603_s0 + %s7719_s15]]   ;;  %s7723_s15 = smov 23  }
  0x1b   :  { %s7856_s27 = sld [smem:[%s9603_s0 + %s7720_s22]]   ;;  %s7724_s22 = smov 24  }
  0x1c   :  { %s7861_s4 = sld [smem:[%s9603_s0 + %s7721_s28]]   ;;  %s7725_s28 = smov 25  }
  0x1f   :  { %9612 = sst [smem:[#allocation9_spill]] %s7846_s12 }
  0x20   :  { %9613 = sst [smem:[#allocation10_spill]] %s7851_s20 }
  0x21   :  { %9614 = sst [smem:[#allocation11_spill]] %s7856_s27 }
  0x22   :  { %9615 = sst [smem:[#allocation12_spill]] %s7861_s4 }
  0x23   :  { %s7866_s12 = sld [smem:[%s9603_s0 + %s7722_s7]]   ;;  %s7726_s7 = smov 26  }
  0x24   :  { %s7871_s20 = sld [smem:[%s9603_s0 + %s7723_s15]]   ;;  %s7727_s15 = smov 27  }
  0x25   :  { %s7876_s27 = sld [smem:[%s9603_s0 + %s7724_s22]]   ;;  %s7728_s22 = smov 28  }
  0x26   :  { %s7881_s4 = sld [smem:[%s9603_s0 + %s7725_s28]]   ;;  %s7729_s28 = smov 29  }
  0x29   :  { %9616 = sst [smem:[#allocation13_spill]] %s7866_s12 }
  0x2a   :  { %9617 = sst [smem:[#allocation14_spill]] %s7871_s20 }
  0x2b   :  { %9618 = sst [smem:[#allocation15_spill]] %s7876_s27 }
  0x2c   :  { %9619 = sst [smem:[#allocation16_spill]] %s7881_s4 }
  0x2d   :  { %s7886_s12 = sld [smem:[%s9603_s0 + %s7726_s7]]  }
  0x2e   :  { %s7891_s20 = sld [smem:[%s9603_s0 + %s7727_s15]]  }
  0x2f   :  { %s7896_s27 = sld [smem:[%s9603_s0 + %s7728_s22]]  }
  0x30   :  { %s7901_s4 = sld [smem:[%s9603_s0 + %s7729_s28]]  }
  0x31   :  { %v134_v0 = vld [vmem:[%s7761_s9 + $0x28] sm:$0xff]  ;;  %v133_v1 = vld [vmem:[%s7761_s9 + $0x20] sm:$0xff]  ;;  %vm135_vm0 = vcmask 392192   ;;  %v132_v2 = vld [vmem:[%s7761_s9 + $0x18] sm:$0xff] }
  0x32   :  { %6672 = vmatprep.subr.mxu0 %v134_v0  ;;  %v123_v3 = vld [vmem:[%s7756_s5] sm:$0xff]  ;;  %v131_v4 = vld [vmem:[%s7761_s9 + $0x10] sm:$0xff] }
  0x33   :  { %6673 = vmatpush3.msra.mxu0 %v134_v0  ;;  %6684 = vmatprep.mubr.msk.f32.mxu0 %vm135_vm0, %v123_v3 }
  0x34   :  { %6674 = vmatprep.subr.mxu0 %v133_v1 }
  0x35   :  { %6675 = vmatpush3.msra.mxu0 %v133_v1 }
  0x36   :  { %64 = vsyncpa [#allocation3], 0  ;;  %6676 = vmatprep.subr.mxu0 %v132_v2  ;;  %v130_v5 = vld [vmem:[%s7761_s9 + $0x8] sm:$0xff]  ;;  %v129_v6 = vld [vmem:[%s7761_s9] sm:$0xff]  ;;  %vm264_vm1 = vcmask 261120   ;;  %s7731_s0 = smov 96  }
  0x37   :  { %6677 = vmatpush3.msra.mxu0 %v132_v2  ;;  %v124_v7 = vld [vmem:[%s7756_s5 + $0x8] sm:$0xff]  ;;  %v125_v8 = vld [vmem:[%s7756_s5 + $0x10] sm:$0xff]  ;;  %v126_v9 = vld [vmem:[%s7756_s5 + $0x18] sm:$0xff]  ;;  %vm7732_vm2 = vmmov 0   ;;  %vm500_vm3 = vcmask 64512   ;;  %vm700_vm5 = vcmask 195584  }
  0x38   :  { %6678 = vmatprep.subr.mxu0 %v131_v4  ;;  %v127_v10 = vld [vmem:[%s7756_s5 + $0x20] sm:$0xff]  ;;  %v128_v11 = vld [vmem:[%s7756_s5 + $0x28] sm:$0xff]  ;;  %v251_v18 = vld [vmem:[%s7766_s13 + $0x10] sm:$0xff]  ;;  %s7734_s5 = smov 64   ;;  %s7735_s9 = smov 88   ;;  %vm2451_vm6 = vcmask 130048  }
  0x39   :  { %6679 = vmatpush3.msra.mxu0 %v131_v4  ;;  %v249_v13 = vld [vmem:[%s7766_s13] sm:$0xff]  ;;  %v250_v14 = vld [vmem:[%s7766_s13 + $0x8] sm:$0xff]  ;;  %v371_v63 = vld [vmem:[%s7781_s25 + $0x18] sm:$0xff]  ;;  %s7736_s13 = smov 120   ;;  %s7740_s7 = smov 48   ;;  %vm3005_vm9 = vcmask 523264  }
  0x3a   :  { %6680 = vmatprep.subr.mxu0 %v130_v5  ;;  %v370_v0 = vld [vmem:[%s7781_s25 + $0x10] sm:$0xff]  ;;  %6693 = vmatprep.subr.mxu1 %v371_v63  ;;  %v369_v1 = vld [vmem:[%s7781_s25 + $0x8] sm:$0xff]  ;;  %v368_v2 = vld [vmem:[%s7781_s25] sm:$0xff]  ;;  %s7739_s25 = smov 112   ;;  %s7741_s10 = smov 72  }
  0x3b   :  { %6681 = vmatpush3.msra.mxu0 %v130_v5  ;;  %6694 = vmatpush3.msra.mxu1 %v371_v63  ;;  %s7742_s11 = smov 104   ;;  %s7743_s15 = smov 40  }
  0x3c   :  { %6682 = vmatprep.subr.mxu0 %v129_v6  ;;  %6695 = vmatprep.subr.mxu1 %v370_v0  ;;  %s7744_s16 = smov 8   ;;  %s7745_s18 = smov 16  }
  0x3d   :  { %6683 = vmatpush3.msra.mxu0 %v129_v6  ;;  %6696 = vmatpush3.msra.mxu1 %v370_v0  ;;  %s7746_s22 = smov 24   ;;  %s9628_s23 = sld [smem:[#allocation14_spill]] }
  0x3e   :  { %6685 = vmatmul.mubr.msk.f32.vlgmr.msra.gmra.mxu0 %vm135_vm0, %v124_v7  ;;  %6697 = vmatprep.subr.mxu1 %v369_v1  ;;  %s9629_s26 = sld [smem:[#allocation13_spill]] }
  0x3f   :  { %6687 = vmatprep.mubr.msk.f32.mxu0 %vm135_vm0, %v125_v8  ;;  %6698 = vmatpush3.msra.mxu1 %v369_v1  ;;  %s9630_s28 = sld [smem:[#allocation15_spill]] }
  0x40   :  { %6699 = vmatprep.subr.mxu1 %v368_v2 }
  0x41   :  { %6700 = vmatpush3.msra.mxu1 %v368_v2 }
  0x42   :  { %6688 = vmatmul.mubr.msk.f32.gmra.mxu0 %vm135_vm0, %v126_v9 }
  0x43   :  { %6690 = vmatprep.mubr.msk.f32.mxu0 %vm135_vm0, %v127_v10 }
  0x46   :  { %6691 = vmatmul.mubr.msk.f32.gmra.mxu0 %vm135_vm0, %v128_v11 }
  0xfe   :  { %v6686_v12 = vpop.f32.mrf.mxu0 }
  0xff   :  { %v7926_v19 = vadd.f32 %v6686_v12, %v250_v14 }
 0x100   :  { %v220_v15 = vpop.f32.mrf.mxu0 }
 0x101   :  { %v7923_v16 = vadd.f32 %v249_v13, %v220_v15  ;;  %v268_v25 = vsel %vm264_vm1, %v7926_v19, 0.0 }
 0x102   :  { %v6689_v17 = vpop.f32.mrf.mxu0 }
 0x103   :  { %v265_v20 = vsel %vm264_vm1, %v7923_v16, 0.0  ;;  %v7932_v24 = vadd.f32 %v6689_v17, %v249_v13 }
 0x104   :  { %266 = vadd.xlane.f32.xlu0 %v265_v20  ;;  %v230_v21 = vpop.f32.mrf.mxu0 }
 0x105   :  { %v7930_v22 = vadd.f32 %v251_v18, %v230_v21  ;;  %v274_v30 = vsel %vm264_vm1, %v7932_v24, 0.0 }
 0x106   :  { %v6692_v23 = vpop.f32.mrf.mxu0 }
 0x107   :  { %v271_v26 = vsel %vm264_vm1, %v7930_v22, 0.0  ;;  %v7938_v28 = vadd.f32 %v6692_v23, %v251_v18 }
 0x108   :  { %269 = vadd.xlane.f32.xlu0 %v268_v25  ;;  %272 = vadd.xlane.f32.xlu1 %v271_v26  ;;  %v240_v27 = vpop.f32.mrf.mxu0  ;;  %v6165_v26 = vld [vmem:[%s7771_s17] ss:$0 sm:$0xff]  ;;  %s7737_s17 = smov 56  }
 0x109   :  { %v7940_v29 = vadd.f32 %v250_v14, %v240_v27  ;;  %v280_v32 = vsel %vm264_vm1, %v7938_v28, 0.0 }
 0x10b   :  { %v277_v31 = vsel %vm264_vm1, %v7940_v29, 0.0 }
 0x10c   :  { %275 = vadd.xlane.f32.xlu1 %v274_v30  ;;  %278 = vadd.xlane.f32.xlu0 %v277_v31  ;;  %v6166_v30 = vld [vmem:[%s7776_s21] ss:$0 sm:$0xff]  ;;  %s7738_s21 = smov 80  }
 0x110   :  { %281 = vadd.xlane.f32.xlu1 %v280_v32 }
 0x18d   :  { %v267_v33 = vpop.xlane.xlu0 %266 }
 0x18e   :  { %v284_v34 = vmul.f32 0.03125, %v267_v33 }
 0x190   :  { %v7949_v35 = vsub.f32 %v7923_v16, %v284_v34 }
 0x191   :  { %v270_v36 = vpop.xlane.xlu0 %269  ;;  %v273_v37 = vpop.xlane.xlu1 %272 }
 0x192   :  { %v285_v38 = vmul.f32 0.03125, %v270_v36  ;;  %v286_v39 = vmul.f32 0.03125, %v273_v37  ;;  %v296_v40 = vmul.f32 %v7949_v35, %v7949_v35 }
 0x194   :  { %v7954_v41 = vsub.f32 %v7926_v19, %v285_v38  ;;  %v7957_v42 = vsub.f32 %v7930_v22, %v286_v39  ;;  %v302_v43 = vsel %vm264_vm1, %v296_v40, 0.0 }
 0x195   :  { %v276_v44 = vpop.xlane.xlu1 %275  ;;  %303 = vadd.xlane.f32.xlu0 %v302_v43  ;;  %v279_v45 = vpop.xlane.xlu0 %278 }
 0x196   :  { %v287_v46 = vmul.f32 0.03125, %v276_v44  ;;  %v288_v47 = vmul.f32 0.03125, %v279_v45  ;;  %v297_v48 = vmul.f32 %v7954_v41, %v7954_v41  ;;  %v298_v49 = vmul.f32 %v7957_v42, %v7957_v42 }
 0x198   :  { %v7965_v50 = vsub.f32 %v7932_v24, %v287_v46  ;;  %v7968_v51 = vsub.f32 %v7940_v29, %v288_v47  ;;  %v305_v52 = vsel %vm264_vm1, %v297_v48, 0.0  ;;  %v308_v53 = vsel %vm264_vm1, %v298_v49, 0.0 }
 0x199   :  { %306 = vadd.xlane.f32.xlu1 %v305_v52  ;;  %v282_v54 = vpop.xlane.xlu1 %281  ;;  %309 = vadd.xlane.f32.xlu0 %v308_v53 }
 0x19a   :  { %v289_v55 = vmul.f32 0.03125, %v282_v54  ;;  %v299_v56 = vmul.f32 %v7965_v50, %v7965_v50  ;;  %v300_v57 = vmul.f32 %v7968_v51, %v7968_v51 }
 0x19c   :  { %v7977_v58 = vsub.f32 %v7938_v28, %v289_v55  ;;  %v311_v59 = vsel %vm264_vm1, %v299_v56, 0.0  ;;  %v314_v60 = vsel %vm264_vm1, %v300_v57, 0.0 }
 0x19d   :  { %312 = vadd.xlane.f32.xlu1 %v311_v59  ;;  %315 = vadd.xlane.f32.xlu0 %v314_v60 }
 0x19e   :  { %v301_v61 = vmul.f32 %v7977_v58, %v7977_v58 }
 0x1a0   :  { %v317_v62 = vsel %vm264_vm1, %v301_v61, 0.0 }
 0x1a1   :  { %318 = vadd.xlane.f32.xlu1 %v317_v62 }
 0x21e   :  { %v304_v3 = vpop.xlane.xlu0 %303 }
 0x21f   :  { %v320_v4 = vmul.f32 0.03125, %v304_v3 }
 0x221   :  { %v326_v5 = vadd.f32 1e-05, %v320_v4 }
 0x222   :  { %v307_v6 = vpop.xlane.xlu1 %306  ;;  %v310_v7 = vpop.xlane.xlu0 %309 }
 0x223   :  { %7389 = vrsqrt.f32 %v326_v5  ;;  %v321_v8 = vmul.f32 0.03125, %v307_v6  ;;  %v322_v9 = vmul.f32 0.03125, %v310_v7 }
 0x225   :  { %v327_v10 = vadd.f32 1e-05, %v321_v8  ;;  %v328_v11 = vadd.f32 1e-05, %v322_v9  ;;  %v258_v8 = vlaneseq }
 0x226   :  { %v313_v12 = vpop.xlane.xlu1 %312  ;;  %v316_v13 = vpop.xlane.xlu0 %315 }
 0x227   :  { %7391 = vrsqrt.f32 %v327_v10  ;;  %v323_v14 = vmul.f32 0.03125, %v313_v12  ;;  %v324_v15 = vmul.f32 0.03125, %v316_v13  ;;  %v259_v9 = vand.u32 127, %v258_v8 }
 0x228   :  { %7393 = vrsqrt.f32 %v328_v11  ;;  %v7733_v10 = vmov -1e+30  }
 0x229   :  { %v329_v17 = vadd.f32 1e-05, %v323_v14  ;;  %v330_v18 = vadd.f32 1e-05, %v324_v15  ;;  %vm260_vm4 = vcmp.lt.s32.totalorder %v259_v9, 17 }
 0x22a   :  { %v319_v20 = vpop.xlane.xlu1 %318  ;;  %v8092_v11 = vsel %vm260_vm4, 0.0, %v7733_v10  ;;  %vm5979_vm4 = vcmask 1041409  }
 0x22b   :  { %7395 = vrsqrt.f32 %v329_v17  ;;  %v325_v21 = vmul.f32 0.03125, %v319_v20 }
 0x22c   :  { %7397 = vrsqrt.f32 %v330_v18 }
 0x22d   :  { %v331_v23 = vadd.f32 1e-05, %v325_v21 }
 0x22f   :  { %7399 = vrsqrt.f32 %v331_v23 }
 0x230   :  { %v7390_v25 = vpop.eup %7389 }
 0x231   :  { %v338_v27 = vmul.f32 %v7390_v25, %v7949_v35 }
 0x233   :  { %v350_v31 = vmul.f32 %v6165_v26, %v338_v27 }
 0x234   :  { %v7392_v32 = vpop.eup %7391 }
 0x235   :  { %v7394_v33 = vpop.eup %7393  ;;  %v362_v34 = vadd.f32 %v6166_v30, %v350_v31  ;;  %v339_v36 = vmul.f32 %v7392_v32, %v7954_v41 }
 0x236   :  { %v340_v37 = vmul.f32 %v7394_v33, %v7957_v42 }
 0x237   :  { %6701 = vmatprep.mubr.msk.f32.mxu1 %vm264_vm1, %v362_v34  ;;  %v351_v38 = vmul.f32 %v6165_v26, %v339_v36 }
 0x238   :  { %v7396_v39 = vpop.eup %7395  ;;  %v352_v40 = vmul.f32 %v6165_v26, %v340_v37 }
 0x239   :  { %v7398_v43 = vpop.eup %7397  ;;  %v363_v44 = vadd.f32 %v6166_v30, %v351_v38  ;;  %v341_v45 = vmul.f32 %v7396_v39, %v7965_v50 }
 0x23a   :  { %v364_v46 = vadd.f32 %v6166_v30, %v352_v40  ;;  %v342_v35 = vmul.f32 %v7398_v43, %v7968_v51  ;;  %v7730_v51 = vmov 0.0  }
 0x23b   :  { %6702 = vmatmul.mubr.msk.f32.vlgmr.msra.gmra.mxu1 %vm264_vm1, %v363_v44  ;;  %v353_v47 = vmul.f32 %v6165_v26, %v341_v45  ;;  %6710 = vmatprep.subr.mxu1 %v7730_v51 }
 0x23c   :  { %v7400_v48 = vpop.eup %7399  ;;  %6704 = vmatprep.mubr.msk.f32.mxu1 %vm264_vm1, %v364_v46  ;;  %v354_v41 = vmul.f32 %v6165_v26, %v342_v35  ;;  %6725 = vmatprep.subr.mxu0 %v7730_v51 }
 0x23d   :  { %v365_v42 = vadd.f32 %v6166_v30, %v353_v47  ;;  %v343_v49 = vmul.f32 %v7400_v48, %v7977_v58  ;;  %6731 = vmatprep.mubr.msk.f32.mxu0 %vm7732_vm2, %v7730_v51 }
 0x23e   :  { %v366_v52 = vadd.f32 %v6166_v30, %v354_v41 }
 0x23f   :  { %6705 = vmatmul.mubr.msk.f32.gmra.mxu1 %vm264_vm1, %v365_v42  ;;  %v355_v53 = vmul.f32 %v6165_v26, %v343_v49 }
 0x240   :  { %6707 = vmatprep.mubr.msk.f32.mxu1 %vm264_vm1, %v366_v52 }
 0x241   :  { %v367_v50 = vadd.f32 %v6166_v30, %v355_v53 }
 0x243   :  { %6708 = vmatmul.mubr.msk.f32.gmra.mxu1 %vm264_vm1, %v367_v50 }
 0x244   :  { %6716 = vmatprep.mubr.msk.f32.mxu1 %vm7732_vm2, %v7730_v51 }
 0x2fb   :  { %v8004_v54 = vpop.f32.mrf.mxu1 }
 0x2fc   :  { %496 = vrot.lane.b32.xlu1 %v8004_v54, %s7731_s0  ;;  %v8058_v4 = vmul.f32 0.35355338, %v8004_v54 }
 0x2fd   :  { %v8008_v55 = vpop.f32.mrf.mxu1 }
 0x2fe   :  { %v8042_v2 = vmul.f32 0.35355338, %v8008_v55 }
 0x2ff   :  { %v8014_v56 = vpop.f32.mrf.mxu1 }
 0x300   :  { %494 = vrot.lane.b32.xlu1 %v8008_v55, %s7731_s0  ;;  %v8049_v3 = vmul.f32 0.35355338, %v8014_v56 }
 0x301   :  { %v8018_v57 = vpop.f32.mrf.mxu1 }
 0x302   :  { %498 = vrot.lane.b32.xlu0 %v8018_v57, %s7731_s0  ;;  %v8074_v6 = vmul.f32 0.35355338, %v8018_v57 }
 0x303   :  { %v8022_v58 = vpop.f32.mrf.mxu1 }
 0x304   :  { %603 = vrot.lane.b32.xlu1 %v8022_v58, %s7731_s0  ;;  %v8085_v7 = vmul.f32 0.35355338, %v8022_v58 }
 0x305   :  { %v8026_v59 = vpop.f32.mrf.mxu1 }
 0x306   :  { %601 = vrot.lane.b32.xlu0 %v8026_v59, %s7731_s0  ;;  %v8066_v5 = vmul.f32 0.35355338, %v8026_v59 }
 0x308   :  { %599 = vrot.lane.b32.xlu1 %v8014_v56, %s7731_s0 }
 0x36e   :  { %v497_v60 = vpop.permute.xlu1 %496 }
 0x372   :  { %v495_v61 = vpop.permute.xlu1 %494 }
 0x374   :  { %v499_v62 = vpop.permute.xlu0 %498 }
 0x375   :  { %6711 = vmatpush3.xpose.msk.msra.mxu1 %vm500_vm3, %v499_v62 }
 0x376   :  { %v604_v63 = vpop.permute.xlu1 %603  ;;  %6712 = vmatprep.subr.mxu1 %v7730_v51 }
 0x377   :  { %6726 = vmatpush3.xpose.msk.msra.mxu0 %vm500_vm3, %v604_v63 }
 0x378   :  { %6727 = vmatprep.subr.mxu0 %v7730_v51  ;;  %v602_v0 = vpop.permute.xlu0 %601 }
 0x379   :  { %6713 = vmatpush3.xpose.msk.msra.mxu1 %vm500_vm3, %v497_v60 }
 0x37a   :  { %6714 = vmatprep.subr.mxu1 %v7730_v51  ;;  %v600_v1 = vpop.permute.xlu1 %599 }
 0x37b   :  { %6728 = vmatpush3.xpose.msk.msra.mxu0 %vm500_vm3, %v602_v0 }
 0x37c   :  { %6729 = vmatprep.subr.mxu0 %v7730_v51 }
 0x37d   :  { %6715 = vmatpush3.xpose.msk.msra.mxu1 %vm500_vm3, %v495_v61 }
 0x37e   :  { %7336 = vmatprep.subr.mxu1 %v7730_v51 }
 0x37f   :  { %6730 = vmatpush3.xpose.msk.msra.mxu0 %vm500_vm3, %v600_v1 }
 0x380   :  { %6717 = vmatmul.mubr.msk.f32.vlgmr.msra.gmra.mxu1 %vm500_vm3, %v8042_v2  ;;  %6755 = vmatprep.subr.mxu0 %v7730_v51 }
 0x381   :  { %7339 = vmatpush3.xpose.msk.msra.mxu1 %vm500_vm3, %v604_v63  ;;  %6719 = vmatprep.mubr.msk.f32.mxu1 %vm7732_vm2, %v7730_v51 }
 0x382   :  { %6732 = vmatmul.mubr.msk.f32.vlgmr.msra.gmra.mxu0 %vm500_vm3, %v8049_v3  ;;  %7337 = vmatprep.subr.mxu1 %v7730_v51 }
 0x383   :  { %6734 = vmatprep.mubr.msk.f32.mxu0 %vm7732_vm2, %v7730_v51 }
 0x384   :  { %6720 = vmatmul.mubr.msk.f32.gmra.mxu1 %vm500_vm3, %v8058_v4 }
 0x385   :  { %7340 = vmatpush3.xpose.msk.msra.mxu1 %vm500_vm3, %v602_v0  ;;  %6722 = vmatprep.mubr.msk.f32.mxu1 %vm7732_vm2, %v7730_v51 }
 0x386   :  { %6735 = vmatmul.mubr.msk.f32.gmra.mxu0 %vm500_vm3, %v8066_v5  ;;  %7338 = vmatprep.subr.mxu1 %v7730_v51 }
 0x387   :  { %6761 = vmatprep.mubr.msk.f32.mxu0 %vm7732_vm2, %v7730_v51 }
 0x388   :  { %6723 = vmatmul.mubr.msk.f32.gmra.mxu1 %vm500_vm3, %v8074_v6 }
 0x389   :  { %7341 = vmatpush3.xpose.msk.msra.mxu1 %vm500_vm3, %v600_v1  ;;  %6737 = vmatprep.mubr.msk.f32.mxu1 %vm7732_vm2, %v7730_v51 }
 0x38a   :  { %6740 = vmatprep.subr.mxu1 %v7730_v51 }
 0x38c   :  { %6738 = vmatmul.mubr.msk.f32.vlgmr.msra.gmra.mxu1 %vm500_vm3, %v8085_v7 }
 0x38d   :  { %6746 = vmatprep.mubr.msk.f32.mxu1 %vm7732_vm2, %v7730_v51 }
 0x440   :  { %v582_v12 = vpop.f32.mrf.mxu1 }
 0x441   :  { %v583_v13 = vadd.f32 %v582_v12, %v8092_v11 }
 0x442   :  { %v6718_v14 = vpop.f32.mrf.mxu1  ;;  %v686_v15 = vpop.f32.mrf.mxu0 }
 0x443   :  { %v701_v17 = vsel %vm700_vm5, %v583_v13, -inf  ;;  %v687_v33 = vadd.f32 %v686_v15, %v8092_v11 }
 0x444   :  { %702 = vmax.xlane.f32.xlu0 %v701_v17  ;;  %v587_v18 = vpop.f32.mrf.mxu1  ;;  %v6733_v20 = vpop.f32.mrf.mxu0 }
 0x445   :  { %v588_v21 = vadd.f32 %v587_v18, %v8092_v11  ;;  %v710_v39 = vsel %vm700_vm5, %v687_v33, -inf }
 0x446   :  { %v6721_v23 = vpop.f32.mrf.mxu1  ;;  %v691_v25 = vpop.f32.mrf.mxu0 }
 0x447   :  { %v704_v26 = vsel %vm700_vm5, %v588_v21, -inf  ;;  %v692_v38 = vadd.f32 %v691_v25, %v8092_v11 }
 0x448   :  { %705 = vmax.xlane.f32.xlu1 %v704_v26  ;;  %v592_v27 = vpop.f32.mrf.mxu1  ;;  %v6736_v30 = vpop.f32.mrf.mxu0 }
 0x449   :  { %v593_v31 = vadd.f32 %v592_v27, %v8092_v11  ;;  %v713_v40 = vsel %vm700_vm5, %v692_v38, -inf }
 0x44a   :  { %v6724_v32 = vpop.f32.mrf.mxu1 }
 0x44b   :  { %v707_v34 = vsel %vm700_vm5, %v593_v31, -inf }
 0x44c   :  { %708 = vmax.xlane.f32.xlu0 %v707_v34  ;;  %v696_v36 = vpop.f32.mrf.mxu1 }
 0x44d   :  { %v8119_v43 = vadd.f32 %v696_v36, %v8092_v11 }
 0x44e   :  { %v6739_v37 = vpop.f32.mrf.mxu1 }
 0x44f   :  { %v716_v44 = vsel %vm700_vm5, %v8119_v43, -inf }
 0x450   :  { %711 = vmax.xlane.f32.xlu0 %v710_v39 }
 0x454   :  { %714 = vmax.xlane.f32.xlu0 %v713_v40 }
 0x459   :  { %769 = vrot.lane.b32.xlu1 %v8004_v54, %s7734_s5 }
 0x45d   :  { %767 = vrot.lane.b32.xlu1 %v8008_v55, %s7734_s5 }
 0x461   :  { %973 = vrot.lane.b32.xlu1 %v8018_v57, %s7735_s9 }
 0x465   :  { %971 = vrot.lane.b32.xlu1 %v8004_v54, %s7735_s9 }
 0x46a   :  { %771 = vrot.lane.b32.xlu0 %v8018_v57, %s7734_s5 }
 0x46e   :  { %869 = vrot.lane.b32.xlu0 %v8022_v58, %s7734_s5 }
 0x472   :  { %867 = vrot.lane.b32.xlu0 %v8026_v59, %s7734_s5 }
 0x489   :  { %717 = vmax.xlane.f32.xlu1 %v716_v44 }
 0x49a   :  { %865 = vrot.lane.b32.xlu1 %v8014_v56, %s7734_s5 }
 0x4cd   :  { %v703_v45 = vpop.xlane.xlu0 %702 }
 0x4ce   :  { %v719_v46 = vsub.f32 %v583_v13, %v703_v45 }
 0x4d0   :  { %v725_v35 = vmul.f32 1.442695, %v719_v46 }
 0x4d1   :  { %v706_v47 = vpop.xlane.xlu1 %705 }
 0x4d2   :  { %7401 = vpow2.f32 %v725_v35  ;;  %v720_v41 = vsub.f32 %v588_v21, %v706_v47 }
 0x4d4   :  { %v727_v52 = vmul.f32 1.442695, %v720_v41 }
 0x4d5   :  { %v709_v48 = vpop.xlane.xlu0 %708  ;;  %v770_v63 = vpop.permute.xlu1 %769 }
 0x4d6   :  { %v721_v53 = vsub.f32 %v593_v31, %v709_v48 }
 0x4d8   :  { %v729_v0 = vmul.f32 1.442695, %v721_v53 }
 0x4d9   :  { %v712_v42 = vpop.xlane.xlu0 %711  ;;  %v768_v10 = vpop.permute.xlu1 %767 }
 0x4da   :  { %v722_v49 = vsub.f32 %v687_v33, %v712_v42 }
 0x4dc   :  { %v731_v50 = vmul.f32 1.442695, %v722_v49 }
 0x4dd   :  { %v715_v60 = vpop.xlane.xlu0 %714  ;;  %v974_v26 = vpop.permute.xlu1 %973 }
 0x4de   :  { %7403 = vpow2.f32 %v731_v50  ;;  %v723_v61 = vsub.f32 %v692_v38, %v715_v60 }
 0x4df   :  { %v8125_v62 = vpop.eup %7401  ;;  %7405 = vpow2.f32 %v727_v52 }
 0x4e0   :  { %v733_v1 = vmul.f32 1.442695, %v723_v61  ;;  %v737_v8 = vsel %vm700_vm5, %v8125_v62, 0.0 }
 0x4e1   :  { %738 = vadd.xlane.f32.xlu0 %v737_v8  ;;  %v772_v9 = vpop.permute.xlu0 %771  ;;  %v972_v27 = vpop.permute.xlu1 %971 }
 0x4e2   :  { %7407 = vpow2.f32 %v733_v1  ;;  %6741 = vmatpush3.msra.mxu1 %v772_v9 }
 0x4e3   :  { %6742 = vmatprep.subr.mxu1 %v7730_v51  ;;  %7409 = vpow2.f32 %v729_v0 }
 0x4e4   :  { %6743 = vmatpush3.msra.mxu1 %v770_v63 }
 0x4e5   :  { %6744 = vmatprep.subr.mxu1 %v7730_v51  ;;  %v870_v12 = vpop.permute.xlu0 %869 }
 0x4e6   :  { %6745 = vmatpush3.msra.mxu1 %v768_v10  ;;  %6756 = vmatpush3.msra.mxu0 %v870_v12 }
 0x4e7   :  { %6757 = vmatprep.subr.mxu0 %v7730_v51  ;;  %6770 = vmatprep.subr.mxu1 %v7730_v51 }
 0x4e9   :  { %v868_v13 = vpop.permute.xlu0 %867 }
 0x4ea   :  { %6758 = vmatpush3.msra.mxu0 %v868_v13 }
 0x4eb   :  { %v8133_v14 = vpop.eup %7403  ;;  %6759 = vmatprep.subr.mxu0 %v7730_v51 }
 0x4ec   :  { %v746_v15 = vsel %vm700_vm5, %v8133_v14, 0.0  ;;  %v8138_v17 = vpop.eup %7405 }
 0x4ed   :  { %747 = vadd.xlane.f32.xlu1 %v746_v15  ;;  %v740_v20 = vsel %vm700_vm5, %v8138_v17, 0.0 }
 0x4ef   :  { %v8140_v18 = vpop.eup %7407 }
 0x4f0   :  { %v749_v21 = vsel %vm700_vm5, %v8140_v18, 0.0  ;;  %v8146_v23 = vpop.eup %7409 }
 0x4f1   :  { %741 = vadd.xlane.f32.xlu1 %v740_v20  ;;  %750 = vadd.xlane.f32.xlu0 %v749_v21  ;;  %v743_v25 = vsel %vm700_vm5, %v8146_v23, 0.0 }
 0x4f5   :  { %744 = vadd.xlane.f32.xlu0 %v743_v25 }
 0x502   :  { %1077 = vrot.lane.b32.xlu1 %v8022_v58, %s7735_s9 }
 0x506   :  { %1075 = vrot.lane.b32.xlu1 %v8026_v59, %s7735_s9 }
 0x50a   :  { %1073 = vrot.lane.b32.xlu1 %v8014_v56, %s7735_s9 }
 0x50b   :  { %969 = vrot.lane.b32.xlu0 %v8008_v55, %s7735_s9 }
 0x50f   :  { %963 = vrot.lane.b32.xlu0 %v8042_v2, %s7736_s13 }
 0x512   :  { %v718_v30 = vpop.xlane.xlu1 %717 }
 0x513   :  { %965 = vrot.lane.b32.xlu0 %v8058_v4, %s7736_s13  ;;  %v724_v31 = vsub.f32 %v8119_v43, %v718_v30 }
 0x515   :  { %v735_v33 = vmul.f32 1.442695, %v724_v31 }
 0x516   :  { %v866_v32 = vpop.permute.xlu1 %865 }
 0x517   :  { %967 = vrot.lane.b32.xlu0 %v8074_v6, %s7736_s13  ;;  %6760 = vmatpush3.msra.mxu0 %v866_v32  ;;  %7411 = vpow2.f32 %v735_v33 }
 0x518   :  { %6785 = vmatprep.subr.mxu0 %v7730_v51 }
 0x51b   :  { %1069 = vrot.lane.b32.xlu0 %v8066_v5, %s7736_s13 }
 0x51f   :  { %1241 = vrot.lane.b32.xlu0 %v8018_v57, %s7737_s17 }
 0x523   :  { %1339 = vrot.lane.b32.xlu0 %v8022_v58, %s7737_s17 }
 0x524   :  { %v8174_v34 = vpop.eup %7411 }
 0x525   :  { %v752_v36 = vsel %vm700_vm5, %v8174_v34, 0.0 }
 0x527   :  { %1337 = vrot.lane.b32.xlu0 %v8026_v59, %s7737_s17 }
 0x52e   :  { %753 = vadd.xlane.f32.xlu1 %v752_v36 }
 0x53f   :  { %1067 = vrot.lane.b32.xlu1 %v8049_v3, %s7736_s13 }
 0x543   :  { %1071 = vrot.lane.b32.xlu1 %v8085_v7, %s7736_s13 }
 0x547   :  { %1239 = vrot.lane.b32.xlu1 %v8004_v54, %s7737_s17 }
 0x54b   :  { %1237 = vrot.lane.b32.xlu1 %v8008_v55, %s7737_s17 }
 0x54f   :  { %1443 = vrot.lane.b32.xlu1 %v8018_v57, %s7738_s21 }
 0x553   :  { %1441 = vrot.lane.b32.xlu1 %v8004_v54, %s7738_s21 }
 0x557   :  { %1335 = vrot.lane.b32.xlu1 %v8014_v56, %s7737_s17 }
 0x56a   :  { %v739_v37 = vpop.xlane.xlu0 %738 }
 0x56b   :  { %7413 = vrcp.f32 %v739_v37 }
 0x576   :  { %v748_v38 = vpop.xlane.xlu1 %747 }
 0x577   :  { %7415 = vrcp.f32 %v748_v38 }
 0x578   :  { %v7414_v39 = vpop.eup %7413 }
 0x579   :  { %v761_v40 = vmul.f32 %v7414_v39, %v8125_v62 }
 0x57a   :  { %v742_v43 = vpop.xlane.xlu1 %741  ;;  %v751_v44 = vpop.xlane.xlu0 %750 }
 0x57b   :  { %7417 = vrcp.f32 %v742_v43  ;;  %6747 = vmatmul.mubr.msk.f32.vlgmr.msra.gmra.mxu1 %vm700_vm5, %v761_v40 }
 0x57c   :  { %7419 = vrcp.f32 %v751_v44  ;;  %6771 = vmatpush3.xpose.msk.msra.mxu1 %vm500_vm3, %v974_v26  ;;  %6749 = vmatprep.mubr.msk.f32.mxu1 %vm7732_vm2, %v7730_v51 }
 0x57d   :  { %6772 = vmatprep.subr.mxu1 %v7730_v51 }
 0x57e   :  { %v745_v45 = vpop.xlane.xlu0 %744  ;;  %v1078_v47 = vpop.permute.xlu1 %1077 }
 0x57f   :  { %7421 = vrcp.f32 %v745_v45 }
 0x580   :  { %6773 = vmatpush3.xpose.msk.msra.mxu1 %vm500_vm3, %v972_v27 }
 0x581   :  { %6774 = vmatprep.subr.mxu1 %v7730_v51 }
 0x582   :  { %v970_v46 = vpop.permute.xlu0 %969  ;;  %v1076_v53 = vpop.permute.xlu1 %1075 }
 0x584   :  { %v7416_v35 = vpop.eup %7415  ;;  %6775 = vmatpush3.xpose.msk.msra.mxu1 %vm500_vm3, %v970_v46 }
 0x585   :  { %v764_v48 = vmul.f32 %v7416_v35, %v8133_v14  ;;  %6800 = vmatprep.subr.mxu1 %v7730_v51 }
 0x586   :  { %v964_v41 = vpop.permute.xlu0 %963  ;;  %v1074_v0 = vpop.permute.xlu1 %1073 }
 0x587   :  { %6762 = vmatmul.mubr.msk.f32.vlgmr.msra.gmra.mxu0 %vm700_vm5, %v764_v48 }
 0x588   :  { %v7418_v42 = vpop.eup %7417  ;;  %6786 = vmatpush3.xpose.msk.msra.mxu0 %vm500_vm3, %v1078_v47  ;;  %6764 = vmatprep.mubr.msk.f32.mxu0 %vm7732_vm2, %v7730_v51 }
 0x589   :  { %v7420_v49 = vpop.eup %7419  ;;  %6787 = vmatprep.subr.mxu0 %v7730_v51  ;;  %v762_v52 = vmul.f32 %v7418_v42, %v8138_v17 }
 0x58a   :  { %v966_v50 = vpop.permute.xlu0 %965  ;;  %v765_v60 = vmul.f32 %v7420_v49, %v8140_v18 }
 0x58b   :  { %6750 = vmatmul.mubr.msk.f32.gmra.mxu1 %vm700_vm5, %v762_v52 }
 0x58c   :  { %v7422_v61 = vpop.eup %7421  ;;  %6765 = vmatmul.mubr.msk.f32.gmra.mxu0 %vm700_vm5, %v765_v60  ;;  %6752 = vmatprep.mubr.msk.f32.mxu1 %vm7732_vm2, %v7730_v51 }
 0x58d   :  { %6788 = vmatpush3.xpose.msk.msra.mxu0 %vm500_vm3, %v1076_v53  ;;  %v763_v62 = vmul.f32 %v7422_v61, %v8146_v23  ;;  %6767 = vmatprep.mubr.msk.f32.mxu0 %vm7732_vm2, %v7730_v51 }
 0x58e   :  { %6789 = vmatprep.subr.mxu0 %v7730_v51  ;;  %v968_v63 = vpop.permute.xlu0 %967 }
 0x58f   :  { %6753 = vmatmul.mubr.msk.f32.gmra.mxu1 %vm700_vm5, %v763_v62 }
 0x590   :  { %6776 = vmatprep.mubr.msk.f32.mxu1 %vm7732_vm2, %v7730_v51 }
 0x591   :  { %6790 = vmatpush3.xpose.msk.msra.mxu0 %vm500_vm3, %v1074_v0 }
 0x592   :  { %v1070_v1 = vpop.permute.xlu0 %1069  ;;  %6815 = vmatprep.subr.mxu0 %v7730_v51 }
 0x593   :  { %6777 = vmatmul.mubr.msk.f32.vlgmr.msra.gmra.mxu1 %vm500_vm3, %v964_v41 }
 0x594   :  { %6779 = vmatprep.mubr.msk.f32.mxu1 %vm7732_vm2, %v7730_v51 }
 0x596   :  { %v1242_v8 = vpop.permute.xlu0 %1241 }
 0x597   :  { %6780 = vmatmul.mubr.msk.f32.gmra.mxu1 %vm500_vm3, %v966_v50 }
 0x598   :  { %6801 = vmatpush3.msra.mxu1 %v1242_v8  ;;  %6782 = vmatprep.mubr.msk.f32.mxu1 %vm7732_vm2, %v7730_v51 }
 0x599   :  { %6802 = vmatprep.subr.mxu1 %v7730_v51 }
 0x59a   :  { %v1340_v18 = vpop.permute.xlu0 %1339 }
 0x59b   :  { %6783 = vmatmul.mubr.msk.f32.gmra.mxu1 %vm500_vm3, %v968_v63 }
 0x59c   :  { %6806 = vmatprep.mubr.msk.f32.mxu1 %vm7732_vm2, %v7730_v51 }
 0x59e   :  { %v1338_v21 = vpop.permute.xlu0 %1337 }
 0x5b7   :  { %v754_v9 = vpop.xlane.xlu1 %753 }
 0x5b8   :  { %7423 = vrcp.f32 %v754_v9 }
 0x5bb   :  { %v1068_v10 = vpop.permute.xlu1 %1067 }
 0x5bf   :  { %v1072_v12 = vpop.permute.xlu1 %1071 }
 0x5c3   :  { %v1240_v13 = vpop.permute.xlu1 %1239 }
 0x5c4   :  { %6803 = vmatpush3.msra.mxu1 %v1240_v13 }
 0x5c5   :  { %v7424_v14 = vpop.eup %7423  ;;  %6804 = vmatprep.subr.mxu1 %v7730_v51 }
 0x5c6   :  { %v766_v15 = vmul.f32 %v7424_v14, %v8174_v34 }
 0x5c7   :  { %v1238_v17 = vpop.permute.xlu1 %1237 }
 0x5c8   :  { %6768 = vmatmul.mubr.msk.f32.gmra.mxu0 %vm700_vm5, %v766_v15  ;;  %6805 = vmatpush3.msra.mxu1 %v1238_v17 }
 0x5c9   :  { %6791 = vmatprep.mubr.msk.f32.mxu0 %vm7732_vm2, %v7730_v51  ;;  %6830 = vmatprep.subr.mxu1 %v7730_v51 }
 0x5cb   :  { %v8240_v20 = vpop.permute.xlu1 %1443 }
 0x5cc   :  { %6792 = vmatmul.mubr.msk.f32.vlgmr.msra.gmra.mxu0 %vm500_vm3, %v1068_v10 }
 0x5cd   :  { %6816 = vmatpush3.msra.mxu0 %v1340_v18  ;;  %6794 = vmatprep.mubr.msk.f32.mxu0 %vm7732_vm2, %v7730_v51 }
 0x5ce   :  { %6817 = vmatprep.subr.mxu0 %v7730_v51 }
 0x5cf   :  { %6818 = vmatpush3.msra.mxu0 %v1338_v21  ;;  %v8246_v23 = vpop.permute.xlu1 %1441 }
 0x5d0   :  { %6795 = vmatmul.mubr.msk.f32.gmra.mxu0 %vm500_vm3, %v1070_v1  ;;  %6819 = vmatprep.subr.mxu0 %v7730_v51 }
 0x5d1   :  { %6797 = vmatprep.mubr.msk.f32.mxu0 %vm7732_vm2, %v7730_v51 }
 0x5d3   :  { %v1336_v25 = vpop.permute.xlu1 %1335 }
 0x5d4   :  { %6798 = vmatmul.mubr.msk.f32.gmra.mxu0 %vm500_vm3, %v1072_v12 }
 0x5d5   :  { %6820 = vmatpush3.msra.mxu0 %v1336_v25  ;;  %6821 = vmatprep.mubr.msk.f32.mxu0 %vm7732_vm2, %v7730_v51 }
 0x5d6   :  { %6845 = vmatprep.subr.mxu0 %v7730_v51 }
 0x63b   :  { %v8256_v26 = vpop.f32.mrf.mxu1 }
 0x63d   :  { %v6748_v27 = vpop.f32.mrf.mxu1 }
 0x647   :  { %v8258_v30 = vpop.f32.mrf.mxu0 }
 0x649   :  { %v6763_v31 = vpop.f32.mrf.mxu0 }
 0x64b   :  { %v8260_v32 = vpop.f32.mrf.mxu1 }
 0x64c   :  { %v8262_v33 = vpop.f32.mrf.mxu0 }
 0x64d   :  { %v6751_v34 = vpop.f32.mrf.mxu1 }
 0x64e   :  { %v6766_v36 = vpop.f32.mrf.mxu0 }
 0x64f   :  { %v8264_v37 = vpop.f32.mrf.mxu1 }
 0x651   :  { %v6754_v38 = vpop.f32.mrf.mxu1 }
 0x653   :  { %v1053_v39 = vpop.f32.mrf.mxu1 }
 0x654   :  { %v1054_v40 = vadd.f32 %v1053_v39, %v8092_v11 }
 0x655   :  { %v6778_v43 = vpop.f32.mrf.mxu1 }
 0x656   :  { %v1171_v44 = vsel %vm700_vm5, %v1054_v40, -inf }
 0x657   :  { %1172 = vmax.xlane.f32.xlu0 %v1171_v44  ;;  %v1058_v45 = vpop.f32.mrf.mxu1 }
 0x658   :  { %v1059_v46 = vadd.f32 %v1058_v45, %v8092_v11 }
 0x659   :  { %v6781_v35 = vpop.f32.mrf.mxu1 }
 0x65a   :  { %v1174_v47 = vsel %vm700_vm5, %v1059_v46, -inf }
 0x65b   :  { %1175 = vmax.xlane.f32.xlu1 %v1174_v47  ;;  %v1063_v48 = vpop.f32.mrf.mxu1 }
 0x65c   :  { %v1064_v60 = vadd.f32 %v1063_v48, %v8092_v11 }
 0x65d   :  { %v6784_v41 = vpop.f32.mrf.mxu1 }
 0x65e   :  { %v1177_v1 = vsel %vm700_vm5, %v1064_v60, -inf }
 0x688   :  { %v8270_v42 = vpop.f32.mrf.mxu0 }
 0x68a   :  { %v6769_v49 = vpop.f32.mrf.mxu0 }
 0x68c   :  { %v1157_v52 = vpop.f32.mrf.mxu0 }
 0x68d   :  { %v1158_v53 = vadd.f32 %v1157_v52, %v8092_v11 }
 0x68e   :  { %v6793_v50 = vpop.f32.mrf.mxu0 }
 0x68f   :  { %v1180_v61 = vsel %vm700_vm5, %v1158_v53, -inf }
 0x690   :  { %1181 = vmax.xlane.f32.xlu0 %v1180_v61  ;;  %v1162_v62 = vpop.f32.mrf.mxu0 }
 0x691   :  { %v1163_v0 = vadd.f32 %v1162_v62, %v8092_v11 }
 0x692   :  { %v6796_v63 = vpop.f32.mrf.mxu0 }
 0x693   :  { %v1183_v12 = vsel %vm700_vm5, %v1163_v0, -inf }
 0x694   :  { %1178 = vmax.xlane.f32.xlu0 %v1177_v1  ;;  %v1167_v8 = vpop.f32.mrf.mxu0 }
 0x695   :  { %v1168_v9 = vadd.f32 %v1167_v8, %v8092_v11 }
 0x696   :  { %v6799_v10 = vpop.f32.mrf.mxu0 }
 0x697   :  { %v1186_v13 = vsel %vm700_vm5, %v1168_v9, -inf }
 0x698   :  { %1184 = vmax.xlane.f32.xlu0 %v1183_v12  ;;  %1187 = vmax.xlane.f32.xlu1 %v1186_v13 }
 0x6a9   :  { %1547 = vrot.lane.b32.xlu1 %v8022_v58, %s7738_s21 }
 0x6ae   :  { %1439 = vrot.lane.b32.xlu0 %v8008_v55, %s7738_s21 }
 0x6e0   :  { %v1173_v14 = vpop.xlane.xlu0 %1172 }
 0x6e1   :  { %v1189_v15 = vsub.f32 %v1054_v40, %v1173_v14 }
 0x6e3   :  { %v1195_v17 = vmul.f32 1.442695, %v1189_v15 }
 0x6e4   :  { %v1176_v18 = vpop.xlane.xlu1 %1175 }
 0x6e5   :  { %7425 = vpow2.f32 %v1195_v17  ;;  %v1190_v21 = vsub.f32 %v1059_v46, %v1176_v18 }
 0x6e7   :  { %v1197_v25 = vmul.f32 1.442695, %v1190_v21 }
 0x6e9   :  { %7427 = vpow2.f32 %v1197_v25 }
 0x6f2   :  { %v7426_v27 = vpop.eup %7425 }
 0x6f3   :  { %v1207_v31 = vsel %vm700_vm5, %v7426_v27, 0.0 }
 0x6f4   :  { %1208 = vadd.xlane.f32.xlu0 %v1207_v31 }
 0x6f6   :  { %v7428_v34 = vpop.eup %7427 }
 0x6f7   :  { %v1210_v36 = vsel %vm700_vm5, %v7428_v34, 0.0 }
 0x6f8   :  { %1211 = vadd.xlane.f32.xlu1 %v1210_v36 }
 0x719   :  { %v1182_v38 = vpop.xlane.xlu0 %1181 }
 0x71a   :  { %v1192_v39 = vsub.f32 %v1158_v53, %v1182_v38 }
 0x71c   :  { %v1201_v43 = vmul.f32 1.442695, %v1192_v39 }
 0x71d   :  { %v1179_v44 = vpop.xlane.xlu0 %1178 }
 0x71e   :  { %7429 = vpow2.f32 %v1201_v43  ;;  %v1191_v40 = vsub.f32 %v1064_v60, %v1179_v44 }
 0x720   :  { %v1199_v45 = vmul.f32 1.442695, %v1191_v40 }
 0x721   :  { %v1188_v41 = vpop.xlane.xlu1 %1187  ;;  %v1185_v49 = vpop.xlane.xlu0 %1184 }
 0x722   :  { %7431 = vpow2.f32 %v1199_v45  ;;  %v1194_v52 = vsub.f32 %v1168_v9, %v1188_v41  ;;  %v1193_v53 = vsub.f32 %v1163_v0, %v1185_v49 }
 0x724   :  { %v1205_v50 = vmul.f32 1.442695, %v1194_v52  ;;  %v1203_v60 = vmul.f32 1.442695, %v1193_v53 }
 0x725   :  { %v1440_v0 = vpop.permute.xlu0 %1439  ;;  %v1548_v8 = vpop.permute.xlu1 %1547 }
 0x726   :  { %7433 = vpow2.f32 %v1205_v50 }
 0x727   :  { %7435 = vpow2.f32 %v1203_v60 }
 0x72b   :  { %v8286_v35 = vpop.eup %7429 }
 0x72c   :  { %v1216_v46 = vsel %vm700_vm5, %v8286_v35, 0.0 }
 0x72d   :  { %1217 = vadd.xlane.f32.xlu1 %v1216_v46 }
 0x72f   :  { %v8290_v47 = vpop.eup %7431 }
 0x730   :  { %v1213_v48 = vsel %vm700_vm5, %v8290_v47, 0.0 }
 0x731   :  { %1214 = vadd.xlane.f32.xlu0 %v1213_v48 }
 0x733   :  { %v8300_v61 = vpop.eup %7433 }
 0x734   :  { %v8302_v62 = vpop.eup %7435  ;;  %v1222_v63 = vsel %vm700_vm5, %v8300_v61, 0.0 }
 0x735   :  { %v1219_v1 = vsel %vm700_vm5, %v8302_v62, 0.0 }
 0x73e   :  { %1545 = vrot.lane.b32.xlu1 %v8026_v59, %s7738_s21 }
 0x742   :  { %1543 = vrot.lane.b32.xlu1 %v8014_v56, %s7738_s21 }
 0x747   :  { %1433 = vrot.lane.b32.xlu0 %v8042_v2, %s7739_s25 }
 0x766   :  { %1223 = vadd.xlane.f32.xlu1 %v1222_v63  ;;  %1220 = vadd.xlane.f32.xlu0 %v1219_v1 }
 0x777   :  { %1537 = vrot.lane.b32.xlu1 %v8049_v3, %s7739_s25 }
 0x77b   :  { %1541 = vrot.lane.b32.xlu1 %v8085_v7, %s7739_s25 }
 0x77c   :  { %1435 = vrot.lane.b32.xlu0 %v8058_v4, %s7739_s25 }
 0x77d   :  { %v1209_v9 = vpop.xlane.xlu0 %1208 }
 0x77e   :  { %7437 = vrcp.f32 %v1209_v9 }
 0x77f   :  { %1709 = vrot.lane.b32.xlu1 %v8004_v54, %s7740_s7 }
 0x780   :  { %1437 = vrot.lane.b32.xlu0 %v8074_v6, %s7739_s25 }
 0x781   :  { %v1212_v10 = vpop.xlane.xlu1 %1211 }
 0x782   :  { %7439 = vrcp.f32 %v1212_v10 }
 0x783   :  { %1707 = vrot.lane.b32.xlu1 %v8008_v55, %s7740_s7 }
 0x784   :  { %1539 = vrot.lane.b32.xlu0 %v8066_v5, %s7739_s25 }
 0x787   :  { %1913 = vrot.lane.b32.xlu1 %v8018_v57, %s7741_s10 }
 0x788   :  { %1711 = vrot.lane.b32.xlu0 %v8018_v57, %s7740_s7 }
 0x78b   :  { %v7438_v12 = vpop.eup %7437  ;;  %1911 = vrot.lane.b32.xlu1 %v8004_v54, %s7741_s10 }
 0x78c   :  { %v1231_v13 = vmul.f32 %v7438_v12, %v7426_v27  ;;  %1809 = vrot.lane.b32.xlu0 %v8022_v58, %s7740_s7 }
 0x78e   :  { %6807 = vmatmul.mubr.msk.f32.vlgmr.msra.gmra.mxu1 %vm700_vm5, %v1231_v13 }
 0x78f   :  { %v7440_v14 = vpop.eup %7439  ;;  %6831 = vmatpush3.xpose.msk.msra.mxu1 %vm500_vm3, %v8240_v20  ;;  %1805 = vrot.lane.b32.xlu1 %v8014_v56, %s7740_s7 }
 0x790   :  { %1807 = vrot.lane.b32.xlu0 %v8026_v59, %s7740_s7  ;;  %6809 = vmatprep.mubr.msk.f32.mxu1 %vm7732_vm2, %v7730_v51  ;;  %v1232_v15 = vmul.f32 %v7440_v14, %v7428_v34 }
 0x791   :  { %6832 = vmatprep.subr.mxu1 %v7730_v51 }
 0x792   :  { %6810 = vmatmul.mubr.msk.f32.gmra.mxu1 %vm700_vm5, %v1232_v15 }
 0x793   :  { %6833 = vmatpush3.xpose.msk.msra.mxu1 %vm500_vm3, %v8246_v23  ;;  %6812 = vmatprep.mubr.msk.f32.mxu1 %vm7732_vm2, %v7730_v51 }
 0x794   :  { %6834 = vmatprep.subr.mxu1 %v7730_v51 }
 0x797   :  { %6835 = vmatpush3.xpose.msk.msra.mxu1 %vm500_vm3, %v1440_v0 }
 0x798   :  { %6860 = vmatprep.subr.mxu1 %v7730_v51 }
 0x7b6   :  { %v1218_v20 = vpop.xlane.xlu1 %1217 }
 0x7b7   :  { %7441 = vrcp.f32 %v1218_v20 }
 0x7ba   :  { %v1215_v17 = vpop.xlane.xlu0 %1214  ;;  %v1546_v23 = vpop.permute.xlu1 %1545 }
 0x7bb   :  { %7443 = vrcp.f32 %v1215_v17 }
 0x7be   :  { %v1434_v31 = vpop.permute.xlu0 %1433  ;;  %v1544_v34 = vpop.permute.xlu1 %1543 }
 0x7c4   :  { %v7442_v18 = vpop.eup %7441 }
 0x7c5   :  { %v1234_v21 = vmul.f32 %v7442_v18, %v8286_v35 }
 0x7c7   :  { %6822 = vmatmul.mubr.msk.f32.vlgmr.msra.gmra.mxu0 %vm700_vm5, %v1234_v21 }
 0x7c8   :  { %v7444_v25 = vpop.eup %7443  ;;  %6846 = vmatpush3.xpose.msk.msra.mxu0 %vm500_vm3, %v1548_v8  ;;  %6824 = vmatprep.mubr.msk.f32.mxu0 %vm7732_vm2, %v7730_v51 }
 0x7c9   :  { %6847 = vmatprep.subr.mxu0 %v7730_v51  ;;  %v1233_v27 = vmul.f32 %v7444_v25, %v8290_v47 }
 0x7cb   :  { %6813 = vmatmul.mubr.msk.f32.gmra.mxu1 %vm700_vm5, %v1233_v27 }
 0x7cc   :  { %6848 = vmatpush3.xpose.msk.msra.mxu0 %vm500_vm3, %v1546_v23  ;;  %6836 = vmatprep.mubr.msk.f32.mxu1 %vm7732_vm2, %v7730_v51 }
 0x7cd   :  { %6849 = vmatprep.subr.mxu0 %v7730_v51 }
 0x7cf   :  { %6837 = vmatmul.mubr.msk.f32.vlgmr.msra.gmra.mxu1 %vm500_vm3, %v1434_v31 }
 0x7d0   :  { %6850 = vmatpush3.xpose.msk.msra.mxu0 %vm500_vm3, %v1544_v34  ;;  %6839 = vmatprep.mubr.msk.f32.mxu1 %vm7732_vm2, %v7730_v51 }
 0x7d1   :  { %6875 = vmatprep.subr.mxu0 %v7730_v51 }
 0x7ef   :  { %v1224_v36 = vpop.xlane.xlu1 %1223  ;;  %v1221_v38 = vpop.xlane.xlu0 %1220 }
 0x7f0   :  { %7445 = vrcp.f32 %v1221_v38 }
 0x7f1   :  { %7447 = vrcp.f32 %v1224_v36 }
 0x7f3   :  { %v1538_v39 = vpop.permute.xlu1 %1537  ;;  %v1436_v43 = vpop.permute.xlu0 %1435 }
 0x7f4   :  { %6840 = vmatmul.mubr.msk.f32.gmra.mxu1 %vm500_vm3, %v1436_v43 }
 0x7f5   :  { %6842 = vmatprep.mubr.msk.f32.mxu1 %vm7732_vm2, %v7730_v51 }
 0x7f7   :  { %v1542_v44 = vpop.permute.xlu1 %1541  ;;  %v1438_v40 = vpop.permute.xlu0 %1437 }
 0x7f8   :  { %6843 = vmatmul.mubr.msk.f32.gmra.mxu1 %vm500_vm3, %v1438_v40 }
 0x7f9   :  { %6866 = vmatprep.mubr.msk.f32.mxu1 %vm7732_vm2, %v7730_v51 }
 0x7fb   :  { %v1710_v45 = vpop.permute.xlu1 %1709  ;;  %v1540_v35 = vpop.permute.xlu0 %1539 }
 0x7fd   :  { %v7446_v46 = vpop.eup %7445 }
 0x7fe   :  { %v1235_v41 = vmul.f32 %v7446_v46, %v8302_v62  ;;  %v7448_v49 = vpop.eup %7447 }
 0x7ff   :  { %v1708_v47 = vpop.permute.xlu1 %1707  ;;  %v1712_v48 = vpop.permute.xlu0 %1711  ;;  %v1236_v53 = vmul.f32 %v7448_v49, %v8300_v61 }
 0x800   :  { %6861 = vmatpush3.msra.mxu1 %v1712_v48  ;;  %6825 = vmatmul.mubr.msk.f32.gmra.mxu0 %vm700_vm5, %v1235_v41 }
 0x801   :  { %6862 = vmatprep.subr.mxu1 %v7730_v51  ;;  %6827 = vmatprep.mubr.msk.f32.mxu0 %vm7732_vm2, %v7730_v51 }
 0x802   :  { %6863 = vmatpush3.msra.mxu1 %v1710_v45 }
 0x803   :  { %v8376_v52 = vpop.permute.xlu1 %1913  ;;  %6864 = vmatprep.subr.mxu1 %v7730_v51  ;;  %v1810_v50 = vpop.permute.xlu0 %1809 }
 0x804   :  { %6865 = vmatpush3.msra.mxu1 %v1708_v47  ;;  %6828 = vmatmul.mubr.msk.f32.gmra.mxu0 %vm700_vm5, %v1236_v53 }
 0x805   :  { %6890 = vmatprep.subr.mxu1 %v7730_v51  ;;  %6851 = vmatprep.mubr.msk.f32.mxu0 %vm7732_vm2, %v7730_v51 }
 0x807   :  { %v8384_v60 = vpop.permute.xlu1 %1911  ;;  %v1808_v62 = vpop.permute.xlu0 %1807 }
 0x808   :  { %6852 = vmatmul.mubr.msk.f32.vlgmr.msra.gmra.mxu0 %vm500_vm3, %v1538_v39 }
 0x809   :  { %6876 = vmatpush3.msra.mxu0 %v1810_v50  ;;  %6854 = vmatprep.mubr.msk.f32.mxu0 %vm7732_vm2, %v7730_v51 }
 0x80a   :  { %6877 = vmatprep.subr.mxu0 %v7730_v51 }
 0x80b   :  { %v1806_v61 = vpop.permute.xlu1 %1805  ;;  %6878 = vmatpush3.msra.mxu0 %v1808_v62 }
 0x80c   :  { %6879 = vmatprep.subr.mxu0 %v7730_v51  ;;  %6855 = vmatmul.mubr.msk.f32.gmra.mxu0 %vm500_vm3, %v1540_v35 }
 0x80d   :  { %6880 = vmatpush3.msra.mxu0 %v1806_v61  ;;  %6857 = vmatprep.mubr.msk.f32.mxu0 %vm7732_vm2, %v7730_v51 }
 0x80e   :  { %6905 = vmatprep.subr.mxu0 %v7730_v51 }
 0x810   :  { %6858 = vmatmul.mubr.msk.f32.gmra.mxu0 %vm500_vm3, %v1542_v44 }
 0x811   :  { %6881 = vmatprep.mubr.msk.f32.mxu0 %vm7732_vm2, %v7730_v51 }
 0x84e   :  { %v8398_v63 = vpop.f32.mrf.mxu1 }
 0x850   :  { %v6808_v1 = vpop.f32.mrf.mxu1 }
 0x852   :  { %v8400_v0 = vpop.f32.mrf.mxu1 }
 0x854   :  { %v6811_v8 = vpop.f32.mrf.mxu1 }
 0x887   :  { %v8402_v9 = vpop.f32.mrf.mxu0 }
 0x889   :  { %v6823_v10 = vpop.f32.mrf.mxu0 }
 0x88b   :  { %v8404_v12 = vpop.f32.mrf.mxu1 }
 0x88d   :  { %v6814_v13 = vpop.f32.mrf.mxu1 }
 0x88f   :  { %v1523_v14 = vpop.f32.mrf.mxu1 }
 0x890   :  { %v1524_v15 = vadd.f32 %v1523_v14, %v8092_v11 }
 0x891   :  { %v6838_v20 = vpop.f32.mrf.mxu1 }
 0x892   :  { %v1641_v17 = vsel %vm700_vm5, %v1524_v15, -inf }
 0x893   :  { %1642 = vmax.xlane.f32.xlu0 %v1641_v17 }
 0x8b4   :  { %v1528_v18 = vpop.f32.mrf.mxu1 }
 0x8b5   :  { %v1529_v21 = vadd.f32 %v1528_v18, %v8092_v11 }
 0x8b6   :  { %v6841_v25 = vpop.f32.mrf.mxu1 }
 0x8b7   :  { %v1644_v23 = vsel %vm700_vm5, %v1529_v21, -inf }
 0x8b8   :  { %1645 = vmax.xlane.f32.xlu1 %v1644_v23  ;;  %v1533_v27 = vpop.f32.mrf.mxu1 }
 0x8b9   :  { %v1534_v45 = vadd.f32 %v1533_v27, %v8092_v11 }
 0x8ba   :  { %v6844_v31 = vpop.f32.mrf.mxu1 }
 0x8bb   :  { %v1647_v41 = vsel %vm700_vm5, %v1534_v45, -inf }
 0x8c0   :  { %v8410_v34 = vpop.f32.mrf.mxu0 }
 0x8c2   :  { %v6826_v36 = vpop.f32.mrf.mxu0 }
 0x8c4   :  { %v8412_v38 = vpop.f32.mrf.mxu0 }
 0x8c6   :  { %v6829_v39 = vpop.f32.mrf.mxu0 }
 0x8c8   :  { %v1627_v43 = vpop.f32.mrf.mxu0 }
 0x8c9   :  { %v1628_v44 = vadd.f32 %v1627_v43, %v8092_v11 }
 0x8ca   :  { %v6853_v40 = vpop.f32.mrf.mxu0 }
 0x8cb   :  { %v1650_v35 = vsel %vm700_vm5, %v1628_v44, -inf }
 0x8cc   :  { %1651 = vmax.xlane.f32.xlu0 %v1650_v35  ;;  %v1632_v46 = vpop.f32.mrf.mxu0 }
 0x8cd   :  { %v1633_v48 = vadd.f32 %v1632_v46, %v8092_v11 }
 0x8ce   :  { %v6856_v47 = vpop.f32.mrf.mxu0 }
 0x8cf   :  { %v1653_v62 = vsel %vm700_vm5, %v1633_v48, -inf }
 0x8d0   :  { %1648 = vmax.xlane.f32.xlu0 %v1647_v41  ;;  %v1637_v49 = vpop.f32.mrf.mxu0 }
 0x8d1   :  { %v1638_v53 = vadd.f32 %v1637_v49, %v8092_v11 }
 0x8d2   :  { %v6859_v50 = vpop.f32.mrf.mxu0 }
 0x8d3   :  { %v1656_v61 = vsel %vm700_vm5, %v1638_v53, -inf }
 0x8d4   :  { %1654 = vmax.xlane.f32.xlu0 %v1653_v62  ;;  %1657 = vmax.xlane.f32.xlu1 %v1656_v61 }
 0x8e5   :  { %2017 = vrot.lane.b32.xlu1 %v8022_v58, %s7741_s10 }
 0x8ea   :  { %1909 = vrot.lane.b32.xlu0 %v8008_v55, %s7741_s10 }
 0x91c   :  { %v1643_v1 = vpop.xlane.xlu0 %1642 }
 0x91d   :  { %v1659_v8 = vsub.f32 %v1524_v15, %v1643_v1 }
 0x91f   :  { %v1665_v10 = vmul.f32 1.442695, %v1659_v8 }
 0x921   :  { %7449 = vpow2.f32 %v1665_v10 }
 0x92e   :  { %v7450_v13 = vpop.eup %7449 }
 0x92f   :  { %v1677_v14 = vsel %vm700_vm5, %v7450_v13, 0.0 }
 0x930   :  { %1678 = vadd.xlane.f32.xlu0 %v1677_v14 }
 0x941   :  { %v1646_v20 = vpop.xlane.xlu1 %1645 }
 0x942   :  { %v1660_v17 = vsub.f32 %v1529_v21, %v1646_v20 }
 0x944   :  { %v1667_v18 = vmul.f32 1.442695, %v1660_v17 }
 0x946   :  { %7451 = vpow2.f32 %v1667_v18 }
 0x953   :  { %v7452_v25 = vpop.eup %7451 }
 0x954   :  { %v1680_v23 = vsel %vm700_vm5, %v7452_v25, 0.0 }
 0x955   :  { %1681 = vadd.xlane.f32.xlu1 %v1680_v23  ;;  %v1652_v27 = vpop.xlane.xlu0 %1651 }
 0x956   :  { %v1662_v31 = vsub.f32 %v1628_v44, %v1652_v27 }
 0x958   :  { %v1671_v36 = vmul.f32 1.442695, %v1662_v31 }
 0x959   :  { %v1649_v39 = vpop.xlane.xlu0 %1648 }
 0x95a   :  { %7453 = vpow2.f32 %v1671_v36  ;;  %v1661_v15 = vsub.f32 %v1534_v45, %v1649_v39 }
 0x95c   :  { %v1669_v43 = vmul.f32 1.442695, %v1661_v15 }
 0x95d   :  { %v1658_v44 = vpop.xlane.xlu1 %1657  ;;  %v1655_v45 = vpop.xlane.xlu0 %1654 }
 0x95e   :  { %7455 = vpow2.f32 %v1669_v43  ;;  %v1664_v47 = vsub.f32 %v1638_v53, %v1658_v44  ;;  %v1663_v41 = vsub.f32 %v1633_v48, %v1655_v45 }
 0x960   :  { %v1675_v49 = vmul.f32 1.442695, %v1664_v47  ;;  %v1673_v50 = vmul.f32 1.442695, %v1663_v41 }
 0x962   :  { %7457 = vpow2.f32 %v1675_v49 }
 0x963   :  { %7459 = vpow2.f32 %v1673_v50 }
 0x967   :  { %v7454_v40 = vpop.eup %7453 }
 0x968   :  { %v1686_v35 = vsel %vm700_vm5, %v7454_v40, 0.0 }
 0x969   :  { %1687 = vadd.xlane.f32.xlu1 %v1686_v35 }
 0x96b   :  { %v7456_v46 = vpop.eup %7455 }
 0x96c   :  { %v1683_v21 = vsel %vm700_vm5, %v7456_v46, 0.0 }
 0x96d   :  { %1684 = vadd.xlane.f32.xlu0 %v1683_v21 }
 0x96f   :  { %v8436_v62 = vpop.eup %7457 }
 0x970   :  { %v8438_v61 = vpop.eup %7459  ;;  %v1692_v1 = vsel %vm700_vm5, %v8436_v62, 0.0 }
 0x971   :  { %v1689_v8 = vsel %vm700_vm5, %v8438_v61, 0.0 }
 0x97a   :  { %2015 = vrot.lane.b32.xlu1 %v8026_v59, %s7741_s10 }
 0x97e   :  { %2013 = vrot.lane.b32.xlu1 %v8014_v56, %s7741_s10 }
 0x983   :  { %1903 = vrot.lane.b32.xlu0 %v8042_v2, %s7742_s11  ;;  %v1910_v2 = vpop.permute.xlu0 %1909 }
 0x9a2   :  { %1693 = vadd.xlane.f32.xlu1 %v1692_v1  ;;  %1690 = vadd.xlane.f32.xlu0 %v1689_v8 }
 0x9b3   :  { %2007 = vrot.lane.b32.xlu1 %v8049_v3, %s7742_s11  ;;  %v2018_v3 = vpop.permute.xlu1 %2017 }
 0x9b7   :  { %2011 = vrot.lane.b32.xlu1 %v8085_v7, %s7742_s11 }
 0x9b8   :  { %1905 = vrot.lane.b32.xlu0 %v8058_v4, %s7742_s11 }
 0x9b9   :  { %v1679_v48 = vpop.xlane.xlu0 %1678 }
 0x9ba   :  { %7461 = vrcp.f32 %v1679_v48 }
 0x9bc   :  { %1907 = vrot.lane.b32.xlu0 %v8074_v6, %s7742_s11 }
 0x9c0   :  { %2009 = vrot.lane.b32.xlu0 %v8066_v5, %s7742_s11 }
 0x9c7   :  { %v7462_v53 = vpop.eup %7461 }
 0x9c8   :  { %v1701_v10 = vmul.f32 %v7462_v53, %v7450_v13 }
 0x9ca   :  { %6867 = vmatmul.mubr.msk.f32.vlgmr.msra.gmra.mxu1 %vm700_vm5, %v1701_v10 }
 0x9cb   :  { %6891 = vmatpush3.xpose.msk.msra.mxu1 %vm500_vm3, %v8376_v52  ;;  %6869 = vmatprep.mubr.msk.f32.mxu1 %vm7732_vm2, %v7730_v51 }
 0x9cc   :  { %6892 = vmatprep.subr.mxu1 %v7730_v51 }
 0x9cf   :  { %6893 = vmatpush3.xpose.msk.msra.mxu1 %vm500_vm3, %v8384_v60 }
 0x9d0   :  { %6894 = vmatprep.subr.mxu1 %v7730_v51 }
 0x9d3   :  { %6895 = vmatpush3.xpose.msk.msra.mxu1 %vm500_vm3, %v1910_v2 }
 0x9d4   :  { %6920 = vmatprep.subr.mxu1 %v7730_v51 }
 0x9de   :  { %v1682_v4 = vpop.xlane.xlu1 %1681 }
 0x9df   :  { %7463 = vrcp.f32 %v1682_v4 }
 0x9ec   :  { %v7464_v5 = vpop.eup %7463 }
 0x9ed   :  { %v1702_v6 = vmul.f32 %v7464_v5, %v7452_v25 }
 0x9ef   :  { %6870 = vmatmul.mubr.msk.f32.gmra.mxu1 %vm700_vm5, %v1702_v6 }
 0x9f0   :  { %6872 = vmatprep.mubr.msk.f32.mxu1 %vm7732_vm2, %v7730_v51 }
 0x9f2   :  { %v1688_v7 = vpop.xlane.xlu1 %1687 }
 0x9f3   :  { %7465 = vrcp.f32 %v1688_v7 }
 0x9f6   :  { %v1685_v52 = vpop.xlane.xlu0 %1684  ;;  %v2016_v20 = vpop.permute.xlu1 %2015 }
 0x9f7   :  { %7467 = vrcp.f32 %v1685_v52 }
 0x9fa   :  { %v1904_v18 = vpop.permute.xlu0 %1903  ;;  %v2014_v25 = vpop.permute.xlu1 %2013 }
 0xa00   :  { %v7466_v60 = vpop.eup %7465 }
 0xa01   :  { %v1704_v13 = vmul.f32 %v7466_v60, %v7454_v40 }
 0xa03   :  { %6882 = vmatmul.mubr.msk.f32.vlgmr.msra.gmra.mxu0 %vm700_vm5, %v1704_v13 }
 0xa04   :  { %v7468_v14 = vpop.eup %7467  ;;  %6906 = vmatpush3.xpose.msk.msra.mxu0 %vm500_vm3, %v2018_v3  ;;  %6884 = vmatprep.mubr.msk.f32.mxu0 %vm7732_vm2, %v7730_v51 }
 0xa05   :  { %6907 = vmatprep.subr.mxu0 %v7730_v51  ;;  %v1703_v17 = vmul.f32 %v7468_v14, %v7456_v46 }
 0xa07   :  { %6873 = vmatmul.mubr.msk.f32.gmra.mxu1 %vm700_vm5, %v1703_v17 }
 0xa08   :  { %6908 = vmatpush3.xpose.msk.msra.mxu0 %vm500_vm3, %v2016_v20  ;;  %6896 = vmatprep.mubr.msk.f32.mxu1 %vm7732_vm2, %v7730_v51 }
 0xa09   :  { %6909 = vmatprep.subr.mxu0 %v7730_v51 }
 0xa0b   :  { %6897 = vmatmul.mubr.msk.f32.vlgmr.msra.gmra.mxu1 %vm500_vm3, %v1904_v18 }
 0xa0c   :  { %6910 = vmatpush3.xpose.msk.msra.mxu0 %vm500_vm3, %v2014_v25  ;;  %6899 = vmatprep.mubr.msk.f32.mxu1 %vm7732_vm2, %v7730_v51 }
 0xa0d   :  { %6935 = vmatprep.subr.mxu0 %v7730_v51 }
 0xa2b   :  { %v1691_v23 = vpop.xlane.xlu0 %1690  ;;  %v1694_v27 = vpop.xlane.xlu1 %1693 }
 0xa2c   :  { %7469 = vrcp.f32 %v1691_v23 }
 0xa2d   :  { %7471 = vrcp.f32 %v1694_v27 }
 0xa2f   :  { %v1906_v31 = vpop.permute.xlu0 %1905  ;;  %v2008_v35 = vpop.permute.xlu1 %2007 }
 0xa30   :  { %6900 = vmatmul.mubr.msk.f32.gmra.mxu1 %vm500_vm3, %v1906_v31 }
 0xa31   :  { %6902 = vmatprep.mubr.msk.f32.mxu1 %vm7732_vm2, %v7730_v51 }
 0xa33   :  { %v1908_v36 = vpop.permute.xlu0 %1907  ;;  %v2012_v21 = vpop.permute.xlu1 %2011 }
 0xa34   :  { %6903 = vmatmul.mubr.msk.f32.gmra.mxu1 %vm500_vm3, %v1908_v36 }
 0xa35   :  { %6926 = vmatprep.mubr.msk.f32.mxu1 %vm7732_vm2, %v7730_v51 }
 0xa37   :  { %v2010_v46 = vpop.permute.xlu0 %2009 }
 0xa39   :  { %v7470_v39 = vpop.eup %7469 }
 0xa3a   :  { %v1705_v15 = vmul.f32 %v7470_v39, %v8438_v61  ;;  %v7472_v43 = vpop.eup %7471 }
 0xa3b   :  { %v1706_v40 = vmul.f32 %v7472_v43, %v8436_v62 }
 0xa3c   :  { %6885 = vmatmul.mubr.msk.f32.gmra.mxu0 %vm700_vm5, %v1705_v15 }
 0xa3d   :  { %6887 = vmatprep.mubr.msk.f32.mxu0 %vm7732_vm2, %v7730_v51 }
 0xa40   :  { %6888 = vmatmul.mubr.msk.f32.gmra.mxu0 %vm700_vm5, %v1706_v40 }
 0xa41   :  { %6911 = vmatprep.mubr.msk.f32.mxu0 %vm7732_vm2, %v7730_v51 }
 0xa44   :  { %6912 = vmatmul.mubr.msk.f32.vlgmr.msra.gmra.mxu0 %vm500_vm3, %v2008_v35 }
 0xa45   :  { %6914 = vmatprep.mubr.msk.f32.mxu0 %vm7732_vm2, %v7730_v51 }
 0xa48   :  { %6915 = vmatmul.mubr.msk.f32.gmra.mxu0 %vm500_vm3, %v2010_v46 }
 0xa49   :  { %6917 = vmatprep.mubr.msk.f32.mxu0 %vm7732_vm2, %v7730_v51 }
 0xa4c   :  { %6918 = vmatmul.mubr.msk.f32.gmra.mxu0 %vm500_vm3, %v2012_v21 }
 0xa4d   :  { %6941 = vmatprep.mubr.msk.f32.mxu0 %vm7732_vm2, %v7730_v51 }
 0xa8a   :  { %v8506_v44 = vpop.f32.mrf.mxu1 }
 0xa8c   :  { %v6868_v45 = vpop.f32.mrf.mxu1 }
 0xaaf   :  { %v8508_v47 = vpop.f32.mrf.mxu1 }
 0xab1   :  { %v6871_v41 = vpop.f32.mrf.mxu1 }
 0xac3   :  { %v8510_v49 = vpop.f32.mrf.mxu0 }
 0xac5   :  { %v6883_v50 = vpop.f32.mrf.mxu0 }
 0xac7   :  { %v8512_v62 = vpop.f32.mrf.mxu1 }
 0xac9   :  { %v6874_v61 = vpop.f32.mrf.mxu1 }
 0xacb   :  { %v1993_v1 = vpop.f32.mrf.mxu1 }
 0xacc   :  { %v1994_v8 = vadd.f32 %v1993_v1, %v8092_v11 }
 0xacd   :  { %v6898_v2 = vpop.f32.mrf.mxu1 }
 0xace   :  { %v2111_v48 = vsel %vm700_vm5, %v1994_v8, -inf }
 0xacf   :  { %2112 = vmax.xlane.f32.xlu0 %v2111_v48 }
 0xaf0   :  { %v1998_v53 = vpop.f32.mrf.mxu1 }
 0xaf1   :  { %v1999_v10 = vadd.f32 %v1998_v53, %v8092_v11 }
 0xaf2   :  { %v6901_v3 = vpop.f32.mrf.mxu1 }
 0xaf3   :  { %v2114_v4 = vsel %vm700_vm5, %v1999_v10, -inf }
 0xaf4   :  { %2115 = vmax.xlane.f32.xlu1 %v2114_v4  ;;  %v2003_v5 = vpop.f32.mrf.mxu1 }
 0xaf5   :  { %v2004_v6 = vadd.f32 %v2003_v5, %v8092_v11 }
 0xaf6   :  { %v6904_v7 = vpop.f32.mrf.mxu1 }
 0xaf7   :  { %v2117_v52 = vsel %vm700_vm5, %v2004_v6, -inf }
 0xaf8   :  { %2118 = vmax.xlane.f32.xlu0 %v2117_v52 }
 0xafc   :  { %v8520_v60 = vpop.f32.mrf.mxu0 }
 0xafe   :  { %v6886_v13 = vpop.f32.mrf.mxu0 }
 0xb00   :  { %v8522_v14 = vpop.f32.mrf.mxu0 }
 0xb02   :  { %v6889_v20 = vpop.f32.mrf.mxu0 }
 0xb04   :  { %v2097_v17 = vpop.f32.mrf.mxu0 }
 0xb05   :  { %v2098_v18 = vadd.f32 %v2097_v17, %v8092_v11 }
 0xb06   :  { %v6913_v25 = vpop.f32.mrf.mxu0 }
 0xb07   :  { %v2120_v23 = vsel %vm700_vm5, %v2098_v18, -inf }
 0xb08   :  { %2121 = vmax.xlane.f32.xlu0 %v2120_v23  ;;  %v2102_v27 = vpop.f32.mrf.mxu0 }
 0xb09   :  { %v2103_v31 = vadd.f32 %v2102_v27, %v8092_v11 }
 0xb0a   :  { %v6916_v36 = vpop.f32.mrf.mxu0 }
 0xb0b   :  { %v2123_v39 = vsel %vm700_vm5, %v2103_v31, -inf }
 0xb0c   :  { %2124 = vmax.xlane.f32.xlu0 %v2123_v39  ;;  %v2107_v15 = vpop.f32.mrf.mxu0 }
 0xb0d   :  { %v2108_v43 = vadd.f32 %v2107_v15, %v8092_v11 }
 0xb0e   :  { %v6919_v40 = vpop.f32.mrf.mxu0 }
 0xb0f   :  { %v2126_v35 = vsel %vm700_vm5, %v2108_v43, -inf }
 0xb10   :  { %2127 = vmax.xlane.f32.xlu1 %v2126_v35 }
 0xb21   :  { %2179 = vrot.lane.b32.xlu1 %v8004_v54, %s7743_s15 }
 0xb22   :  { %2181 = vrot.lane.b32.xlu0 %v8018_v57, %s7743_s15 }
 0xb25   :  { %2177 = vrot.lane.b32.xlu1 %v8008_v55, %s7743_s15 }
 0xb29   :  { %2279 = vrot.lane.b32.xlu1 %v8022_v58, %s7743_s15 }
 0xb58   :  { %v2113_v46 = vpop.xlane.xlu0 %2112 }
 0xb59   :  { %v2129_v21 = vsub.f32 %v1994_v8, %v2113_v46 }
 0xb5b   :  { %v2135_v45 = vmul.f32 1.442695, %v2129_v21 }
 0xb5d   :  { %7473 = vpow2.f32 %v2135_v45 }
 0xb6a   :  { %v8538_v41 = vpop.eup %7473 }
 0xb6b   :  { %v2147_v50 = vsel %vm700_vm5, %v8538_v41, 0.0 }
 0xb6c   :  { %2148 = vadd.xlane.f32.xlu0 %v2147_v50 }
 0xb7d   :  { %v2116_v54 = vpop.xlane.xlu1 %2115 }
 0xb7e   :  { %v2130_v61 = vsub.f32 %v1999_v10, %v2116_v54 }
 0xb80   :  { %v2137_v1 = vmul.f32 1.442695, %v2130_v61 }
 0xb81   :  { %v2119_v57 = vpop.xlane.xlu0 %2118 }
 0xb82   :  { %7475 = vpow2.f32 %v2137_v1  ;;  %v2131_v2 = vsub.f32 %v2004_v6, %v2119_v57  ;;  %v2467_v57 = vld [vmem:[%s7786_s29 + $0x18] sm:$0xff] }
 0xb84   :  { %v2139_v55 = vmul.f32 1.442695, %v2131_v2  ;;  %v2466_v2 = vld [vmem:[%s7786_s29 + $0x10] sm:$0xff] }
 0xb86   :  { %7477 = vpow2.f32 %v2139_v55  ;;  %v2465_v55 = vld [vmem:[%s7786_s29 + $0x8] sm:$0xff] }
 0xb8f   :  { %v7476_v48 = vpop.eup %7475 }
 0xb90   :  { %v2150_v58 = vsel %vm700_vm5, %v7476_v48, 0.0 }
 0xb91   :  { %2151 = vadd.xlane.f32.xlu1 %v2150_v58  ;;  %v2122_v8 = vpop.xlane.xlu0 %2121 }
 0xb92   :  { %v2132_v3 = vsub.f32 %v2098_v18, %v2122_v8 }
 0xb93   :  { %v7478_v53 = vpop.eup %7477 }
 0xb94   :  { %v2153_v4 = vsel %vm700_vm5, %v7478_v53, 0.0  ;;  %v2141_v5 = vmul.f32 1.442695, %v2132_v3 }
 0xb95   :  { %2154 = vadd.xlane.f32.xlu0 %v2153_v4  ;;  %v2125_v7 = vpop.xlane.xlu0 %2124 }
 0xb96   :  { %7479 = vpow2.f32 %v2141_v5  ;;  %v2133_v10 = vsub.f32 %v2103_v31, %v2125_v7 }
 0xb98   :  { %v2143_v52 = vmul.f32 1.442695, %v2133_v10 }
 0xb99   :  { %v2128_v13 = vpop.xlane.xlu1 %2127  ;;  %v2182_v20 = vpop.permute.xlu0 %2181 }
 0xb9a   :  { %7481 = vpow2.f32 %v2143_v52  ;;  %v2134_v6 = vsub.f32 %v2108_v43, %v2128_v13  ;;  %6921 = vmatpush3.msra.mxu1 %v2182_v20 }
 0xb9b   :  { %6922 = vmatprep.subr.mxu1 %v7730_v51 }
 0xb9c   :  { %v2145_v17 = vmul.f32 1.442695, %v2134_v6 }
 0xb9d   :  { %v2180_v25 = vpop.permute.xlu1 %2179 }
 0xb9e   :  { %7483 = vpow2.f32 %v2145_v17  ;;  %6923 = vmatpush3.msra.mxu1 %v2180_v25 }
 0xb9f   :  { %6924 = vmatprep.subr.mxu1 %v7730_v51 }
 0xba1   :  { %v2178_v18 = vpop.permute.xlu1 %2177 }
 0xba2   :  { %6925 = vmatpush3.msra.mxu1 %v2178_v18 }
 0xba3   :  { %v7480_v23 = vpop.eup %7479  ;;  %6950 = vmatprep.subr.mxu1 %v2467_v57 }
 0xba4   :  { %v2156_v27 = vsel %vm700_vm5, %v7480_v23, 0.0 }
 0xba5   :  { %v2280_v31 = vpop.permute.xlu1 %2279  ;;  %2157 = vadd.xlane.f32.xlu1 %v2156_v27 }
 0xba6   :  { %6936 = vmatpush3.msra.mxu0 %v2280_v31 }
 0xba7   :  { %v7482_v36 = vpop.eup %7481  ;;  %6937 = vmatprep.subr.mxu0 %v7730_v51 }
 0xba8   :  { %v2159_v39 = vsel %vm700_vm5, %v7482_v36, 0.0 }
 0xba9   :  { %2160 = vadd.xlane.f32.xlu0 %v2159_v39 }
 0xbab   :  { %v7484_v15 = vpop.eup %7483 }
 0xbac   :  { %v2162_v43 = vsel %vm700_vm5, %v7484_v15, 0.0 }
 0xbad   :  { %2163 = vadd.xlane.f32.xlu1 %v2162_v43 }
 0xbbe   :  { %2275 = vrot.lane.b32.xlu1 %v8014_v56, %s7743_s15 }
 0xbbf   :  { %2277 = vrot.lane.b32.xlu0 %v8026_v59, %s7743_s15 }
 0xbc2   :  { %2381 = vrot.lane.b32.xlu1 %v8400_v0, %s7744_s16 }
 0xbc3   :  { %2379 = vrot.lane.b32.xlu0 %v8398_v63, %s7744_s16 }
 0xbc6   :  { %2405 = vrot.lane.b32.xlu1 %v8508_v47, %s7745_s18 }
 0xbc7   :  { %2403 = vrot.lane.b32.xlu0 %v8506_v44, %s7745_s18 }
 0xbca   :  { %2385 = vrot.lane.b32.xlu1 %v8402_v9, %s7744_s16 }
 0xbcb   :  { %2383 = vrot.lane.b32.xlu0 %v8404_v12, %s7744_s16 }
 0xbce   :  { %2409 = vrot.lane.b32.xlu1 %v8510_v49, %s7745_s18 }
 0xbcf   :  { %2407 = vrot.lane.b32.xlu0 %v8512_v62, %s7745_s18 }
 0xbf5   :  { %v2149_v56 = vpop.xlane.xlu0 %2148 }
 0xbf6   :  { %7485 = vrcp.f32 %v2149_v56 }
 0xc03   :  { %v7486_v59 = vpop.eup %7485 }
 0xc04   :  { %v2171_v63 = vmul.f32 %v7486_v59, %v8538_v41 }
 0xc06   :  { %6927 = vmatmul.mubr.msk.f32.vlgmr.msra.gmra.mxu1 %vm700_vm5, %v2171_v63 }
 0xc07   :  { %6929 = vmatprep.mubr.msk.f32.mxu1 %vm7732_vm2, %v7730_v51  ;;  %6951 = vmatpush3.msra.mxu1 %v2467_v57 }
 0xc08   :  { %6952 = vmatprep.subr.mxu1 %v2466_v2 }
 0xc09   :  { %6953 = vmatpush3.msra.mxu1 %v2466_v2 }
 0xc0a   :  { %6954 = vmatprep.subr.mxu1 %v2465_v55 }
 0xc0b   :  { %6955 = vmatpush3.msra.mxu1 %v2465_v55 }
 0xc1a   :  { %v2152_v0 = vpop.xlane.xlu1 %2151 }
 0xc1b   :  { %7487 = vrcp.f32 %v2152_v0 }
 0xc1e   :  { %v2155_v9 = vpop.xlane.xlu0 %2154 }
 0xc1f   :  { %7489 = vrcp.f32 %v2155_v9 }
 0xc28   :  { %v7488_v12 = vpop.eup %7487 }
 0xc29   :  { %v2172_v44 = vmul.f32 %v7488_v12, %v7476_v48  ;;  %v2464_v48 = vld [vmem:[%s7786_s29] sm:$0xff]  ;;  %s9620_s29 = sld [smem:[#allocation7_spill]] }
 0xc2a   :  { %6956 = vmatprep.subr.mxu1 %v2464_v48 }
 0xc2b   :  { %6930 = vmatmul.mubr.msk.f32.gmra.mxu1 %vm700_vm5, %v2172_v44 }
 0xc2c   :  { %v7490_v47 = vpop.eup %7489  ;;  %6932 = vmatprep.mubr.msk.f32.mxu1 %vm7732_vm2, %v7730_v51  ;;  %6957 = vmatpush3.msra.mxu1 %v2464_v48 }
 0xc2d   :  { %v2173_v49 = vmul.f32 %v7490_v47, %v7478_v53 }
 0xc2e   :  { %v2158_v62 = vpop.xlane.xlu1 %2157 }
 0xc2f   :  { %6933 = vmatmul.mubr.msk.f32.gmra.mxu1 %vm700_vm5, %v2173_v49  ;;  %7491 = vrcp.f32 %v2158_v62 }
 0xc32   :  { %v2161_v40 = vpop.xlane.xlu0 %2160 }
 0xc33   :  { %7493 = vrcp.f32 %v2161_v40 }
 0xc36   :  { %v2164_v35 = vpop.xlane.xlu1 %2163  ;;  %v2278_v46 = vpop.permute.xlu0 %2277 }
 0xc37   :  { %7495 = vrcp.f32 %v2164_v35  ;;  %6938 = vmatpush3.msra.mxu0 %v2278_v46 }
 0xc38   :  { %6939 = vmatprep.subr.mxu0 %v7730_v51 }
 0xc3a   :  { %v2276_v21 = vpop.permute.xlu1 %2275 }
 0xc3b   :  { %6940 = vmatpush3.msra.mxu0 %v2276_v21 }
 0xc3c   :  { %v7492_v45 = vpop.eup %7491 }
 0xc3d   :  { %v2174_v41 = vmul.f32 %v7492_v45, %v7480_v23 }
 0xc3e   :  { %v2382_v31 = vpop.permute.xlu1 %2381 }
 0xc3f   :  { %6942 = vmatmul.mubr.msk.f32.vlgmr.msra.gmra.mxu0 %vm700_vm5, %v2174_v41 }
 0xc40   :  { %v7494_v50 = vpop.eup %7493  ;;  %6944 = vmatprep.mubr.msk.f32.mxu0 %vm7732_vm2, %v7730_v51 }
 0xc41   :  { %v2175_v54 = vmul.f32 %v7494_v50, %v7482_v36 }
 0xc43   :  { %6945 = vmatmul.mubr.msk.f32.gmra.mxu0 %vm700_vm5, %v2175_v54 }
 0xc44   :  { %v7496_v61 = vpop.eup %7495  ;;  %6947 = vmatprep.mubr.msk.f32.mxu0 %vm7732_vm2, %v7730_v51 }
 0xc45   :  { %v2176_v1 = vmul.f32 %v7496_v61, %v7484_v15  ;;  %v2446_v15 = vsel %vm500_vm3, %v8260_v32, %v2382_v31  ;;  %v6251_v61 = vld [vmem:[%s7791_s3] ss:$0 sm:$0xff]  ;;  %s9621_s3 = sld [smem:[#allocation5_spill]] }
 0xc47   :  { %6948 = vmatmul.mubr.msk.f32.gmra.mxu0 %vm700_vm5, %v2176_v1 }
 0xcc6   :  { %v2261_v58 = vpop.f32.mrf.mxu1 }
 0xcc7   :  { %2427 = vrot.lane.b32.xlu0 %v2261_v58, %s7746_s22 }
 0xcc8   :  { %v6928_v8 = vpop.f32.mrf.mxu1 }
 0xceb   :  { %v2266_v53 = vpop.f32.mrf.mxu1 }
 0xcec   :  { %2429 = vrot.lane.b32.xlu1 %v2266_v53, %s7746_s22 }
 0xced   :  { %v6931_v3 = vpop.f32.mrf.mxu1 }
 0xcef   :  { %v2271_v4 = vpop.f32.mrf.mxu1 }
 0xcf0   :  { %2431 = vrot.lane.b32.xlu0 %v2271_v4, %s7746_s22 }
 0xcf1   :  { %v6934_v5 = vpop.f32.mrf.mxu1 }
 0xcf4   :  { %2387 = vrot.lane.b32.xlu0 %v8410_v34, %s7744_s16  ;;  %v2380_v34 = vpop.permute.xlu0 %2379 }
 0xcf5   :  { %v2445_v18 = vsel %vm500_vm3, %v8256_v26, %v2380_v34 }
 0xcf8   :  { %2411 = vrot.lane.b32.xlu0 %v8520_v60, %s7745_s18  ;;  %v2404_v60 = vpop.permute.xlu0 %2403 }
 0xcfc   :  { %v2384_v17 = vpop.permute.xlu0 %2383 }
 0xcfd   :  { %v2447_v26 = vsel %vm500_vm3, %v8264_v37, %v2384_v17 }
 0xcff   :  { %v2359_v7 = vpop.f32.mrf.mxu0 }
 0xd00   :  { %2433 = vrot.lane.b32.xlu1 %v2359_v7, %s7746_s22  ;;  %v2408_v25 = vpop.permute.xlu0 %2407 }
 0xd01   :  { %v6943_v10 = vpop.f32.mrf.mxu0  ;;  %v2454_v63 = vsel %vm2451_vm6, %v2447_v26, %v2408_v25 }
 0xd03   :  { %v2364_v52 = vpop.f32.mrf.mxu0 }
 0xd04   :  { %2389 = vrot.lane.b32.xlu1 %v8412_v38, %s7744_s16  ;;  %2435 = vrot.lane.b32.xlu0 %v2364_v52, %s7746_s22  ;;  %v2452_v38 = vsel %vm2451_vm6, %v2445_v18, %v2404_v60 }
 0xd05   :  { %v6946_v13 = vpop.f32.mrf.mxu0 }
 0xd07   :  { %v2369_v20 = vpop.f32.mrf.mxu0 }
 0xd08   :  { %2413 = vrot.lane.b32.xlu1 %v8522_v14, %s7745_s18  ;;  %v2406_v14 = vpop.permute.xlu1 %2405 }
 0xd09   :  { %v6949_v6 = vpop.f32.mrf.mxu0  ;;  %v2453_v43 = vsel %vm2451_vm6, %v2446_v15, %v2406_v14 }
 0xd0c   :  { %2437 = vrot.lane.b32.xlu1 %v2369_v20, %s7746_s22  ;;  %v2386_v36 = vpop.permute.xlu1 %2385 }
 0xd0d   :  { %v2448_v32 = vsel %vm500_vm3, %v8258_v30, %v2386_v36 }
 0xd10   :  { %v2410_v39 = vpop.permute.xlu1 %2409 }
 0xd11   :  { %v2455_v44 = vsel %vm2451_vm6, %v2448_v32, %v2410_v39 }
 0xd39   :  { %v2428_v23 = vpop.permute.xlu0 %2427 }
 0xd3a   :  { %v2458_v27 = vsel %vm700_vm5, %v2452_v38, %v2428_v23 }
 0xd3b   :  { %6958 = vmatprep.mubr.msk.f32.mxu1 %vm264_vm1, %v2458_v27 }
 0xd5e   :  { %v2430_v56 = vpop.permute.xlu1 %2429 }
 0xd5f   :  { %v2459_v59 = vsel %vm700_vm5, %v2453_v43, %v2430_v56 }
 0xd60   :  { %6959 = vmatmul.mubr.msk.f32.vlgmr.msra.gmra.mxu1 %vm264_vm1, %v2459_v59 }
 0xd62   :  { %v2432_v0 = vpop.permute.xlu0 %2431 }
 0xd63   :  { %v2460_v9 = vsel %vm700_vm5, %v2454_v63, %v2432_v0 }
 0xd64   :  { %6961 = vmatprep.mubr.msk.f32.mxu1 %vm264_vm1, %v2460_v9 }
 0xd66   :  { %v2388_v12 = vpop.permute.xlu0 %2387 }
 0xd67   :  { %v2449_v37 = vsel %vm500_vm3, %v8262_v33, %v2388_v12 }
 0xd6a   :  { %v2412_v47 = vpop.permute.xlu0 %2411 }
 0xd6b   :  { %v2456_v40 = vsel %vm2451_vm6, %v2449_v37, %v2412_v47 }
 0xd72   :  { %v2434_v49 = vpop.permute.xlu1 %2433 }
 0xd73   :  { %v2461_v62 = vsel %vm700_vm5, %v2455_v44, %v2434_v49  ;;  %v2707_v49 = vld [vmem:[%s7806_s19 + $0x18] sm:$0xff] }
 0xd74   :  { %6962 = vmatmul.mubr.msk.f32.gmra.mxu1 %vm264_vm1, %v2461_v62  ;;  %v2706_v62 = vld [vmem:[%s7806_s19 + $0x10] sm:$0xff]  ;;  %6967 = vmatprep.subr.mxu0 %v2707_v49 }
 0xd75   :  { %6968 = vmatpush3.msra.mxu0 %v2707_v49  ;;  %v2994_v49 = vld [vmem:[%s7816_s30 + $0x20] sm:$0xff] }
 0xd76   :  { %v2390_v35 = vpop.permute.xlu1 %2389  ;;  %v2436_v46 = vpop.permute.xlu0 %2435  ;;  %6969 = vmatprep.subr.mxu0 %v2706_v62 }
 0xd77   :  { %v2462_v21 = vsel %vm700_vm5, %v2456_v40, %v2436_v46  ;;  %v2450_v45 = vsel %vm500_vm3, %v8270_v42, %v2390_v35  ;;  %6970 = vmatpush3.msra.mxu0 %v2706_v62  ;;  %v2993_v62 = vld [vmem:[%s7816_s30 + $0x18] sm:$0xff] }
 0xd78   :  { %6964 = vmatprep.mubr.msk.f32.mxu1 %vm264_vm1, %v2462_v21  ;;  %v2705_v21 = vld [vmem:[%s7806_s19 + $0x8] sm:$0xff] }
 0xd79   :  { %6971 = vmatprep.subr.mxu0 %v2705_v21 }
 0xd7a   :  { %v2414_v30 = vpop.permute.xlu1 %2413  ;;  %6972 = vmatpush3.msra.mxu0 %v2705_v21 }
 0xd7b   :  { %v2457_v41 = vsel %vm2451_vm6, %v2450_v45, %v2414_v30  ;;  %v2704_v45 = vld [vmem:[%s7806_s19] sm:$0xff]  ;;  %s9624_s19 = sld [smem:[#allocation9_spill]] }
 0xd7c   :  { %6973 = vmatprep.subr.mxu0 %v2704_v45 }
 0xd7d   :  { %6974 = vmatpush3.msra.mxu0 %v2704_v45 }
 0xd7e   :  { %v2438_v50 = vpop.permute.xlu1 %2437 }
 0xd7f   :  { %v2463_v54 = vsel %vm700_vm5, %v2457_v41, %v2438_v50 }
 0xd80   :  { %6965 = vmatmul.mubr.msk.f32.gmra.mxu1 %vm264_vm1, %v2463_v54 }
 0xe20   :  { %v6960_v33 = vpop.f32.mrf.mxu1 }
 0xe21   :  { %v2582_v1 = vadd.f32 %v6960_v33, %v7926_v19 }
 0xe22   :  { %v2552_v57 = vpop.f32.mrf.mxu1 }
 0xe23   :  { %v8636_v2 = vadd.f32 %v6251_v61, %v2582_v1  ;;  %v2581_v55 = vadd.f32 %v2552_v57, %v7923_v16 }
 0xe25   :  { %v8639_v48 = vadd.f32 %v6251_v61, %v2581_v55  ;;  %v2605_v42 = vsel %vm264_vm1, %v8636_v2, 0.0 }
 0xe26   :  { %2606 = vadd.xlane.f32.xlu1 %v2605_v42  ;;  %v6252_v42 = vld [vmem:[%s7796_s8] ss:$0 sm:$0xff]  ;;  %s9622_s8 = sld [smem:[#allocation6_spill]] }
 0xe27   :  { %v2602_v58 = vsel %vm264_vm1, %v8639_v48, 0.0 }
 0xe28   :  { %2603 = vadd.xlane.f32.xlu0 %v2602_v58 }
 0xe34   :  { %v6963_v8 = vpop.f32.mrf.mxu1 }
 0xe35   :  { %v2584_v3 = vadd.f32 %v6963_v8, %v7932_v24 }
 0xe36   :  { %v2562_v53 = vpop.f32.mrf.mxu1 }
 0xe37   :  { %v2583_v19 = vadd.f32 %v2562_v53, %v7930_v22  ;;  %v8649_v5 = vadd.f32 %v6251_v61, %v2584_v3 }
 0xe39   :  { %v8647_v4 = vadd.f32 %v6251_v61, %v2583_v19  ;;  %v2611_v7 = vsel %vm264_vm1, %v8649_v5, 0.0  ;;  %v6253_v19 = vld [vmem:[%s7801_s14] ss:$0 sm:$0xff]  ;;  %s9623_s14 = sld [smem:[#allocation8_spill]] }
 0xe3b   :  { %v2608_v16 = vsel %vm264_vm1, %v8647_v4, 0.0 }
 0xe3c   :  { %2609 = vadd.xlane.f32.xlu0 %v2608_v16 }
 0xe40   :  { %2612 = vadd.xlane.f32.xlu0 %v2611_v7  ;;  %v6966_v10 = vpop.f32.mrf.mxu1 }
 0xe41   :  { %v2586_v52 = vadd.f32 %v6966_v10, %v7938_v28 }
 0xe42   :  { %v2572_v13 = vpop.f32.mrf.mxu1 }
 0xe43   :  { %v8656_v20 = vadd.f32 %v6251_v61, %v2586_v52  ;;  %v2585_v22 = vadd.f32 %v2572_v13, %v7940_v29 }
 0xe45   :  { %v8659_v24 = vadd.f32 %v6251_v61, %v2585_v22  ;;  %v2617_v6 = vsel %vm264_vm1, %v8656_v20, 0.0 }
 0xe46   :  { %2618 = vadd.xlane.f32.xlu1 %v2617_v6 }
 0xe47   :  { %v2614_v34 = vsel %vm264_vm1, %v8659_v24, 0.0 }
 0xe48   :  { %2615 = vadd.xlane.f32.xlu0 %v2614_v34 }
 0xeaf   :  { %v2607_v60 = vpop.xlane.xlu1 %2606 }
 0xeb0   :  { %v2621_v17 = vmul.f32 0.03125, %v2607_v60 }
 0xeb1   :  { %v2604_v25 = vpop.xlane.xlu0 %2603 }
 0xeb2   :  { %v2627_v28 = vsub.f32 %v8636_v2, %v2621_v17  ;;  %v2620_v18 = vmul.f32 0.03125, %v2604_v25 }
 0xeb4   :  { %v2626_v38 = vsub.f32 %v8639_v48, %v2620_v18  ;;  %v2633_v23 = vmul.f32 %v2627_v28, %v2627_v28 }
 0xeb6   :  { %v2641_v29 = vsel %vm264_vm1, %v2633_v23, 0.0  ;;  %v2632_v27 = vmul.f32 %v2626_v38, %v2626_v38 }
 0xeb7   :  { %2642 = vadd.xlane.f32.xlu1 %v2641_v29 }
 0xeb8   :  { %v2638_v31 = vsel %vm264_vm1, %v2632_v27, 0.0 }
 0xeb9   :  { %2639 = vadd.xlane.f32.xlu0 %v2638_v31 }
 0xec5   :  { %v2610_v14 = vpop.xlane.xlu0 %2609 }
 0xec6   :  { %v2622_v36 = vmul.f32 0.03125, %v2610_v14 }
 0xec8   :  { %v8670_v39 = vsub.f32 %v8647_v4, %v2622_v36 }
 0xec9   :  { %v2613_v15 = vpop.xlane.xlu0 %2612 }
 0xeca   :  { %v2623_v43 = vmul.f32 0.03125, %v2613_v15  ;;  %v2634_v56 = vmul.f32 %v8670_v39, %v8670_v39 }
 0xecc   :  { %v8675_v59 = vsub.f32 %v8649_v5, %v2623_v43  ;;  %v2644_v26 = vsel %vm264_vm1, %v2634_v56, 0.0 }
 0xecd   :  { %2645 = vadd.xlane.f32.xlu0 %v2644_v26 }
 0xece   :  { %v2635_v63 = vmul.f32 %v8675_v59, %v8675_v59 }
 0xecf   :  { %v2619_v0 = vpop.xlane.xlu1 %2618 }
 0xed0   :  { %v2625_v9 = vmul.f32 0.03125, %v2619_v0  ;;  %v2647_v12 = vsel %vm264_vm1, %v2635_v63, 0.0 }
 0xed1   :  { %2648 = vadd.xlane.f32.xlu1 %v2647_v12  ;;  %v2616_v32 = vpop.xlane.xlu0 %2615 }
 0xed2   :  { %v8682_v44 = vsub.f32 %v8656_v20, %v2625_v9  ;;  %v2624_v47 = vmul.f32 0.03125, %v2616_v32  ;;  %v2997_v32 = vld [vmem:[%s7816_s30 + $0x38] sm:$0xff] }
 0xed3   :  { %6984 = vmatprep.subr.mxu1 %v2997_v32 }
 0xed4   :  { %v8687_v37 = vsub.f32 %v8659_v24, %v2624_v47  ;;  %v2637_v40 = vmul.f32 %v8682_v44, %v8682_v44  ;;  %6985 = vmatpush3.msra.mxu1 %v2997_v32  ;;  %v2996_v47 = vld [vmem:[%s7816_s30 + $0x30] sm:$0xff] }
 0xed5   :  { %6986 = vmatprep.subr.mxu1 %v2996_v47 }
 0xed6   :  { %v2653_v35 = vsel %vm264_vm1, %v2637_v40, 0.0  ;;  %v2636_v46 = vmul.f32 %v8687_v37, %v8687_v37  ;;  %6987 = vmatpush3.msra.mxu1 %v2996_v47  ;;  %v2991_v40 = vld [vmem:[%s7816_s30 + $0x8] sm:$0xff] }
 0xed7   :  { %2654 = vadd.xlane.f32.xlu1 %v2653_v35  ;;  %v2990_v35 = vld [vmem:[%s7816_s30] sm:$0xff] }
 0xed8   :  { %v2650_v30 = vsel %vm264_vm1, %v2636_v46, 0.0  ;;  %v6254_v46 = vld [vmem:[%s7811_s24] ss:$0 sm:$0xff]  ;;  %s9625_s24 = sld [smem:[#allocation12_spill]] }
 0xed9   :  { %2651 = vadd.xlane.f32.xlu0 %v2650_v30 }
 0xf40   :  { %v2643_v41 = vpop.xlane.xlu1 %2642 }
 0xf41   :  { %v2657_v50 = vmul.f32 0.03125, %v2643_v41 }
 0xf42   :  { %v2640_v54 = vpop.xlane.xlu0 %2639 }
 0xf43   :  { %v2663_v33 = vadd.f32 1e-05, %v2657_v50  ;;  %v2656_v61 = vmul.f32 0.03125, %v2640_v54 }
 0xf45   :  { %7497 = vrsqrt.f32 %v2663_v33  ;;  %v2662_v1 = vadd.f32 1e-05, %v2656_v61 }
 0xf47   :  { %7499 = vrsqrt.f32 %v2662_v1 }
 0xf52   :  { %v7498_v57 = vpop.eup %7497 }
 0xf53   :  { %v2675_v55 = vmul.f32 %v7498_v57, %v2627_v28 }
 0xf54   :  { %v7500_v58 = vpop.eup %7499 }
 0xf55   :  { %v2674_v8 = vmul.f32 %v7500_v58, %v2626_v38  ;;  %v2687_v53 = vmul.f32 %v6252_v42, %v2675_v55 }
 0xf56   :  { %v2646_v3 = vpop.xlane.xlu0 %2645 }
 0xf57   :  { %v2686_v16 = vmul.f32 %v6252_v42, %v2674_v8  ;;  %v2658_v7 = vmul.f32 0.03125, %v2646_v3  ;;  %v2699_v13 = vadd.f32 %v6253_v19, %v2687_v53 }
 0xf59   :  { %v2698_v10 = vadd.f32 %v6253_v19, %v2686_v16  ;;  %v2664_v52 = vadd.f32 1e-05, %v2658_v7 }
 0xf5a   :  { %v2649_v22 = vpop.xlane.xlu1 %2648 }
 0xf5b   :  { %6975 = vmatprep.mubr.msk.f32.mxu0 %vm264_vm1, %v2698_v10  ;;  %7501 = vrsqrt.f32 %v2664_v52  ;;  %v2659_v6 = vmul.f32 0.03125, %v2649_v22 }
 0xf5c   :  { %6976 = vmatmul.mubr.msk.f32.vlgmr.msra.gmra.mxu0 %vm264_vm1, %v2699_v13 }
 0xf5d   :  { %v2665_v34 = vadd.f32 1e-05, %v2659_v6 }
 0xf5f   :  { %7503 = vrsqrt.f32 %v2665_v34 }
 0xf60   :  { %v2655_v60 = vpop.xlane.xlu1 %2654 }
 0xf61   :  { %v2661_v17 = vmul.f32 0.03125, %v2655_v60 }
 0xf62   :  { %v2652_v25 = vpop.xlane.xlu0 %2651 }
 0xf63   :  { %v2667_v28 = vadd.f32 1e-05, %v2661_v17  ;;  %v2660_v18 = vmul.f32 0.03125, %v2652_v25 }
 0xf65   :  { %7505 = vrsqrt.f32 %v2667_v28  ;;  %v2666_v38 = vadd.f32 1e-05, %v2660_v18 }
 0xf67   :  { %7507 = vrsqrt.f32 %v2666_v38 }
 0xf68   :  { %v7502_v23 = vpop.eup %7501 }
 0xf69   :  { %v2676_v29 = vmul.f32 %v7502_v23, %v8670_v39 }
 0xf6b   :  { %v2688_v27 = vmul.f32 %v6252_v42, %v2676_v29 }
 0xf6c   :  { %v7504_v31 = vpop.eup %7503 }
 0xf6d   :  { %v2700_v14 = vadd.f32 %v6253_v19, %v2688_v27  ;;  %v2677_v36 = vmul.f32 %v7504_v31, %v8675_v59 }
 0xf6f   :  { %6978 = vmatprep.mubr.msk.f32.mxu0 %vm264_vm1, %v2700_v14  ;;  %v2689_v15 = vmul.f32 %v6252_v42, %v2677_v36 }
 0xf71   :  { %v2701_v43 = vadd.f32 %v6253_v19, %v2689_v15 }
 0xf72   :  { %v7506_v56 = vpop.eup %7505 }
 0xf73   :  { %6979 = vmatmul.mubr.msk.f32.gmra.mxu0 %vm264_vm1, %v2701_v43  ;;  %v2679_v26 = vmul.f32 %v7506_v56, %v8682_v44  ;;  %v2995_v44 = vld [vmem:[%s7816_s30 + $0x28] sm:$0xff] }
 0xf74   :  { %v7508_v63 = vpop.eup %7507  ;;  %6988 = vmatprep.subr.mxu1 %v2995_v44 }
 0xf75   :  { %v2678_v39 = vmul.f32 %v7508_v63, %v8687_v37  ;;  %v2691_v0 = vmul.f32 %v6252_v42, %v2679_v26  ;;  %6989 = vmatpush3.msra.mxu1 %v2995_v44  ;;  %v2992_v37 = vld [vmem:[%s7816_s30 + $0x10] sm:$0xff]  ;;  %s9626_s30 = sld [smem:[#allocation10_spill]] }
 0xf76   :  { %6990 = vmatprep.subr.mxu1 %v2994_v49 }
 0xf77   :  { %v2690_v9 = vmul.f32 %v6252_v42, %v2678_v39  ;;  %v2703_v59 = vadd.f32 %v6253_v19, %v2691_v0  ;;  %6991 = vmatpush3.msra.mxu1 %v2994_v49 }
 0xf78   :  { %6992 = vmatprep.subr.mxu1 %v2993_v62 }
 0xf79   :  { %v2702_v12 = vadd.f32 %v6253_v19, %v2690_v9  ;;  %6993 = vmatpush3.msra.mxu1 %v2993_v62 }
 0xf7a   :  { %6994 = vmatprep.subr.mxu1 %v2992_v37 }
 0xf7b   :  { %6981 = vmatprep.mubr.msk.f32.mxu0 %vm264_vm1, %v2702_v12  ;;  %6995 = vmatpush3.msra.mxu1 %v2992_v37 }
 0xf7c   :  { %6982 = vmatmul.mubr.msk.f32.gmra.mxu0 %vm264_vm1, %v2703_v59  ;;  %6996 = vmatprep.subr.mxu1 %v2991_v40 }
 0xf7d   :  { %6997 = vmatpush3.msra.mxu1 %v2991_v40 }
 0xf7e   :  { %6998 = vmatprep.subr.mxu1 %v2990_v35 }
 0xf7f   :  { %6999 = vmatpush3.msra.mxu1 %v2990_v35 }
 0xf80   :  { %7041 = vmatprep.subr.mxu1 %v7730_v51 }
0x101c   :  { %v6977_v21 = vpop.f32.mrf.mxu0 }
0x101d   :  { %v8719_v30 = vadd.f32 %v6977_v21, %v6254_v46 }
0x101e   :  { %v2799_v45 = vpop.f32.mrf.mxu0 }
0x101f   :  { %v8722_v41 = vmul.f32 0.70710677, %v8719_v30  ;;  %v8724_v50 = vadd.f32 %v6254_v46, %v2799_v45 }
0x1021   :  { %v2841_v54 = vand.u32 2147483647, %v8722_v41  ;;  %v8728_v33 = vmul.f32 0.70710677, %v8724_v50  ;;  %vm2961_vm7 = vcmp.ge.f32.partialorder %v8722_v41, 0.0 }
0x1023   :  { %v2847_v61 = vmul.f32 0.3275911, %v2841_v54  ;;  %v2840_v1 = vand.u32 2147483647, %v8728_v33  ;;  %v2925_v58 = vsub.f32 0.0, %v2841_v54  ;;  %vm2960_vm8 = vcmp.ge.f32.partialorder %v8728_v33, 0.0 }
0x1025   :  { %v2853_v57 = vadd.f32 1.0, %v2847_v61  ;;  %v2846_v55 = vmul.f32 0.3275911, %v2840_v1  ;;  %v2924_v8 = vsub.f32 0.0, %v2840_v1  ;;  %v2931_v53 = vmul.f32 %v2925_v58, %v2841_v54 }
0x1027   :  { %7509 = vrcp.f32 %v2853_v57  ;;  %v2852_v42 = vadd.f32 1.0, %v2846_v55  ;;  %v2930_v19 = vmul.f32 %v2924_v8, %v2840_v1  ;;  %v2938_v10 = vmul.f32 1.442695, %v2931_v53 }
0x1029   :  { %7511 = vrcp.f32 %v2852_v42  ;;  %v2936_v25 = vmul.f32 1.442695, %v2930_v19 }
0x102a   :  { %7513 = vpow2.f32 %v2938_v10 }
0x102b   :  { %7515 = vpow2.f32 %v2936_v25 }
0x1033   :  { %v6980_v16 = vpop.f32.mrf.mxu0 }
0x1034   :  { %v7510_v3 = vpop.eup %7509  ;;  %v8731_v52 = vadd.f32 %v6980_v16, %v6254_v46 }
0x1035   :  { %v2871_v7 = vmul.f32 1.0614054, %v7510_v3  ;;  %v2809_v13 = vpop.f32.mrf.mxu0 }
0x1036   :  { %v7512_v22 = vpop.eup %7511  ;;  %v8734_v34 = vmul.f32 0.70710677, %v8731_v52  ;;  %v8736_v60 = vadd.f32 %v6254_v46, %v2809_v13 }
0x1037   :  { %v2877_v6 = vadd.f32 -1.4531521, %v2871_v7  ;;  %v2870_v17 = vmul.f32 1.0614054, %v7512_v22  ;;  %v7514_v54 = vpop.eup %7513 }
0x1038   :  { %v2843_v18 = vand.u32 2147483647, %v8734_v34  ;;  %v8740_v23 = vmul.f32 0.70710677, %v8736_v60  ;;  %v7516_v8 = vpop.eup %7515  ;;  %vm2963_vm10 = vcmp.ge.f32.partialorder %v8734_v34, 0.0 }
0x1039   :  { %v2883_v28 = vmul.f32 %v7510_v3, %v2877_v6  ;;  %v2876_v38 = vadd.f32 -1.4531521, %v2870_v17 }
0x103a   :  { %v2849_v27 = vmul.f32 0.3275911, %v2843_v18  ;;  %v2842_v14 = vand.u32 2147483647, %v8740_v23  ;;  %v2927_v21 = vsub.f32 0.0, %v2843_v18  ;;  %vm2962_vm11 = vcmp.ge.f32.partialorder %v8740_v23, 0.0 }
0x103b   :  { %v2889_v29 = vadd.f32 1.4214138, %v2883_v28  ;;  %v2882_v31 = vmul.f32 %v7512_v22, %v2876_v38 }
0x103c   :  { %v2855_v15 = vadd.f32 1.0, %v2849_v27  ;;  %v6983_v43 = vpop.f32.mrf.mxu0  ;;  %v2848_v26 = vmul.f32 0.3275911, %v2842_v14  ;;  %v2926_v42 = vsub.f32 0.0, %v2842_v14  ;;  %v2933_v19 = vmul.f32 %v2927_v21, %v2843_v18 }
0x103d   :  { %v2895_v36 = vmul.f32 %v7510_v3, %v2889_v29  ;;  %v2888_v56 = vadd.f32 1.4214138, %v2882_v31  ;;  %v8743_v63 = vadd.f32 %v6983_v43, %v6254_v46  ;;  %v2828_v43 = vmul.f32 0.5, %v8724_v50 }
0x103e   :  { %7517 = vrcp.f32 %v2855_v15  ;;  %v2819_v0 = vpop.f32.mrf.mxu0  ;;  %v2854_v12 = vadd.f32 1.0, %v2848_v26  ;;  %v2932_v6 = vmul.f32 %v2926_v42, %v2842_v14  ;;  %v2942_v28 = vmul.f32 1.442695, %v2933_v19 }
0x103f   :  { %v2901_v39 = vadd.f32 -0.28449672, %v2895_v36  ;;  %v2894_v9 = vmul.f32 %v7512_v22, %v2888_v56  ;;  %v8746_v32 = vmul.f32 0.70710677, %v8743_v63  ;;  %v8748_v47 = vadd.f32 %v6254_v46, %v2819_v0 }
0x1040   :  { %7519 = vrcp.f32 %v2854_v12  ;;  %v2940_v15 = vmul.f32 1.442695, %v2932_v6  ;;  %v2829_v14 = vmul.f32 0.5, %v8719_v30 }
0x1041   :  { %v2907_v59 = vmul.f32 %v7510_v3, %v2901_v39  ;;  %v2900_v44 = vadd.f32 -0.28449672, %v2894_v9  ;;  %v2845_v62 = vand.u32 2147483647, %v8746_v32  ;;  %v8752_v40 = vmul.f32 0.70710677, %v8748_v47 }
0x1042   :  { %vm2965_vm12 = vcmp.ge.f32.partialorder %v8746_v32, 0.0  ;;  %v6261_v32 = vld [vmem:[%s7821_s6] ss:$0 sm:$0xff]  ;;  %s9627_s6 = sld [smem:[#allocation11_spill]] }
0x1043   :  { %v2913_v49 = vadd.f32 0.2548296, %v2907_v59  ;;  %v2906_v37 = vmul.f32 %v7512_v22, %v2900_v44  ;;  %v2851_v45 = vmul.f32 0.3275911, %v2845_v62  ;;  %v2844_v1 = vand.u32 2147483647, %v8752_v40 }
0x1044   :  { %v2929_v27 = vsub.f32 0.0, %v2845_v62  ;;  %vm2964_vm13 = vcmp.ge.f32.partialorder %v8752_v40, 0.0 }
0x1045   :  { %v2919_v35 = vmul.f32 %v7510_v3, %v2913_v49  ;;  %v2912_v61 = vadd.f32 0.2548296, %v2906_v37  ;;  %v2857_v55 = vadd.f32 1.0, %v2851_v45  ;;  %v2850_v58 = vmul.f32 0.3275911, %v2844_v1 }
0x1046   :  { %v2928_v39 = vsub.f32 0.0, %v2844_v1  ;;  %v2935_v12 = vmul.f32 %v2929_v27, %v2845_v62 }
0x1047   :  { %v2949_v57 = vmul.f32 %v7514_v54, %v2919_v35  ;;  %v2918_v46 = vmul.f32 %v7512_v22, %v2912_v61  ;;  %7521 = vrcp.f32 %v2857_v55  ;;  %v2856_v7 = vadd.f32 1.0, %v2850_v58 }
0x1048   :  { %v2934_v50 = vmul.f32 %v2928_v39, %v2844_v1  ;;  %v2946_v30 = vmul.f32 1.442695, %v2935_v12  ;;  %v2830_v12 = vmul.f32 0.5, %v8736_v60 }
0x1049   :  { %v2955_v53 = vsub.f32 1.0, %v2949_v57  ;;  %v2948_v16 = vmul.f32 %v7516_v8, %v2918_v46  ;;  %7523 = vrcp.f32 %v2856_v7 }
0x104a   :  { %7525 = vpow2.f32 %v2942_v28  ;;  %v2944_v46 = vmul.f32 1.442695, %v2934_v50 }
0x104b   :  { %v2967_v10 = vsub.f32 0.0, %v2955_v53  ;;  %v7518_v13 = vpop.eup %7517  ;;  %v2954_v3 = vsub.f32 1.0, %v2948_v16  ;;  %7527 = vpow2.f32 %v2940_v15 }
0x104c   :  { %v2873_v25 = vmul.f32 1.0614054, %v7518_v13  ;;  %7529 = vpow2.f32 %v2946_v30 }
0x104d   :  { %v2973_v17 = vsel %vm2961_vm7, %v2955_v53, %v2967_v10  ;;  %v2966_v38 = vsub.f32 0.0, %v2954_v3  ;;  %v7520_v22 = vpop.eup %7519  ;;  %7531 = vpow2.f32 %v2944_v46 }
0x104e   :  { %v2879_v29 = vadd.f32 -1.4531521, %v2873_v25  ;;  %v2979_v18 = vadd.f32 1.0, %v2973_v17  ;;  %v2872_v36 = vmul.f32 1.0614054, %v7520_v22 }
0x104f   :  { %v2972_v31 = vsel %vm2960_vm8, %v2954_v3, %v2966_v38 }
0x1050   :  { %v2978_v56 = vadd.f32 1.0, %v2972_v31  ;;  %v2885_v41 = vmul.f32 %v7518_v13, %v2879_v29  ;;  %v2878_v26 = vadd.f32 -1.4531521, %v2872_v36  ;;  %v2985_v33 = vmul.f32 %v2979_v18, %v2829_v14 }
0x1052   :  { %v2984_v0 = vmul.f32 %v2978_v56, %v2828_v43  ;;  %v2891_v9 = vadd.f32 1.4214138, %v2885_v41  ;;  %v2884_v59 = vmul.f32 %v7520_v22, %v2878_v26 }
0x1054   :  { %v2897_v44 = vmul.f32 %v7518_v13, %v2891_v9  ;;  %7000 = vmatprep.mubr.msk.f32.mxu1 %vm3005_vm9, %v2984_v0  ;;  %v7522_v49 = vpop.eup %7521  ;;  %v2890_v37 = vadd.f32 1.4214138, %v2884_v59 }
0x1055   :  { %7001 = vmatmul.mubr.msk.f32.vlgmr.msra.gmra.mxu1 %vm3005_vm9, %v2985_v33  ;;  %v2875_v21 = vmul.f32 1.0614054, %v7522_v49 }
0x1056   :  { %v2903_v35 = vadd.f32 -0.28449672, %v2897_v44  ;;  %v2896_v45 = vmul.f32 %v7520_v22, %v2890_v37  ;;  %v7524_v54 = vpop.eup %7523  ;;  %v2831_v44 = vmul.f32 0.5, %v8731_v52 }
0x1057   :  { %v2881_v57 = vadd.f32 -1.4531521, %v2875_v21  ;;  %v2874_v62 = vmul.f32 1.0614054, %v7524_v54  ;;  %v7526_v1 = vpop.eup %7525 }
0x1058   :  { %v2909_v61 = vmul.f32 %v7518_v13, %v2903_v35  ;;  %v2902_v55 = vadd.f32 -0.28449672, %v2896_v45  ;;  %v7528_v28 = vpop.eup %7527 }
0x1059   :  { %v2887_v58 = vmul.f32 %v7522_v49, %v2881_v57  ;;  %v2880_v53 = vadd.f32 -1.4531521, %v2874_v62 }
0x105a   :  { %v2915_v42 = vadd.f32 0.2548296, %v2909_v61  ;;  %v2908_v8 = vmul.f32 %v7520_v22, %v2902_v55  ;;  %v2832_v61 = vmul.f32 0.5, %v8748_v47  ;;  %v2833_v55 = vmul.f32 0.5, %v8743_v63 }
0x105b   :  { %v2893_v16 = vadd.f32 1.4214138, %v2887_v58  ;;  %v2886_v10 = vmul.f32 %v7524_v54, %v2880_v53 }
0x105c   :  { %v2921_v19 = vmul.f32 %v7518_v13, %v2915_v42  ;;  %v2914_v7 = vadd.f32 0.2548296, %v2908_v8 }
0x105d   :  { %v2899_v6 = vmul.f32 %v7522_v49, %v2893_v16  ;;  %v2892_v25 = vadd.f32 1.4214138, %v2886_v10 }
0x105e   :  { %v2951_v3 = vmul.f32 %v7526_v1, %v2921_v19  ;;  %v2920_v17 = vmul.f32 %v7520_v22, %v2914_v7  ;;  %v7530_v22 = vpop.eup %7529 }
0x105f   :  { %v2905_v29 = vadd.f32 -0.28449672, %v2899_v6  ;;  %v2898_v18 = vmul.f32 %v7524_v54, %v2892_v25  ;;  %v7532_v37 = vpop.eup %7531 }
0x1060   :  { %v2957_v38 = vsub.f32 1.0, %v2951_v3  ;;  %v2950_v27 = vmul.f32 %v7528_v28, %v2920_v17 }
0x1061   :  { %v2911_v36 = vmul.f32 %v7522_v49, %v2905_v29  ;;  %v2904_v13 = vadd.f32 -0.28449672, %v2898_v18 }
0x1062   :  { %v2969_v31 = vsub.f32 0.0, %v2957_v38  ;;  %v2956_v15 = vsub.f32 1.0, %v2950_v27 }
0x1063   :  { %v2917_v56 = vadd.f32 0.2548296, %v2911_v36  ;;  %v2910_v14 = vmul.f32 %v7524_v54, %v2904_v13 }
0x1064   :  { %v2975_v43 = vsel %vm2963_vm10, %v2957_v38, %v2969_v31  ;;  %v2968_v41 = vsub.f32 0.0, %v2956_v15 }
0x1065   :  { %v2923_v26 = vmul.f32 %v7522_v49, %v2917_v56  ;;  %v2981_v39 = vadd.f32 1.0, %v2975_v43  ;;  %v2916_v9 = vadd.f32 0.2548296, %v2910_v14 }
0x1066   :  { %v2974_v0 = vsel %vm2962_vm11, %v2956_v15, %v2968_v41 }
0x1067   :  { %v2980_v33 = vadd.f32 1.0, %v2974_v0  ;;  %v2953_v59 = vmul.f32 %v7530_v22, %v2923_v26  ;;  %v2922_v34 = vmul.f32 %v7524_v54, %v2916_v9  ;;  %v2987_v21 = vmul.f32 %v2981_v39, %v2831_v44 }
0x1069   :  { %v2986_v50 = vmul.f32 %v2980_v33, %v2830_v12  ;;  %v2959_v35 = vsub.f32 1.0, %v2953_v59  ;;  %v2952_v30 = vmul.f32 %v7532_v37, %v2922_v34 }
0x106b   :  { %v2971_v45 = vsub.f32 0.0, %v2959_v35  ;;  %7003 = vmatprep.mubr.msk.f32.mxu1 %vm3005_vm9, %v2986_v50  ;;  %v2958_v23 = vsub.f32 1.0, %v2952_v30 }
0x106c   :  { %7004 = vmatmul.mubr.msk.f32.gmra.mxu1 %vm3005_vm9, %v2987_v21  ;;  %v3231_v21 = vld [vmem:[%s9620_s29 + $0x10] sm:$0xff] }
0x106d   :  { %v2977_v60 = vsel %vm2965_vm12, %v2959_v35, %v2971_v45  ;;  %v2970_v49 = vsub.f32 0.0, %v2958_v23  ;;  %v3232_v35 = vld [vmem:[%s9620_s29 + $0x18] sm:$0xff] }
0x106e   :  { %v2983_v52 = vadd.f32 1.0, %v2977_v60  ;;  %7009 = vmatprep.subr.mxu0 %v3232_v35 }
0x106f   :  { %v2976_v54 = vsel %vm2964_vm13, %v2958_v23, %v2970_v49  ;;  %7010 = vmatpush3.msra.mxu0 %v3232_v35 }
0x1070   :  { %v2982_v57 = vadd.f32 1.0, %v2976_v54  ;;  %v2989_v46 = vmul.f32 %v2983_v52, %v2833_v55  ;;  %7011 = vmatprep.subr.mxu0 %v3231_v21  ;;  %v3230_v54 = vld [vmem:[%s9620_s29 + $0x8] sm:$0xff] }
0x1071   :  { %7012 = vmatpush3.msra.mxu0 %v3231_v21 }
0x1072   :  { %v2988_v62 = vmul.f32 %v2982_v57, %v2832_v61  ;;  %7013 = vmatprep.subr.mxu0 %v3230_v54  ;;  %v3229_v57 = vld [vmem:[%s9620_s29] sm:$0xff] }
0x1073   :  { %7014 = vmatpush3.msra.mxu0 %v3230_v54 }
0x1074   :  { %7006 = vmatprep.mubr.msk.f32.mxu1 %vm3005_vm9, %v2988_v62  ;;  %7015 = vmatprep.subr.mxu0 %v3229_v57 }
0x1075   :  { %7007 = vmatmul.mubr.msk.f32.gmra.mxu1 %vm3005_vm9, %v2989_v46  ;;  %7016 = vmatpush3.msra.mxu0 %v3229_v57 }
0x1076   :  { %7047 = vmatprep.mubr.msk.f32.mxu1 %vm7732_vm2, %v7730_v51  ;;  %7026 = vmatprep.subr.mxu0 %v7730_v51 }
0x1115   :  { %v7002_v42 = vpop.f32.mrf.mxu1 }
0x1116   :  { %v3096_v58 = vadd.f32 %v7002_v42, %v6261_v32 }
0x1117   :  { %v3090_v40 = vpop.f32.mrf.mxu1 }
0x1118   :  { %v8777_v8 = vadd.f32 %v3096_v58, %v8636_v2  ;;  %v3091_v47 = vadd.f32 %v6261_v32, %v3090_v40 }
0x111a   :  { %v8780_v53 = vadd.f32 %v3091_v47, %v8639_v48  ;;  %v3130_v63 = vsel %vm264_vm1, %v8777_v8, 0.0 }
0x111b   :  { %3131 = vadd.xlane.f32.xlu1 %v3130_v63  ;;  %v6268_v63 = vld [vmem:[%s9621_s3] ss:$0 sm:$0xff] }
0x111c   :  { %v3127_v19 = vsel %vm264_vm1, %v8780_v53, 0.0 }
0x111d   :  { %3128 = vadd.xlane.f32.xlu0 %v3127_v19 }
0x112c   :  { %v7005_v16 = vpop.f32.mrf.mxu1 }
0x112d   :  { %v3106_v1 = vadd.f32 %v7005_v16, %v6261_v32 }
0x112e   :  { %v3100_v7 = vpop.f32.mrf.mxu1 }
0x112f   :  { %v8787_v10 = vadd.f32 %v3106_v1, %v8649_v5  ;;  %v3101_v2 = vadd.f32 %v6261_v32, %v3100_v7  ;;  %v6269_v7 = vld [vmem:[%s9622_s8] ss:$0 sm:$0xff] }
0x1131   :  { %v8790_v3 = vadd.f32 %v3101_v2, %v8647_v4  ;;  %v3136_v48 = vsel %vm264_vm1, %v8787_v10, 0.0 }
0x1132   :  { %3137 = vadd.xlane.f32.xlu1 %v3136_v48 }
0x1133   :  { %v3133_v6 = vsel %vm264_vm1, %v8790_v3, 0.0 }
0x1134   :  { %3134 = vadd.xlane.f32.xlu0 %v3133_v6 }
0x1135   :  { %v7008_v17 = vpop.f32.mrf.mxu1 }
0x1136   :  { %v3116_v25 = vadd.f32 %v7008_v17, %v6261_v32 }
0x1137   :  { %v3110_v28 = vpop.f32.mrf.mxu1 }
0x1138   :  { %v8797_v38 = vadd.f32 %v3116_v25, %v8656_v20  ;;  %v3111_v5 = vadd.f32 %v6261_v32, %v3110_v28 }
0x113a   :  { %v8800_v29 = vadd.f32 %v3111_v5, %v8659_v24  ;;  %v3142_v4 = vsel %vm264_vm1, %v8797_v38, 0.0 }
0x113b   :  { %3143 = vadd.xlane.f32.xlu1 %v3142_v4 }
0x113c   :  { %v3139_v27 = vsel %vm264_vm1, %v8800_v29, 0.0 }
0x113d   :  { %3140 = vadd.xlane.f32.xlu0 %v3139_v27 }
0x11a4   :  { %v3132_v18 = vpop.xlane.xlu1 %3131 }
0x11a5   :  { %v3146_v31 = vmul.f32 0.03125, %v3132_v18 }
0x11a6   :  { %v3129_v36 = vpop.xlane.xlu0 %3128 }
0x11a7   :  { %v3152_v15 = vsub.f32 %v8777_v8, %v3146_v31  ;;  %v3145_v13 = vmul.f32 0.03125, %v3129_v36 }
0x11a9   :  { %v3151_v20 = vsub.f32 %v8780_v53, %v3145_v13  ;;  %v3158_v43 = vmul.f32 %v3152_v15, %v3152_v15 }
0x11ab   :  { %v3166_v24 = vsel %vm264_vm1, %v3158_v43, 0.0  ;;  %v3157_v56 = vmul.f32 %v3151_v20, %v3151_v20 }
0x11ac   :  { %3167 = vadd.xlane.f32.xlu1 %v3166_v24 }
0x11ad   :  { %v3163_v41 = vsel %vm264_vm1, %v3157_v56, 0.0 }
0x11ae   :  { %3164 = vadd.xlane.f32.xlu0 %v3163_v41 }
0x11bb   :  { %v3138_v14 = vpop.xlane.xlu1 %3137 }
0x11bc   :  { %v3148_v26 = vmul.f32 0.03125, %v3138_v14 }
0x11bd   :  { %v3135_v22 = vpop.xlane.xlu0 %3134 }
0x11be   :  { %v8811_v39 = vsub.f32 %v8787_v10, %v3148_v26  ;;  %v3147_v0 = vmul.f32 0.03125, %v3135_v22 }
0x11c0   :  { %v8814_v9 = vsub.f32 %v8790_v3, %v3147_v0  ;;  %v3160_v12 = vmul.f32 %v8811_v39, %v8811_v39 }
0x11c2   :  { %v3172_v33 = vsel %vm264_vm1, %v3160_v12, 0.0  ;;  %v3159_v59 = vmul.f32 %v8814_v9, %v8814_v9 }
0x11c3   :  { %3173 = vadd.xlane.f32.xlu1 %v3172_v33 }
0x11c4   :  { %v3169_v44 = vsel %vm264_vm1, %v3159_v59, 0.0  ;;  %v3144_v34 = vpop.xlane.xlu1 %3143 }
0x11c5   :  { %3170 = vadd.xlane.f32.xlu0 %v3169_v44  ;;  %v3150_v37 = vmul.f32 0.03125, %v3144_v34 }
0x11c6   :  { %v3141_v50 = vpop.xlane.xlu0 %3140 }
0x11c7   :  { %v8825_v30 = vsub.f32 %v8797_v38, %v3150_v37  ;;  %v3149_v45 = vmul.f32 0.03125, %v3141_v50 }
0x11c9   :  { %v8828_v23 = vsub.f32 %v8800_v29, %v3149_v45  ;;  %v3162_v60 = vmul.f32 %v8825_v30, %v8825_v30 }
0x11cb   :  { %v3178_v49 = vsel %vm264_vm1, %v3162_v60, 0.0  ;;  %v3161_v52 = vmul.f32 %v8828_v23, %v8828_v23 }
0x11cc   :  { %3179 = vadd.xlane.f32.xlu1 %v3178_v49 }
0x11cd   :  { %v3175_v61 = vsel %vm264_vm1, %v3161_v52, 0.0 }
0x11ce   :  { %3176 = vadd.xlane.f32.xlu0 %v3175_v61 }
0x1235   :  { %v3168_v55 = vpop.xlane.xlu1 %3167 }
0x1236   :  { %v3182_v62 = vmul.f32 0.03125, %v3168_v55 }
0x1237   :  { %v3165_v46 = vpop.xlane.xlu0 %3164 }
0x1238   :  { %v3188_v32 = vadd.f32 1e-05, %v3182_v62  ;;  %v3181_v42 = vmul.f32 0.03125, %v3165_v46 }
0x123a   :  { %7533 = vrsqrt.f32 %v3188_v32  ;;  %v3187_v58 = vadd.f32 1e-05, %v3181_v42 }
0x123c   :  { %7535 = vrsqrt.f32 %v3187_v58 }
0x1247   :  { %v7534_v40 = vpop.eup %7533 }
0x1248   :  { %v3200_v47 = vmul.f32 %v7534_v40, %v3152_v15 }
0x1249   :  { %v7536_v19 = vpop.eup %7535 }
0x124a   :  { %v3199_v16 = vmul.f32 %v7536_v19, %v3151_v20  ;;  %v3212_v1 = vmul.f32 %v6268_v63, %v3200_v47 }
0x124c   :  { %v3211_v2 = vmul.f32 %v6268_v63, %v3199_v16  ;;  %v3174_v48 = vpop.xlane.xlu1 %3173  ;;  %v3224_v28 = vadd.f32 %v6269_v7, %v3212_v1 }
0x124d   :  { %v3184_v6 = vmul.f32 0.03125, %v3174_v48 }
0x124e   :  { %v3223_v17 = vadd.f32 %v6269_v7, %v3211_v2  ;;  %v3171_v25 = vpop.xlane.xlu0 %3170 }
0x124f   :  { %v3190_v5 = vadd.f32 1e-05, %v3184_v6  ;;  %v3183_v4 = vmul.f32 0.03125, %v3171_v25 }
0x1250   :  { %7017 = vmatprep.mubr.msk.f32.mxu0 %vm264_vm1, %v3223_v17 }
0x1251   :  { %7018 = vmatmul.mubr.msk.f32.vlgmr.msra.gmra.mxu0 %vm264_vm1, %v3224_v28  ;;  %7537 = vrsqrt.f32 %v3190_v5  ;;  %v3189_v27 = vadd.f32 1e-05, %v3183_v4 }
0x1253   :  { %7539 = vrsqrt.f32 %v3189_v27 }
0x1255   :  { %v3180_v18 = vpop.xlane.xlu1 %3179 }
0x1256   :  { %v3186_v31 = vmul.f32 0.03125, %v3180_v18 }
0x1257   :  { %v3177_v36 = vpop.xlane.xlu0 %3176 }
0x1258   :  { %v3192_v15 = vadd.f32 1e-05, %v3186_v31  ;;  %v3185_v13 = vmul.f32 0.03125, %v3177_v36 }
0x125a   :  { %7541 = vrsqrt.f32 %v3192_v15  ;;  %v3191_v20 = vadd.f32 1e-05, %v3185_v13 }
0x125c   :  { %7543 = vrsqrt.f32 %v3191_v20 }
0x125e   :  { %v7538_v43 = vpop.eup %7537 }
0x125f   :  { %v3202_v24 = vmul.f32 %v7538_v43, %v8811_v39 }
0x1260   :  { %v7540_v56 = vpop.eup %7539 }
0x1261   :  { %v3201_v41 = vmul.f32 %v7540_v56, %v8814_v9  ;;  %v3214_v14 = vmul.f32 %v6268_v63, %v3202_v24 }
0x1263   :  { %v3213_v26 = vmul.f32 %v6268_v63, %v3201_v41  ;;  %v3226_v0 = vadd.f32 %v6269_v7, %v3214_v14 }
0x1265   :  { %v3225_v22 = vadd.f32 %v6269_v7, %v3213_v26 }
0x1267   :  { %7020 = vmatprep.mubr.msk.f32.mxu0 %vm264_vm1, %v3225_v22  ;;  %v7542_v12 = vpop.eup %7541 }
0x1268   :  { %7021 = vmatmul.mubr.msk.f32.gmra.mxu0 %vm264_vm1, %v3226_v0  ;;  %v3204_v33 = vmul.f32 %v7542_v12, %v8825_v30 }
0x1269   :  { %v7544_v59 = vpop.eup %7543 }
0x126a   :  { %v3203_v44 = vmul.f32 %v7544_v59, %v8828_v23  ;;  %v3216_v34 = vmul.f32 %v6268_v63, %v3204_v33 }
0x126c   :  { %v3215_v37 = vmul.f32 %v6268_v63, %v3203_v44  ;;  %v3228_v50 = vadd.f32 %v6269_v7, %v3216_v34 }
0x126e   :  { %v3227_v39 = vadd.f32 %v6269_v7, %v3215_v37 }
0x1270   :  { %7023 = vmatprep.mubr.msk.f32.mxu0 %vm264_vm1, %v3227_v39 }
0x1271   :  { %7024 = vmatmul.mubr.msk.f32.gmra.mxu0 %vm264_vm1, %v3228_v50 }
0x1272   :  { %7032 = vmatprep.mubr.msk.f32.mxu0 %vm7732_vm2, %v7730_v51 }
0x1311   :  { %v8853_v9 = vpop.f32.mrf.mxu0 }
0x1312   :  { %3357 = vrot.lane.b32.xlu1 %v8853_v9, %s7731_s0  ;;  %v8895_v55 = vmul.f32 0.35355338, %v8853_v9 }
0x1313   :  { %v8857_v35 = vpop.f32.mrf.mxu0 }
0x1314   :  { %v8885_v61 = vmul.f32 0.35355338, %v8857_v35 }
0x1316   :  { %3355 = vrot.lane.b32.xlu1 %v8857_v35, %s7731_s0 }
0x1328   :  { %v8861_v21 = vpop.f32.mrf.mxu0 }
0x1329   :  { %v8903_v46 = vmul.f32 0.35355338, %v8861_v21 }
0x132a   :  { %v8863_v30 = vpop.f32.mrf.mxu0 }
0x132b   :  { %3359 = vrot.lane.b32.xlu0 %v8863_v30, %s7731_s0  ;;  %v8906_v32 = vmul.f32 0.35355338, %v8863_v30 }
0x1331   :  { %v8867_v45 = vpop.f32.mrf.mxu0 }
0x1332   :  { %3463 = vrot.lane.b32.xlu1 %v8867_v45, %s7731_s0  ;;  %v8925_v58 = vmul.f32 0.35355338, %v8867_v45 }
0x1333   :  { %v8871_v23 = vpop.f32.mrf.mxu0 }
0x1334   :  { %3461 = vrot.lane.b32.xlu0 %v8871_v23, %s7731_s0  ;;  %v8918_v42 = vmul.f32 0.35355338, %v8871_v23 }
0x1336   :  { %3459 = vrot.lane.b32.xlu1 %v8861_v21, %s7731_s0 }
0x1384   :  { %v3358_v60 = vpop.permute.xlu1 %3357 }
0x1388   :  { %v3356_v52 = vpop.permute.xlu1 %3355 }
0x139d   :  { %v3360_v49 = vpop.permute.xlu0 %3359 }
0x139e   :  { %7027 = vmatpush3.xpose.msk.msra.mxu0 %vm500_vm3, %v3360_v49 }
0x139f   :  { %7028 = vmatprep.subr.mxu0 %v7730_v51 }
0x13a2   :  { %7029 = vmatpush3.xpose.msk.msra.mxu0 %vm500_vm3, %v3358_v60 }
0x13a3   :  { %7030 = vmatprep.subr.mxu0 %v7730_v51 }
0x13a4   :  { %v3464_v54 = vpop.permute.xlu1 %3463 }
0x13a5   :  { %7042 = vmatpush3.xpose.msk.msra.mxu1 %vm500_vm3, %v3464_v54 }
0x13a6   :  { %7031 = vmatpush3.xpose.msk.msra.mxu0 %vm500_vm3, %v3356_v52  ;;  %7043 = vmatprep.subr.mxu1 %v7730_v51  ;;  %v3462_v57 = vpop.permute.xlu0 %3461 }
0x13a7   :  { %7056 = vmatprep.subr.mxu0 %v7730_v51 }
0x13a8   :  { %v3460_v62 = vpop.permute.xlu1 %3459 }
0x13a9   :  { %7033 = vmatmul.mubr.msk.f32.vlgmr.msra.gmra.mxu0 %vm500_vm3, %v8885_v61  ;;  %7044 = vmatpush3.xpose.msk.msra.mxu1 %vm500_vm3, %v3462_v57 }
0x13aa   :  { %7035 = vmatprep.mubr.msk.f32.mxu0 %vm7732_vm2, %v7730_v51  ;;  %7045 = vmatprep.subr.mxu1 %v7730_v51 }
0x13ad   :  { %7036 = vmatmul.mubr.msk.f32.gmra.mxu0 %vm500_vm3, %v8895_v55  ;;  %7046 = vmatpush3.xpose.msk.msra.mxu1 %vm500_vm3, %v3460_v62 }
0x13ae   :  { %7038 = vmatprep.mubr.msk.f32.mxu0 %vm7732_vm2, %v7730_v51  ;;  %7071 = vmatprep.subr.mxu1 %v7730_v51 }
0x13b0   :  { %7048 = vmatmul.mubr.msk.f32.vlgmr.msra.gmra.mxu1 %vm500_vm3, %v8903_v46 }
0x13b1   :  { %7039 = vmatmul.mubr.msk.f32.gmra.mxu0 %vm500_vm3, %v8906_v32  ;;  %7050 = vmatprep.mubr.msk.f32.mxu1 %vm7732_vm2, %v7730_v51 }
0x13b2   :  { %7062 = vmatprep.mubr.msk.f32.mxu0 %vm7732_vm2, %v7730_v51 }
0x13b4   :  { %7051 = vmatmul.mubr.msk.f32.gmra.mxu1 %vm500_vm3, %v8918_v42 }
0x13b5   :  { %7053 = vmatprep.mubr.msk.f32.mxu1 %vm7732_vm2, %v7730_v51 }
0x13b8   :  { %7054 = vmatmul.mubr.msk.f32.gmra.mxu1 %vm500_vm3, %v8925_v58 }
0x13b9   :  { %7077 = vmatprep.mubr.msk.f32.mxu1 %vm7732_vm2, %v7730_v51 }
0x1469   :  { %v3442_v40 = vpop.f32.mrf.mxu0 }
0x146a   :  { %v3443_v47 = vadd.f32 %v3442_v40, %v8092_v11 }
0x146b   :  { %v7034_v63 = vpop.f32.mrf.mxu0 }
0x146c   :  { %v3560_v19 = vsel %vm700_vm5, %v3443_v47, -inf }
0x146d   :  { %3561 = vmax.xlane.f32.xlu0 %v3560_v19  ;;  %v3447_v16 = vpop.f32.mrf.mxu0 }
0x146e   :  { %v3448_v1 = vadd.f32 %v3447_v16, %v8092_v11 }
0x146f   :  { %v7037_v7 = vpop.f32.mrf.mxu0 }
0x1470   :  { %v3563_v2 = vsel %vm700_vm5, %v3448_v1, -inf  ;;  %v3546_v48 = vpop.f32.mrf.mxu1 }
0x1471   :  { %3564 = vmax.xlane.f32.xlu1 %v3563_v2  ;;  %v3452_v6 = vpop.f32.mrf.mxu0  ;;  %v3547_v5 = vadd.f32 %v3546_v48, %v8092_v11 }
0x1472   :  { %v3453_v17 = vadd.f32 %v3452_v6, %v8092_v11  ;;  %v7049_v25 = vpop.f32.mrf.mxu1 }
0x1473   :  { %v7040_v28 = vpop.f32.mrf.mxu0  ;;  %v3569_v36 = vsel %vm700_vm5, %v3547_v5, -inf }
0x1474   :  { %v3566_v4 = vsel %vm700_vm5, %v3453_v17, -inf  ;;  %v3551_v27 = vpop.f32.mrf.mxu1 }
0x1475   :  { %3567 = vmax.xlane.f32.xlu0 %v3566_v4  ;;  %v3552_v31 = vadd.f32 %v3551_v27, %v8092_v11 }
0x1476   :  { %v7052_v18 = vpop.f32.mrf.mxu1 }
0x1477   :  { %v3572_v20 = vsel %vm700_vm5, %v3552_v31, -inf }
0x1478   :  { %v3556_v15 = vpop.f32.mrf.mxu1 }
0x1479   :  { %3570 = vmax.xlane.f32.xlu0 %v3569_v36  ;;  %v8956_v43 = vadd.f32 %v3556_v15, %v8092_v11 }
0x147a   :  { %v7055_v13 = vpop.f32.mrf.mxu1 }
0x147b   :  { %v3575_v24 = vsel %vm700_vm5, %v8956_v43, -inf }
0x147d   :  { %3573 = vmax.xlane.f32.xlu0 %v3572_v20 }
0x1482   :  { %3628 = vrot.lane.b32.xlu1 %v8853_v9, %s7734_s5 }
0x1486   :  { %3626 = vrot.lane.b32.xlu1 %v8857_v35, %s7734_s5 }
0x148a   :  { %3832 = vrot.lane.b32.xlu1 %v8863_v30, %s7735_s9 }
0x148e   :  { %3830 = vrot.lane.b32.xlu1 %v8853_v9, %s7735_s9 }
0x1493   :  { %3630 = vrot.lane.b32.xlu0 %v8863_v30, %s7734_s5 }
0x1497   :  { %3728 = vrot.lane.b32.xlu0 %v8867_v45, %s7734_s5 }
0x149b   :  { %3726 = vrot.lane.b32.xlu0 %v8871_v23, %s7734_s5 }
0x14b2   :  { %3576 = vmax.xlane.f32.xlu1 %v3575_v24 }
0x14c3   :  { %3724 = vrot.lane.b32.xlu1 %v8861_v21, %s7734_s5 }
0x14f6   :  { %v3562_v56 = vpop.xlane.xlu0 %3561 }
0x14f7   :  { %v3578_v41 = vsub.f32 %v3443_v47, %v3562_v56 }
0x14f9   :  { %v3584_v14 = vmul.f32 1.442695, %v3578_v41 }
0x14fa   :  { %v3565_v26 = vpop.xlane.xlu1 %3564 }
0x14fb   :  { %7545 = vpow2.f32 %v3584_v14  ;;  %v3579_v0 = vsub.f32 %v3448_v1, %v3565_v26 }
0x14fd   :  { %v3586_v59 = vmul.f32 1.442695, %v3579_v0 }
0x14fe   :  { %v3568_v22 = vpop.xlane.xlu0 %3567  ;;  %v3629_v60 = vpop.permute.xlu1 %3628 }
0x14ff   :  { %v3580_v44 = vsub.f32 %v3453_v17, %v3568_v22 }
0x1501   :  { %v3588_v49 = vmul.f32 1.442695, %v3580_v44 }
0x1502   :  { %v3571_v12 = vpop.xlane.xlu0 %3570  ;;  %v3627_v62 = vpop.permute.xlu1 %3626 }
0x1503   :  { %v3581_v33 = vsub.f32 %v3547_v5, %v3571_v12 }
0x1505   :  { %v3590_v34 = vmul.f32 1.442695, %v3581_v33 }
0x1506   :  { %v3574_v37 = vpop.xlane.xlu0 %3573  ;;  %v3833_v17 = vpop.permute.xlu1 %3832 }
0x1507   :  { %7547 = vpow2.f32 %v3590_v34  ;;  %v3582_v39 = vsub.f32 %v3552_v31, %v3574_v37 }
0x1508   :  { %v7546_v50 = vpop.eup %7545  ;;  %7549 = vpow2.f32 %v3586_v59 }
0x1509   :  { %v3592_v52 = vmul.f32 1.442695, %v3582_v39  ;;  %v3596_v54 = vsel %vm700_vm5, %v7546_v50, 0.0 }
0x150a   :  { %3597 = vadd.xlane.f32.xlu0 %v3596_v54  ;;  %v3631_v57 = vpop.permute.xlu0 %3630  ;;  %v3831_v25 = vpop.permute.xlu1 %3830 }
0x150b   :  { %7551 = vpow2.f32 %v3592_v52  ;;  %7057 = vmatpush3.msra.mxu0 %v3631_v57 }
0x150c   :  { %7058 = vmatprep.subr.mxu0 %v7730_v51  ;;  %7553 = vpow2.f32 %v3588_v49 }
0x150d   :  { %7059 = vmatpush3.msra.mxu0 %v3629_v60 }
0x150e   :  { %7060 = vmatprep.subr.mxu0 %v7730_v51  ;;  %v3729_v40 = vpop.permute.xlu0 %3728 }
0x150f   :  { %7061 = vmatpush3.msra.mxu0 %v3627_v62  ;;  %7072 = vmatpush3.msra.mxu1 %v3729_v40 }
0x1510   :  { %7073 = vmatprep.subr.mxu1 %v7730_v51  ;;  %7086 = vmatprep.subr.mxu0 %v7730_v51 }
0x1512   :  { %v3727_v47 = vpop.permute.xlu0 %3726 }
0x1513   :  { %7074 = vmatpush3.msra.mxu1 %v3727_v47 }
0x1514   :  { %v7548_v63 = vpop.eup %7547  ;;  %7075 = vmatprep.subr.mxu1 %v7730_v51 }
0x1515   :  { %v3605_v19 = vsel %vm700_vm5, %v7548_v63, 0.0  ;;  %v7550_v16 = vpop.eup %7549 }
0x1516   :  { %3606 = vadd.xlane.f32.xlu1 %v3605_v19  ;;  %v3599_v7 = vsel %vm700_vm5, %v7550_v16, 0.0 }
0x1518   :  { %v7552_v1 = vpop.eup %7551 }
0x1519   :  { %v3608_v2 = vsel %vm700_vm5, %v7552_v1, 0.0  ;;  %v8971_v48 = vpop.eup %7553 }
0x151a   :  { %3600 = vadd.xlane.f32.xlu1 %v3599_v7  ;;  %3609 = vadd.xlane.f32.xlu0 %v3608_v2  ;;  %v3602_v6 = vsel %vm700_vm5, %v8971_v48, 0.0 }
0x151e   :  { %3603 = vadd.xlane.f32.xlu0 %v3602_v6 }
0x152b   :  { %3936 = vrot.lane.b32.xlu1 %v8867_v45, %s7735_s9 }
0x152f   :  { %3934 = vrot.lane.b32.xlu1 %v8871_v23, %s7735_s9 }
0x1533   :  { %3932 = vrot.lane.b32.xlu1 %v8861_v21, %s7735_s9 }
0x1534   :  { %3828 = vrot.lane.b32.xlu0 %v8857_v35, %s7735_s9 }
0x1538   :  { %3822 = vrot.lane.b32.xlu0 %v8885_v61, %s7736_s13 }
0x153b   :  { %v3577_v28 = vpop.xlane.xlu1 %3576 }
0x153c   :  { %3824 = vrot.lane.b32.xlu0 %v8895_v55, %s7736_s13  ;;  %v3583_v5 = vsub.f32 %v8956_v43, %v3577_v28 }
0x153e   :  { %v3594_v27 = vmul.f32 1.442695, %v3583_v5 }
0x153f   :  { %v3725_v4 = vpop.permute.xlu1 %3724 }
0x1540   :  { %3826 = vrot.lane.b32.xlu0 %v8906_v32, %s7736_s13  ;;  %7076 = vmatpush3.msra.mxu1 %v3725_v4  ;;  %7555 = vpow2.f32 %v3594_v27 }
0x1541   :  { %7101 = vmatprep.subr.mxu1 %v7730_v51 }
0x1544   :  { %3928 = vrot.lane.b32.xlu0 %v8918_v42, %s7736_s13 }
0x154d   :  { %v8993_v18 = vpop.eup %7555 }
0x154e   :  { %v3611_v31 = vsel %vm700_vm5, %v8993_v18, 0.0 }
0x1557   :  { %3612 = vadd.xlane.f32.xlu1 %v3611_v31 }
0x1568   :  { %3926 = vrot.lane.b32.xlu1 %v8903_v46, %s7736_s13 }
0x156c   :  { %3930 = vrot.lane.b32.xlu1 %v8925_v58, %s7736_s13 }
0x1593   :  { %v3598_v36 = vpop.xlane.xlu0 %3597 }
0x1594   :  { %7557 = vrcp.f32 %v3598_v36 }
0x159f   :  { %v3607_v15 = vpop.xlane.xlu1 %3606 }
0x15a0   :  { %7559 = vrcp.f32 %v3607_v15 }
0x15a1   :  { %v7558_v13 = vpop.eup %7557 }
0x15a2   :  { %v3620_v20 = vmul.f32 %v7558_v13, %v7546_v50 }
0x15a3   :  { %v3601_v43 = vpop.xlane.xlu1 %3600  ;;  %v3610_v24 = vpop.xlane.xlu0 %3609 }
0x15a4   :  { %7561 = vrcp.f32 %v3601_v43  ;;  %7063 = vmatmul.mubr.msk.f32.vlgmr.msra.gmra.mxu0 %vm700_vm5, %v3620_v20 }
0x15a5   :  { %7563 = vrcp.f32 %v3610_v24  ;;  %7087 = vmatpush3.xpose.msk.msra.mxu0 %vm500_vm3, %v3833_v17  ;;  %7065 = vmatprep.mubr.msk.f32.mxu0 %vm7732_vm2, %v7730_v51 }
0x15a6   :  { %7088 = vmatprep.subr.mxu0 %v7730_v51 }
0x15a7   :  { %v3604_v56 = vpop.xlane.xlu0 %3603  ;;  %v3937_v26 = vpop.permute.xlu1 %3936 }
0x15a8   :  { %7565 = vrcp.f32 %v3604_v56 }
0x15a9   :  { %7089 = vmatpush3.xpose.msk.msra.mxu0 %vm500_vm3, %v3831_v25 }
0x15aa   :  { %7090 = vmatprep.subr.mxu0 %v7730_v51 }
0x15ab   :  { %v3829_v41 = vpop.permute.xlu0 %3828  ;;  %v3935_v59 = vpop.permute.xlu1 %3934 }
0x15ad   :  { %v7560_v14 = vpop.eup %7559  ;;  %7091 = vmatpush3.xpose.msk.msra.mxu0 %vm500_vm3, %v3829_v41 }
0x15ae   :  { %v3623_v22 = vmul.f32 %v7560_v14, %v7548_v63  ;;  %7116 = vmatprep.subr.mxu0 %v7730_v51 }
0x15af   :  { %v3823_v39 = vpop.permute.xlu0 %3822  ;;  %v3933_v50 = vpop.permute.xlu1 %3932 }
0x15b0   :  { %7078 = vmatmul.mubr.msk.f32.vlgmr.msra.gmra.mxu1 %vm700_vm5, %v3623_v22 }
0x15b1   :  { %v7562_v0 = vpop.eup %7561  ;;  %7102 = vmatpush3.xpose.msk.msra.mxu1 %vm500_vm3, %v3937_v26  ;;  %7080 = vmatprep.mubr.msk.f32.mxu1 %vm7732_vm2, %v7730_v51 }
0x15b2   :  { %v7564_v12 = vpop.eup %7563  ;;  %7103 = vmatprep.subr.mxu1 %v7730_v51  ;;  %v3621_v33 = vmul.f32 %v7562_v0, %v7550_v16 }
0x15b3   :  { %v3624_v44 = vmul.f32 %v7564_v12, %v7552_v1  ;;  %v3825_v60 = vpop.permute.xlu0 %3824 }
0x15b4   :  { %7066 = vmatmul.mubr.msk.f32.gmra.mxu0 %vm700_vm5, %v3621_v33 }
0x15b5   :  { %v7566_v34 = vpop.eup %7565  ;;  %7081 = vmatmul.mubr.msk.f32.gmra.mxu1 %vm700_vm5, %v3624_v44  ;;  %7068 = vmatprep.mubr.msk.f32.mxu0 %vm7732_vm2, %v7730_v51 }
0x15b6   :  { %7104 = vmatpush3.xpose.msk.msra.mxu1 %vm500_vm3, %v3935_v59  ;;  %v3622_v37 = vmul.f32 %v7566_v34, %v8971_v48  ;;  %7083 = vmatprep.mubr.msk.f32.mxu1 %vm7732_vm2, %v7730_v51 }
0x15b7   :  { %7105 = vmatprep.subr.mxu1 %v7730_v51  ;;  %v3827_v49 = vpop.permute.xlu0 %3826 }
0x15b8   :  { %7069 = vmatmul.mubr.msk.f32.gmra.mxu0 %vm700_vm5, %v3622_v37 }
0x15b9   :  { %7092 = vmatprep.mubr.msk.f32.mxu0 %vm7732_vm2, %v7730_v51 }
0x15ba   :  { %7106 = vmatpush3.xpose.msk.msra.mxu1 %vm500_vm3, %v3933_v50 }
0x15bb   :  { %7131 = vmatprep.subr.mxu1 %v7730_v51  ;;  %v3929_v40 = vpop.permute.xlu0 %3928 }
0x15bc   :  { %7093 = vmatmul.mubr.msk.f32.vlgmr.msra.gmra.mxu0 %vm500_vm3, %v3823_v39 }
0x15bd   :  { %7095 = vmatprep.mubr.msk.f32.mxu0 %vm7732_vm2, %v7730_v51 }
0x15c0   :  { %7096 = vmatmul.mubr.msk.f32.gmra.mxu0 %vm500_vm3, %v3825_v60 }
0x15c1   :  { %7098 = vmatprep.mubr.msk.f32.mxu0 %vm7732_vm2, %v7730_v51 }
0x15c4   :  { %7099 = vmatmul.mubr.msk.f32.gmra.mxu0 %vm500_vm3, %v3827_v49 }
0x15c5   :  { %7122 = vmatprep.mubr.msk.f32.mxu0 %vm7732_vm2, %v7730_v51 }
0x15e0   :  { %v3613_v52 = vpop.xlane.xlu1 %3612 }
0x15e1   :  { %7567 = vrcp.f32 %v3613_v52 }
0x15e4   :  { %v3927_v62 = vpop.permute.xlu1 %3926 }
0x15e8   :  { %v3931_v47 = vpop.permute.xlu1 %3930 }
0x15ee   :  { %v7568_v54 = vpop.eup %7567 }
0x15ef   :  { %v3625_v57 = vmul.f32 %v7568_v54, %v8993_v18 }
0x15f1   :  { %7084 = vmatmul.mubr.msk.f32.gmra.mxu1 %vm700_vm5, %v3625_v57 }
0x15f2   :  { %7107 = vmatprep.mubr.msk.f32.mxu1 %vm7732_vm2, %v7730_v51 }
0x15f5   :  { %7108 = vmatmul.mubr.msk.f32.vlgmr.msra.gmra.mxu1 %vm500_vm3, %v3927_v62 }
0x15f6   :  { %7110 = vmatprep.mubr.msk.f32.mxu1 %vm7732_vm2, %v7730_v51 }
0x15f9   :  { %7111 = vmatmul.mubr.msk.f32.gmra.mxu1 %vm500_vm3, %v3929_v40 }
0x15fa   :  { %7113 = vmatprep.mubr.msk.f32.mxu1 %vm7732_vm2, %v7730_v51 }
0x15fd   :  { %7114 = vmatmul.mubr.msk.f32.gmra.mxu1 %vm500_vm3, %v3931_v47 }
0x15fe   :  { %7137 = vmatprep.mubr.msk.f32.mxu1 %vm7732_vm2, %v7730_v51 }
0x1664   :  { %v9051_v63 = vpop.f32.mrf.mxu0 }
0x1666   :  { %v7064_v19 = vpop.f32.mrf.mxu0 }
0x1670   :  { %v9053_v16 = vpop.f32.mrf.mxu1 }
0x1672   :  { %v7079_v1 = vpop.f32.mrf.mxu1 }
0x1674   :  { %v9055_v7 = vpop.f32.mrf.mxu0 }
0x1675   :  { %v9057_v2 = vpop.f32.mrf.mxu1 }
0x1676   :  { %v7067_v48 = vpop.f32.mrf.mxu0 }
0x1677   :  { %v7082_v6 = vpop.f32.mrf.mxu1 }
0x1678   :  { %v9059_v17 = vpop.f32.mrf.mxu0 }
0x167a   :  { %v7070_v25 = vpop.f32.mrf.mxu0 }
0x167c   :  { %v3912_v28 = vpop.f32.mrf.mxu0 }
0x167d   :  { %v3913_v5 = vadd.f32 %v3912_v28, %v8092_v11 }
0x167e   :  { %v7094_v4 = vpop.f32.mrf.mxu0 }
0x167f   :  { %v4030_v27 = vsel %vm700_vm5, %v3913_v5, -inf }
0x1680   :  { %4031 = vmax.xlane.f32.xlu0 %v4030_v27  ;;  %v3917_v18 = vpop.f32.mrf.mxu0 }
0x1681   :  { %v3918_v31 = vadd.f32 %v3917_v18, %v8092_v11 }
0x1682   :  { %v7097_v36 = vpop.f32.mrf.mxu0 }
0x1683   :  { %v4033_v15 = vsel %vm700_vm5, %v3918_v31, -inf }
0x1684   :  { %4034 = vmax.xlane.f32.xlu1 %v4033_v15  ;;  %v3922_v13 = vpop.f32.mrf.mxu0 }
0x1685   :  { %v3923_v20 = vadd.f32 %v3922_v13, %v8092_v11 }
0x1686   :  { %v7100_v43 = vpop.f32.mrf.mxu0 }
0x1687   :  { %v4036_v24 = vsel %vm700_vm5, %v3923_v20, -inf }
0x1688   :  { %4037 = vmax.xlane.f32.xlu0 %v4036_v24 }
0x1695   :  { %4098 = vrot.lane.b32.xlu1 %v8853_v9, %s7737_s17 }
0x1699   :  { %4096 = vrot.lane.b32.xlu1 %v8857_v35, %s7737_s17 }
0x169d   :  { %4302 = vrot.lane.b32.xlu1 %v8863_v30, %s7738_s21 }
0x16a1   :  { %4300 = vrot.lane.b32.xlu1 %v8853_v9, %s7738_s21 }
0x16b1   :  { %v9075_v56 = vpop.f32.mrf.mxu1 }
0x16b3   :  { %v7085_v41 = vpop.f32.mrf.mxu1 }
0x16b5   :  { %v4016_v14 = vpop.f32.mrf.mxu1 }
0x16b6   :  { %v4017_v26 = vadd.f32 %v4016_v14, %v8092_v11 }
0x16b7   :  { %v7109_v22 = vpop.f32.mrf.mxu1 }
0x16b8   :  { %v4039_v0 = vsel %vm700_vm5, %v4017_v26, -inf }
0x16b9   :  { %4040 = vmax.xlane.f32.xlu0 %v4039_v0  ;;  %v4021_v12 = vpop.f32.mrf.mxu1 }
0x16ba   :  { %v4022_v33 = vadd.f32 %v4021_v12, %v8092_v11 }
0x16bb   :  { %v7112_v59 = vpop.f32.mrf.mxu1 }
0x16bc   :  { %v4042_v44 = vsel %vm700_vm5, %v4022_v33, -inf }
0x16bd   :  { %4043 = vmax.xlane.f32.xlu0 %v4042_v44  ;;  %v4026_v34 = vpop.f32.mrf.mxu1 }
0x16be   :  { %v9082_v39 = vadd.f32 %v4026_v34, %v8092_v11 }
0x16bf   :  { %v7115_v37 = vpop.f32.mrf.mxu1 }
0x16c0   :  { %v4045_v50 = vsel %vm700_vm5, %v9082_v39, -inf }
0x16c5   :  { %4046 = vmax.xlane.f32.xlu1 %v4045_v50 }
0x16d3   :  { %4100 = vrot.lane.b32.xlu0 %v8863_v30, %s7737_s17 }
0x16d6   :  { %4194 = vrot.lane.b32.xlu1 %v8861_v21, %s7737_s17 }
0x16d7   :  { %4198 = vrot.lane.b32.xlu0 %v8867_v45, %s7737_s17 }
0x16db   :  { %4196 = vrot.lane.b32.xlu0 %v8871_v23, %s7737_s17 }
0x1709   :  { %v4032_v60 = vpop.xlane.xlu0 %4031 }
0x170a   :  { %v4048_v49 = vsub.f32 %v3913_v5, %v4032_v60 }
0x170c   :  { %v4054_v52 = vmul.f32 1.442695, %v4048_v49 }
0x170d   :  { %v4035_v62 = vpop.xlane.xlu1 %4034 }
0x170e   :  { %7569 = vpow2.f32 %v4054_v52  ;;  %v4049_v1 = vsub.f32 %v3918_v31, %v4035_v62 }
0x1710   :  { %v4056_v28 = vmul.f32 1.442695, %v4049_v1 }
0x1711   :  { %v4099_v40 = vpop.permute.xlu1 %4098  ;;  %v4038_v47 = vpop.xlane.xlu0 %4037 }
0x1712   :  { %v4050_v4 = vsub.f32 %v3923_v20, %v4038_v47 }
0x1714   :  { %v4058_v36 = vmul.f32 1.442695, %v4050_v4 }
0x1715   :  { %v4097_v19 = vpop.permute.xlu1 %4096 }
0x1719   :  { %v9098_v25 = vpop.permute.xlu1 %4302 }
0x171b   :  { %v9094_v54 = vpop.eup %7569 }
0x171c   :  { %v4066_v57 = vsel %vm700_vm5, %v9094_v54, 0.0 }
0x171d   :  { %4067 = vadd.xlane.f32.xlu0 %v4066_v57  ;;  %v4301_v13 = vpop.permute.xlu1 %4300 }
0x1742   :  { %v4041_v48 = vpop.xlane.xlu0 %4040 }
0x1743   :  { %v4051_v6 = vsub.f32 %v4017_v26, %v4041_v48 }
0x1745   :  { %v4060_v5 = vmul.f32 1.442695, %v4051_v6 }
0x1746   :  { %v4044_v27 = vpop.xlane.xlu0 %4043 }
0x1747   :  { %7571 = vpow2.f32 %v4060_v5  ;;  %v4052_v18 = vsub.f32 %v4022_v33, %v4044_v27 }
0x1748   :  { %7573 = vpow2.f32 %v4056_v28 }
0x1749   :  { %v4062_v15 = vmul.f32 1.442695, %v4052_v18 }
0x174a   :  { %v4101_v43 = vpop.permute.xlu0 %4100 }
0x174b   :  { %7575 = vpow2.f32 %v4062_v15  ;;  %7117 = vmatpush3.msra.mxu0 %v4101_v43 }
0x174c   :  { %7118 = vmatprep.subr.mxu0 %v7730_v51  ;;  %7577 = vpow2.f32 %v4058_v36 }
0x174d   :  { %7119 = vmatpush3.msra.mxu0 %v4099_v40 }
0x174e   :  { %v4047_v31 = vpop.xlane.xlu1 %4046  ;;  %7120 = vmatprep.subr.mxu0 %v7730_v51  ;;  %v4199_v24 = vpop.permute.xlu0 %4198 }
0x174f   :  { %7121 = vmatpush3.msra.mxu0 %v4097_v19  ;;  %7132 = vmatpush3.msra.mxu1 %v4199_v24  ;;  %v4053_v34 = vsub.f32 %v9082_v39, %v4047_v31 }
0x1750   :  { %7133 = vmatprep.subr.mxu1 %v7730_v51  ;;  %7146 = vmatprep.subr.mxu0 %v7730_v51 }
0x1751   :  { %v4064_v37 = vmul.f32 1.442695, %v4053_v34 }
0x1752   :  { %v4197_v20 = vpop.permute.xlu0 %4196  ;;  %v4195_v14 = vpop.permute.xlu1 %4194 }
0x1753   :  { %7134 = vmatpush3.msra.mxu1 %v4197_v20  ;;  %7579 = vpow2.f32 %v4064_v37 }
0x1754   :  { %v7572_v41 = vpop.eup %7571  ;;  %7135 = vmatprep.subr.mxu1 %v7730_v51 }
0x1755   :  { %7136 = vmatpush3.msra.mxu1 %v4195_v14  ;;  %v4075_v26 = vsel %vm700_vm5, %v7572_v41, 0.0  ;;  %v7574_v22 = vpop.eup %7573 }
0x1756   :  { %4076 = vadd.xlane.f32.xlu1 %v4075_v26  ;;  %7161 = vmatprep.subr.mxu1 %v7730_v51  ;;  %v4069_v12 = vsel %vm700_vm5, %v7574_v22, 0.0 }
0x1758   :  { %v7576_v0 = vpop.eup %7575 }
0x1759   :  { %v4078_v33 = vsel %vm700_vm5, %v7576_v0, 0.0  ;;  %v7578_v59 = vpop.eup %7577 }
0x175a   :  { %4070 = vadd.xlane.f32.xlu1 %v4069_v12  ;;  %4079 = vadd.xlane.f32.xlu0 %v4078_v33  ;;  %v4072_v44 = vsel %vm700_vm5, %v7578_v59, 0.0 }
0x175e   :  { %4073 = vadd.xlane.f32.xlu0 %v4072_v44 }
0x1760   :  { %v9127_v50 = vpop.eup %7579 }
0x1761   :  { %v4081_v60 = vsel %vm700_vm5, %v9127_v50, 0.0 }
0x176b   :  { %4406 = vrot.lane.b32.xlu1 %v8867_v45, %s7738_s21 }
0x176f   :  { %4404 = vrot.lane.b32.xlu1 %v8871_v23, %s7738_s21 }
0x1773   :  { %4402 = vrot.lane.b32.xlu1 %v8861_v21, %s7738_s21 }
0x1774   :  { %4298 = vrot.lane.b32.xlu0 %v8857_v35, %s7738_s21 }
0x1778   :  { %4292 = vrot.lane.b32.xlu0 %v8885_v61, %s7739_s25 }
0x177c   :  { %4294 = vrot.lane.b32.xlu0 %v8895_v55, %s7739_s25 }
0x1780   :  { %4296 = vrot.lane.b32.xlu0 %v8906_v32, %s7739_s25 }
0x1784   :  { %4398 = vrot.lane.b32.xlu0 %v8918_v42, %s7739_s25 }
0x1797   :  { %4082 = vadd.xlane.f32.xlu1 %v4081_v60 }
0x17a6   :  { %v4068_v49 = vpop.xlane.xlu0 %4067 }
0x17a7   :  { %7581 = vrcp.f32 %v4068_v49 }
0x17a8   :  { %4396 = vrot.lane.b32.xlu1 %v8903_v46, %s7739_s25 }
0x17ac   :  { %4400 = vrot.lane.b32.xlu1 %v8925_v58, %s7739_s25 }
0x17b4   :  { %v7582_v39 = vpop.eup %7581 }
0x17b5   :  { %v4090_v52 = vmul.f32 %v7582_v39, %v9094_v54 }
0x17b7   :  { %7123 = vmatmul.mubr.msk.f32.vlgmr.msra.gmra.mxu0 %vm700_vm5, %v4090_v52 }
0x17b8   :  { %7147 = vmatpush3.xpose.msk.msra.mxu0 %vm500_vm3, %v9098_v25  ;;  %7125 = vmatprep.mubr.msk.f32.mxu0 %vm7732_vm2, %v7730_v51 }
0x17b9   :  { %7148 = vmatprep.subr.mxu0 %v7730_v51 }
0x17bc   :  { %7149 = vmatpush3.xpose.msk.msra.mxu0 %vm500_vm3, %v4301_v13 }
0x17bd   :  { %7150 = vmatprep.subr.mxu0 %v7730_v51 }
0x17df   :  { %v4077_v57 = vpop.xlane.xlu1 %4076 }
0x17e0   :  { %7583 = vrcp.f32 %v4077_v57 }
0x17e3   :  { %v4071_v62 = vpop.xlane.xlu1 %4070  ;;  %v4080_v40 = vpop.xlane.xlu0 %4079 }
0x17e4   :  { %7585 = vrcp.f32 %v4071_v62 }
0x17e5   :  { %7587 = vrcp.f32 %v4080_v40 }
0x17e7   :  { %v4074_v54 = vpop.xlane.xlu0 %4073  ;;  %v4407_v1 = vpop.permute.xlu1 %4406 }
0x17e8   :  { %7589 = vrcp.f32 %v4074_v54 }
0x17eb   :  { %v4299_v47 = vpop.permute.xlu0 %4298  ;;  %v4405_v4 = vpop.permute.xlu1 %4404 }
0x17ec   :  { %7151 = vmatpush3.xpose.msk.msra.mxu0 %vm500_vm3, %v4299_v47 }
0x17ed   :  { %v7584_v19 = vpop.eup %7583  ;;  %7176 = vmatprep.subr.mxu0 %v7730_v51 }
0x17ee   :  { %v4093_v48 = vmul.f32 %v7584_v19, %v7572_v41 }
0x17ef   :  { %v4293_v36 = vpop.permute.xlu0 %4292  ;;  %v4403_v15 = vpop.permute.xlu1 %4402 }
0x17f0   :  { %7138 = vmatmul.mubr.msk.f32.vlgmr.msra.gmra.mxu1 %vm700_vm5, %v4093_v48 }
0x17f1   :  { %v7586_v6 = vpop.eup %7585  ;;  %7162 = vmatpush3.xpose.msk.msra.mxu1 %vm500_vm3, %v4407_v1  ;;  %7140 = vmatprep.mubr.msk.f32.mxu1 %vm7732_vm2, %v7730_v51 }
0x17f2   :  { %v7588_v25 = vpop.eup %7587  ;;  %7163 = vmatprep.subr.mxu1 %v7730_v51  ;;  %v4091_v28 = vmul.f32 %v7586_v6, %v7574_v22 }
0x17f3   :  { %v4094_v5 = vmul.f32 %v7588_v25, %v7576_v0  ;;  %v4295_v13 = vpop.permute.xlu0 %4294 }
0x17f4   :  { %7126 = vmatmul.mubr.msk.f32.gmra.mxu0 %vm700_vm5, %v4091_v28 }
0x17f5   :  { %v7590_v27 = vpop.eup %7589  ;;  %7141 = vmatmul.mubr.msk.f32.gmra.mxu1 %vm700_vm5, %v4094_v5  ;;  %7128 = vmatprep.mubr.msk.f32.mxu0 %vm7732_vm2, %v7730_v51 }
0x17f6   :  { %7164 = vmatpush3.xpose.msk.msra.mxu1 %vm500_vm3, %v4405_v4  ;;  %v4092_v18 = vmul.f32 %v7590_v27, %v7578_v59  ;;  %7143 = vmatprep.mubr.msk.f32.mxu1 %vm7732_vm2, %v7730_v51 }
0x17f7   :  { %7165 = vmatprep.subr.mxu1 %v7730_v51  ;;  %v4297_v43 = vpop.permute.xlu0 %4296 }
0x17f8   :  { %7129 = vmatmul.mubr.msk.f32.gmra.mxu0 %vm700_vm5, %v4092_v18 }
0x17f9   :  { %7152 = vmatprep.mubr.msk.f32.mxu0 %vm7732_vm2, %v7730_v51 }
0x17fa   :  { %7166 = vmatpush3.xpose.msk.msra.mxu1 %vm500_vm3, %v4403_v15 }
0x17fb   :  { %7191 = vmatprep.subr.mxu1 %v7730_v51  ;;  %v4399_v14 = vpop.permute.xlu0 %4398 }
0x17fc   :  { %7153 = vmatmul.mubr.msk.f32.vlgmr.msra.gmra.mxu0 %vm500_vm3, %v4293_v36 }
0x17fd   :  { %7155 = vmatprep.mubr.msk.f32.mxu0 %vm7732_vm2, %v7730_v51 }
0x1800   :  { %7156 = vmatmul.mubr.msk.f32.gmra.mxu0 %vm500_vm3, %v4295_v13 }
0x1801   :  { %7158 = vmatprep.mubr.msk.f32.mxu0 %vm7732_vm2, %v7730_v51 }
0x1804   :  { %7159 = vmatmul.mubr.msk.f32.gmra.mxu0 %vm500_vm3, %v4297_v43 }
0x1805   :  { %7182 = vmatprep.mubr.msk.f32.mxu0 %vm7732_vm2, %v7730_v51 }
0x1820   :  { %v4083_v31 = vpop.xlane.xlu1 %4082 }
0x1821   :  { %7591 = vrcp.f32 %v4083_v31 }
0x1824   :  { %v4397_v41 = vpop.permute.xlu1 %4396 }
0x1828   :  { %v4401_v26 = vpop.permute.xlu1 %4400 }
0x182e   :  { %v7592_v24 = vpop.eup %7591 }
0x182f   :  { %v4095_v20 = vmul.f32 %v7592_v24, %v9127_v50 }
0x1831   :  { %7144 = vmatmul.mubr.msk.f32.gmra.mxu1 %vm700_vm5, %v4095_v20 }
0x1832   :  { %7167 = vmatprep.mubr.msk.f32.mxu1 %vm7732_vm2, %v7730_v51 }
0x1835   :  { %7168 = vmatmul.mubr.msk.f32.vlgmr.msra.gmra.mxu1 %vm500_vm3, %v4397_v41 }
0x1836   :  { %7170 = vmatprep.mubr.msk.f32.mxu1 %vm7732_vm2, %v7730_v51 }
0x1839   :  { %7171 = vmatmul.mubr.msk.f32.gmra.mxu1 %vm500_vm3, %v4399_v14 }
0x183a   :  { %7173 = vmatprep.mubr.msk.f32.mxu1 %vm7732_vm2, %v7730_v51 }
0x183d   :  { %7174 = vmatmul.mubr.msk.f32.gmra.mxu1 %vm500_vm3, %v4401_v26 }
0x183e   :  { %7197 = vmatprep.mubr.msk.f32.mxu1 %vm7732_vm2, %v7730_v51 }
0x1877   :  { %v9186_v22 = vpop.f32.mrf.mxu0 }
0x1879   :  { %v7124_v0 = vpop.f32.mrf.mxu0 }
0x18b0   :  { %v9188_v12 = vpop.f32.mrf.mxu1 }
0x18b2   :  { %v7139_v33 = vpop.f32.mrf.mxu1 }
0x18b4   :  { %v9190_v59 = vpop.f32.mrf.mxu0 }
0x18b5   :  { %v9192_v44 = vpop.f32.mrf.mxu1 }
0x18b6   :  { %v7127_v34 = vpop.f32.mrf.mxu0 }
0x18b7   :  { %v7142_v37 = vpop.f32.mrf.mxu1 }
0x18b8   :  { %v9194_v50 = vpop.f32.mrf.mxu0 }
0x18ba   :  { %v7130_v60 = vpop.f32.mrf.mxu0 }
0x18bc   :  { %v4382_v49 = vpop.f32.mrf.mxu0 }
0x18bd   :  { %v4383_v39 = vadd.f32 %v4382_v49, %v8092_v11 }
0x18be   :  { %v7154_v52 = vpop.f32.mrf.mxu0 }
0x18bf   :  { %v4500_v57 = vsel %vm700_vm5, %v4383_v39, -inf }
0x18c0   :  { %4501 = vmax.xlane.f32.xlu0 %v4500_v57  ;;  %v4387_v62 = vpop.f32.mrf.mxu0 }
0x18c1   :  { %v4388_v40 = vadd.f32 %v4387_v62, %v8092_v11 }
0x18c2   :  { %v7157_v54 = vpop.f32.mrf.mxu0 }
0x18c3   :  { %v4503_v47 = vsel %vm700_vm5, %v4388_v40, -inf }
0x18c4   :  { %4504 = vmax.xlane.f32.xlu1 %v4503_v47  ;;  %v4392_v19 = vpop.f32.mrf.mxu0 }
0x18c5   :  { %v4393_v1 = vadd.f32 %v4392_v19, %v8092_v11 }
0x18c6   :  { %v7160_v48 = vpop.f32.mrf.mxu0 }
0x18c7   :  { %v4506_v6 = vsel %vm700_vm5, %v4393_v1, -inf }
0x18c8   :  { %4507 = vmax.xlane.f32.xlu0 %v4506_v6 }
0x18d5   :  { %4568 = vrot.lane.b32.xlu1 %v8853_v9, %s7740_s7 }
0x18d9   :  { %4566 = vrot.lane.b32.xlu1 %v8857_v35, %s7740_s7 }
0x18dd   :  { %4772 = vrot.lane.b32.xlu1 %v8863_v30, %s7741_s10 }
0x18e1   :  { %4770 = vrot.lane.b32.xlu1 %v8853_v9, %s7741_s10 }
0x18f1   :  { %v9210_v25 = vpop.f32.mrf.mxu1 }
0x18f3   :  { %v7145_v28 = vpop.f32.mrf.mxu1 }
0x18f5   :  { %v4486_v4 = vpop.f32.mrf.mxu1 }
0x18f6   :  { %v4487_v5 = vadd.f32 %v4486_v4, %v8092_v11 }
0x18f7   :  { %v7169_v27 = vpop.f32.mrf.mxu1 }
0x18f8   :  { %v4509_v18 = vsel %vm700_vm5, %v4487_v5, -inf }
0x18f9   :  { %4510 = vmax.xlane.f32.xlu0 %v4509_v18  ;;  %v4491_v36 = vpop.f32.mrf.mxu1 }
0x18fa   :  { %v4492_v15 = vadd.f32 %v4491_v36, %v8092_v11 }
0x18fb   :  { %v7172_v13 = vpop.f32.mrf.mxu1 }
0x18fc   :  { %v4512_v43 = vsel %vm700_vm5, %v4492_v15, -inf }
0x18fd   :  { %4513 = vmax.xlane.f32.xlu0 %v4512_v43  ;;  %v4496_v31 = vpop.f32.mrf.mxu1 }
0x18fe   :  { %v9217_v20 = vadd.f32 %v4496_v31, %v8092_v11 }
0x18ff   :  { %v7175_v24 = vpop.f32.mrf.mxu1 }
0x1900   :  { %v4515_v41 = vsel %vm700_vm5, %v9217_v20, -inf }
0x1905   :  { %4516 = vmax.xlane.f32.xlu1 %v4515_v41 }
0x1913   :  { %4570 = vrot.lane.b32.xlu0 %v8863_v30, %s7740_s7 }
0x1916   :  { %4664 = vrot.lane.b32.xlu1 %v8861_v21, %s7740_s7 }
0x1917   :  { %4668 = vrot.lane.b32.xlu0 %v8867_v45, %s7740_s7 }
0x191b   :  { %4666 = vrot.lane.b32.xlu0 %v8871_v23, %s7740_s7 }
0x1949   :  { %v4502_v14 = vpop.xlane.xlu0 %4501 }
0x194a   :  { %v4518_v26 = vsub.f32 %v4383_v39, %v4502_v14 }
0x194c   :  { %v4524_v0 = vmul.f32 1.442695, %v4518_v26 }
0x194d   :  { %v4505_v37 = vpop.xlane.xlu1 %4504 }
0x194e   :  { %7593 = vpow2.f32 %v4524_v0  ;;  %v4519_v57 = vsub.f32 %v4388_v40, %v4505_v37 }
0x1950   :  { %v4526_v19 = vmul.f32 1.442695, %v4519_v57 }
0x1951   :  { %v4569_v60 = vpop.permute.xlu1 %4568  ;;  %v4508_v49 = vpop.xlane.xlu0 %4507 }
0x1952   :  { %v4520_v48 = vsub.f32 %v4393_v1, %v4508_v49 }
0x1954   :  { %v4528_v4 = vmul.f32 1.442695, %v4520_v48 }
0x1955   :  { %v4567_v52 = vpop.permute.xlu1 %4566 }
0x1959   :  { %v4773_v47 = vpop.permute.xlu1 %4772 }
0x195b   :  { %v9229_v33 = vpop.eup %7593 }
0x195c   :  { %v4536_v34 = vsel %vm700_vm5, %v9229_v33, 0.0 }
0x195d   :  { %4537 = vadd.xlane.f32.xlu0 %v4536_v34  ;;  %v4771_v18 = vpop.permute.xlu1 %4770 }
0x1982   :  { %v4511_v62 = vpop.xlane.xlu0 %4510 }
0x1983   :  { %v4521_v54 = vsub.f32 %v4487_v5, %v4511_v62 }
0x1985   :  { %v4530_v6 = vmul.f32 1.442695, %v4521_v54 }
0x1986   :  { %v4514_v39 = vpop.xlane.xlu0 %4513 }
0x1987   :  { %7595 = vpow2.f32 %v4530_v6  ;;  %v4522_v28 = vsub.f32 %v4492_v15, %v4514_v39 }
0x1988   :  { %7597 = vpow2.f32 %v4526_v19 }
0x1989   :  { %v4532_v27 = vmul.f32 1.442695, %v4522_v28 }
0x198a   :  { %v4571_v36 = vpop.permute.xlu0 %4570 }
0x198b   :  { %7599 = vpow2.f32 %v4532_v27  ;;  %7177 = vmatpush3.msra.mxu0 %v4571_v36 }
0x198c   :  { %7178 = vmatprep.subr.mxu0 %v7730_v51  ;;  %7601 = vpow2.f32 %v4528_v4 }
0x198d   :  { %7179 = vmatpush3.msra.mxu0 %v4569_v60 }
0x198e   :  { %v4517_v40 = vpop.xlane.xlu1 %4516  ;;  %7180 = vmatprep.subr.mxu0 %v7730_v51  ;;  %v4669_v5 = vpop.permute.xlu0 %4668 }
0x198f   :  { %7181 = vmatpush3.msra.mxu0 %v4567_v52  ;;  %7192 = vmatpush3.msra.mxu1 %v4669_v5  ;;  %v4523_v34 = vsub.f32 %v9217_v20, %v4517_v40 }
0x1990   :  { %7193 = vmatprep.subr.mxu1 %v7730_v51  ;;  %7206 = vmatprep.subr.mxu0 %v7730_v51 }
0x1991   :  { %v4534_v37 = vmul.f32 1.442695, %v4523_v34 }
0x1992   :  { %v4667_v1 = vpop.permute.xlu0 %4666  ;;  %v4665_v13 = vpop.permute.xlu1 %4664 }
0x1993   :  { %7194 = vmatpush3.msra.mxu1 %v4667_v1  ;;  %7603 = vpow2.f32 %v4534_v37 }
0x1994   :  { %v7596_v15 = vpop.eup %7595  ;;  %7195 = vmatprep.subr.mxu1 %v7730_v51 }
0x1995   :  { %7196 = vmatpush3.msra.mxu1 %v4665_v13  ;;  %v4545_v43 = vsel %vm700_vm5, %v7596_v15, 0.0  ;;  %v7598_v31 = vpop.eup %7597 }
0x1996   :  { %4546 = vadd.xlane.f32.xlu1 %v4545_v43  ;;  %7221 = vmatprep.subr.mxu1 %v7730_v51  ;;  %v4539_v41 = vsel %vm700_vm5, %v7598_v31, 0.0 }
0x1998   :  { %v7600_v24 = vpop.eup %7599 }
0x1999   :  { %v4548_v14 = vsel %vm700_vm5, %v7600_v24, 0.0  ;;  %v7602_v26 = vpop.eup %7601 }
0x199a   :  { %4540 = vadd.xlane.f32.xlu1 %v4539_v41  ;;  %4549 = vadd.xlane.f32.xlu0 %v4548_v14  ;;  %v4542_v0 = vsel %vm700_vm5, %v7602_v26, 0.0 }
0x199e   :  { %4543 = vadd.xlane.f32.xlu0 %v4542_v0 }
0x19a0   :  { %v7604_v60 = vpop.eup %7603 }
0x19a1   :  { %v4551_v49 = vsel %vm700_vm5, %v7604_v60, 0.0 }
0x19ab   :  { %4876 = vrot.lane.b32.xlu1 %v8867_v45, %s7741_s10 }
0x19af   :  { %4874 = vrot.lane.b32.xlu1 %v8871_v23, %s7741_s10 }
0x19b3   :  { %4872 = vrot.lane.b32.xlu1 %v8861_v21, %s7741_s10 }
0x19b4   :  { %4768 = vrot.lane.b32.xlu0 %v8857_v35, %s7741_s10 }
0x19b8   :  { %4762 = vrot.lane.b32.xlu0 %v8885_v61, %s7742_s11 }
0x19bc   :  { %4764 = vrot.lane.b32.xlu0 %v8895_v55, %s7742_s11 }
0x19c0   :  { %4766 = vrot.lane.b32.xlu0 %v8906_v32, %s7742_s11 }
0x19d7   :  { %4552 = vadd.xlane.f32.xlu1 %v4551_v49 }
0x19e6   :  { %v4538_v52 = vpop.xlane.xlu0 %4537 }
0x19e7   :  { %7605 = vrcp.f32 %v4538_v52 }
0x19e8   :  { %4866 = vrot.lane.b32.xlu1 %v8903_v46, %s7742_s11 }
0x19f4   :  { %v7606_v61 = vpop.eup %7605 }
0x19f5   :  { %v4560_v57 = vmul.f32 %v7606_v61, %v9229_v33 }
0x19f7   :  { %7183 = vmatmul.mubr.msk.f32.vlgmr.msra.gmra.mxu0 %vm700_vm5, %v4560_v57 }
0x19f8   :  { %7207 = vmatpush3.xpose.msk.msra.mxu0 %vm500_vm3, %v4773_v47  ;;  %7185 = vmatprep.mubr.msk.f32.mxu0 %vm7732_vm2, %v7730_v51 }
0x19f9   :  { %7208 = vmatprep.subr.mxu0 %v7730_v51 }
0x19fc   :  { %7209 = vmatpush3.xpose.msk.msra.mxu0 %vm500_vm3, %v4771_v18 }
0x19fd   :  { %7210 = vmatprep.subr.mxu0 %v7730_v51 }
0x1a1f   :  { %v4547_v55 = vpop.xlane.xlu1 %4546 }
0x1a20   :  { %7607 = vrcp.f32 %v4547_v55 }
0x1a23   :  { %v4541_v32 = vpop.xlane.xlu1 %4540  ;;  %v4550_v46 = vpop.xlane.xlu0 %4549 }
0x1a24   :  { %7609 = vrcp.f32 %v4541_v32 }
0x1a25   :  { %7611 = vrcp.f32 %v4550_v46 }
0x1a27   :  { %v4544_v20 = vpop.xlane.xlu0 %4543  ;;  %v4877_v54 = vpop.permute.xlu1 %4876 }
0x1a28   :  { %7613 = vrcp.f32 %v4544_v20 }
0x1a2b   :  { %v4769_v33 = vpop.permute.xlu0 %4768  ;;  %v4875_v39 = vpop.permute.xlu1 %4874 }
0x1a2c   :  { %7211 = vmatpush3.xpose.msk.msra.mxu0 %vm500_vm3, %v4769_v33 }
0x1a2d   :  { %v7608_v62 = vpop.eup %7607  ;;  %7236 = vmatprep.subr.mxu0 %v7730_v51 }
0x1a2e   :  { %v4563_v47 = vmul.f32 %v7608_v62, %v7596_v15 }
0x1a2f   :  { %v4763_v18 = vpop.permute.xlu0 %4762  ;;  %v4873_v36 = vpop.permute.xlu1 %4872 }
0x1a30   :  { %7198 = vmatmul.mubr.msk.f32.vlgmr.msra.gmra.mxu1 %vm700_vm5, %v4563_v47 }
0x1a31   :  { %v7610_v19 = vpop.eup %7609  ;;  %7222 = vmatpush3.xpose.msk.msra.mxu1 %vm500_vm3, %v4877_v54  ;;  %7200 = vmatprep.mubr.msk.f32.mxu1 %vm7732_vm2, %v7730_v51 }
0x1a32   :  { %v7612_v48 = vpop.eup %7611  ;;  %7223 = vmatprep.subr.mxu1 %v7730_v51  ;;  %v4561_v6 = vmul.f32 %v7610_v19, %v7598_v31 }
0x1a33   :  { %v4564_v28 = vmul.f32 %v7612_v48, %v7600_v24  ;;  %v4765_v40 = vpop.permute.xlu0 %4764 }
0x1a34   :  { %7186 = vmatmul.mubr.msk.f32.gmra.mxu0 %vm700_vm5, %v4561_v6 }
0x1a35   :  { %v7614_v4 = vpop.eup %7613  ;;  %7201 = vmatmul.mubr.msk.f32.gmra.mxu1 %vm700_vm5, %v4564_v28  ;;  %7188 = vmatprep.mubr.msk.f32.mxu0 %vm7732_vm2, %v7730_v51 }
0x1a36   :  { %7224 = vmatpush3.xpose.msk.msra.mxu1 %vm500_vm3, %v4875_v39  ;;  %v4562_v27 = vmul.f32 %v7614_v4, %v7602_v26  ;;  %7203 = vmatprep.mubr.msk.f32.mxu1 %vm7732_vm2, %v7730_v51 }
0x1a37   :  { %7225 = vmatprep.subr.mxu1 %v7730_v51  ;;  %v4767_v5 = vpop.permute.xlu0 %4766 }
0x1a38   :  { %7189 = vmatmul.mubr.msk.f32.gmra.mxu0 %vm700_vm5, %v4562_v27 }
0x1a39   :  { %7212 = vmatprep.mubr.msk.f32.mxu0 %vm7732_vm2, %v7730_v51 }
0x1a3a   :  { %7226 = vmatpush3.xpose.msk.msra.mxu1 %vm500_vm3, %v4873_v36 }
0x1a3b   :  { %7251 = vmatprep.subr.mxu1 %v7730_v51 }
0x1a3c   :  { %7213 = vmatmul.mubr.msk.f32.vlgmr.msra.gmra.mxu0 %vm500_vm3, %v4763_v18 }
0x1a3d   :  { %7215 = vmatprep.mubr.msk.f32.mxu0 %vm7732_vm2, %v7730_v51 }
0x1a40   :  { %7216 = vmatmul.mubr.msk.f32.gmra.mxu0 %vm500_vm3, %v4765_v40 }
0x1a41   :  { %7218 = vmatprep.mubr.msk.f32.mxu0 %vm7732_vm2, %v7730_v51 }
0x1a44   :  { %7219 = vmatmul.mubr.msk.f32.gmra.mxu0 %vm500_vm3, %v4767_v5 }
0x1a45   :  { %7242 = vmatprep.mubr.msk.f32.mxu0 %vm7732_vm2, %v7730_v51 }
0x1a60   :  { %v4553_v1 = vpop.xlane.xlu1 %4552 }
0x1a61   :  { %7615 = vrcp.f32 %v4553_v1 }
0x1a64   :  { %v4867_v43 = vpop.permute.xlu1 %4866 }
0x1a6e   :  { %v7616_v15 = vpop.eup %7615 }
0x1a6f   :  { %v4565_v13 = vmul.f32 %v7616_v15, %v7604_v60 }
0x1a71   :  { %7204 = vmatmul.mubr.msk.f32.gmra.mxu1 %vm700_vm5, %v4565_v13 }
0x1a72   :  { %7227 = vmatprep.mubr.msk.f32.mxu1 %vm7732_vm2, %v7730_v51 }
0x1a75   :  { %7228 = vmatmul.mubr.msk.f32.vlgmr.msra.gmra.mxu1 %vm500_vm3, %v4867_v43 }
0x1a76   :  { %7230 = vmatprep.mubr.msk.f32.mxu1 %vm7732_vm2, %v7730_v51 }
0x1ab7   :  { %v9304_v31 = vpop.f32.mrf.mxu0 }
0x1ab9   :  { %v7184_v24 = vpop.f32.mrf.mxu0 }
0x1af0   :  { %v9306_v41 = vpop.f32.mrf.mxu1 }
0x1af2   :  { %v7199_v14 = vpop.f32.mrf.mxu1 }
0x1af4   :  { %v9308_v26 = vpop.f32.mrf.mxu0 }
0x1af5   :  { %v9310_v0 = vpop.f32.mrf.mxu1 }
0x1af6   :  { %v7187_v34 = vpop.f32.mrf.mxu0 }
0x1af7   :  { %v7202_v37 = vpop.f32.mrf.mxu1 }
0x1af8   :  { %v9312_v60 = vpop.f32.mrf.mxu0 }
0x1afa   :  { %v7190_v49 = vpop.f32.mrf.mxu0 }
0x1afc   :  { %v4852_v52 = vpop.f32.mrf.mxu0 }
0x1afd   :  { %v4853_v61 = vadd.f32 %v4852_v52, %v8092_v11 }
0x1afe   :  { %v7214_v57 = vpop.f32.mrf.mxu0 }
0x1aff   :  { %v4970_v55 = vsel %vm700_vm5, %v4853_v61, -inf }
0x1b00   :  { %4971 = vmax.xlane.f32.xlu0 %v4970_v55  ;;  %v4857_v32 = vpop.f32.mrf.mxu0 }
0x1b01   :  { %v4858_v46 = vadd.f32 %v4857_v32, %v8092_v11 }
0x1b02   :  { %v7217_v20 = vpop.f32.mrf.mxu0 }
0x1b03   :  { %v4973_v33 = vsel %vm700_vm5, %v4858_v46, -inf }
0x1b04   :  { %4974 = vmax.xlane.f32.xlu1 %v4973_v33  ;;  %v4862_v62 = vpop.f32.mrf.mxu0 }
0x1b05   :  { %v4863_v54 = vadd.f32 %v4862_v62, %v8092_v11 }
0x1b06   :  { %v7220_v47 = vpop.f32.mrf.mxu0 }
0x1b07   :  { %v4976_v19 = vsel %vm700_vm5, %v4863_v54, -inf }
0x1b08   :  { %4977 = vmax.xlane.f32.xlu0 %v4976_v19 }
0x1b15   :  { %5038 = vrot.lane.b32.xlu1 %v8853_v9, %s7743_s15 }
0x1b19   :  { %5036 = vrot.lane.b32.xlu1 %v8857_v35, %s7743_s15 }
0x1b1d   :  { %4868 = vrot.lane.b32.xlu1 %v8918_v42, %s7742_s11 }
0x1b21   :  { %4870 = vrot.lane.b32.xlu1 %v8925_v58, %s7742_s11 }
0x1b31   :  { %v9328_v48 = vpop.f32.mrf.mxu1 }
0x1b33   :  { %v7205_v6 = vpop.f32.mrf.mxu1 }
0x1b35   :  { %v4956_v39 = vpop.f32.mrf.mxu1 }
0x1b36   :  { %v4957_v28 = vadd.f32 %v4956_v39, %v8092_v11 }
0x1b37   :  { %v7229_v4 = vpop.f32.mrf.mxu1 }
0x1b38   :  { %v4979_v27 = vsel %vm700_vm5, %v4957_v28, -inf  ;;  %v5325_v4 = vld [vmem:[%s9623_s14 + $0x18] sm:$0xff] }
0x1b39   :  { %4980 = vmax.xlane.f32.xlu0 %v4979_v27  ;;  %v5324_v27 = vld [vmem:[%s9623_s14 + $0x10] sm:$0xff] }
0x1b4f   :  { %5040 = vrot.lane.b32.xlu0 %v8863_v30, %s7743_s15 }
0x1b53   :  { %5138 = vrot.lane.b32.xlu0 %v8867_v45, %s7743_s15 }
0x1b89   :  { %v4972_v9 = vpop.xlane.xlu0 %4971 }
0x1b8a   :  { %v4988_v35 = vsub.f32 %v4853_v61, %v4972_v9  ;;  %v5323_v9 = vld [vmem:[%s9623_s14 + $0x8] sm:$0xff] }
0x1b8c   :  { %v4994_v42 = vmul.f32 1.442695, %v4988_v35  ;;  %v5322_v35 = vld [vmem:[%s9623_s14] sm:$0xff] }
0x1b8d   :  { %v4975_v58 = vpop.xlane.xlu1 %4974 }
0x1b8e   :  { %7617 = vpow2.f32 %v4994_v42  ;;  %v4989_v14 = vsub.f32 %v4858_v46, %v4975_v58 }
0x1b90   :  { %v4996_v49 = vmul.f32 1.442695, %v4989_v14 }
0x1b91   :  { %v5039_v18 = vpop.permute.xlu1 %5038  ;;  %v4978_v36 = vpop.xlane.xlu0 %4977 }
0x1b92   :  { %v4990_v40 = vsub.f32 %v4863_v54, %v4978_v36 }
0x1b94   :  { %v4998_v5 = vmul.f32 1.442695, %v4990_v40 }
0x1b95   :  { %v5037_v1 = vpop.permute.xlu1 %5036 }
0x1b96   :  { %7619 = vpow2.f32 %v4998_v5 }
0x1b99   :  { %v4869_v15 = vpop.permute.xlu1 %4868 }
0x1b9a   :  { %7231 = vmatmul.mubr.msk.f32.gmra.mxu1 %vm500_vm3, %v4869_v15 }
0x1b9b   :  { %v7618_v13 = vpop.eup %7617  ;;  %7233 = vmatprep.mubr.msk.f32.mxu1 %vm7732_vm2, %v7730_v51 }
0x1b9c   :  { %v5006_v30 = vsel %vm700_vm5, %v7618_v13, 0.0 }
0x1b9d   :  { %v4871_v45 = vpop.permute.xlu1 %4870  ;;  %5007 = vadd.xlane.f32.xlu0 %v5006_v30 }
0x1b9e   :  { %7234 = vmatmul.mubr.msk.f32.gmra.mxu1 %vm500_vm3, %v4871_v45 }
0x1b9f   :  { %7257 = vmatprep.mubr.msk.f32.mxu1 %vm7732_vm2, %v7730_v51 }
0x1ba3   :  { %v9343_v43 = vpop.eup %7619 }
0x1ba4   :  { %v5012_v24 = vsel %vm700_vm5, %v9343_v43, 0.0 }
0x1ba5   :  { %5013 = vadd.xlane.f32.xlu0 %v5012_v24 }
0x1bbb   :  { %5136 = vrot.lane.b32.xlu0 %v8871_v23, %s7743_s15 }
0x1bbf   :  { %5238 = vrot.lane.b32.xlu0 %v9186_v22, %s7744_s16 }
0x1bc2   :  { %v4981_v34 = vpop.xlane.xlu0 %4980 }
0x1bc3   :  { %v4991_v37 = vsub.f32 %v4957_v28, %v4981_v34  ;;  %5262 = vrot.lane.b32.xlu0 %v9304_v31, %s7745_s18 }
0x1bc5   :  { %v5000_v52 = vmul.f32 1.442695, %v4991_v37 }
0x1bc6   :  { %v5041_v61 = vpop.permute.xlu0 %5040 }
0x1bc7   :  { %7621 = vpow2.f32 %v5000_v52  ;;  %5242 = vrot.lane.b32.xlu0 %v9194_v50, %s7744_s16  ;;  %7237 = vmatpush3.msra.mxu0 %v5041_v61 }
0x1bc8   :  { %7238 = vmatprep.subr.mxu0 %v7730_v51  ;;  %7623 = vpow2.f32 %v4996_v49 }
0x1bc9   :  { %7239 = vmatpush3.msra.mxu0 %v5039_v18 }
0x1bca   :  { %7240 = vmatprep.subr.mxu0 %v7730_v51  ;;  %v5139_v23 = vpop.permute.xlu0 %5138 }
0x1bcb   :  { %5266 = vrot.lane.b32.xlu0 %v9312_v60, %s7745_s18  ;;  %7241 = vmatpush3.msra.mxu0 %v5037_v1 }
0x1bcc   :  { %7252 = vmatpush3.msra.mxu1 %v5139_v23  ;;  %7266 = vmatprep.subr.mxu0 %v5325_v4 }
0x1bcd   :  { %7253 = vmatprep.subr.mxu1 %v7730_v51 }
0x1bd4   :  { %v7622_v22 = vpop.eup %7621 }
0x1bd5   :  { %v5015_v31 = vsel %vm700_vm5, %v7622_v22, 0.0  ;;  %v7624_v57 = vpop.eup %7623 }
0x1bd6   :  { %5016 = vadd.xlane.f32.xlu1 %v5015_v31  ;;  %v5009_v50 = vsel %vm700_vm5, %v7624_v57, 0.0 }
0x1bda   :  { %5010 = vadd.xlane.f32.xlu1 %v5009_v50 }
0x1beb   :  { %5134 = vrot.lane.b32.xlu1 %v8861_v21, %s7743_s15 }
0x1bef   :  { %5240 = vrot.lane.b32.xlu1 %v9190_v59, %s7744_s16 }
0x1bf3   :  { %5264 = vrot.lane.b32.xlu1 %v9308_v26, %s7745_s18 }
0x1bf7   :  { %5244 = vrot.lane.b32.xlu1 %v9188_v12, %s7744_s16 }
0x1bfb   :  { %5268 = vrot.lane.b32.xlu1 %v9306_v41, %s7745_s18 }
0x1c26   :  { %v5008_v60 = vpop.xlane.xlu0 %5007 }
0x1c27   :  { %7625 = vrcp.f32 %v5008_v60 }
0x1c2e   :  { %v5014_v55 = vpop.xlane.xlu0 %5013 }
0x1c32   :  { %v5137_v32 = vpop.permute.xlu0 %5136 }
0x1c33   :  { %7254 = vmatpush3.msra.mxu1 %v5137_v32 }
0x1c34   :  { %v7626_v46 = vpop.eup %7625  ;;  %7255 = vmatprep.subr.mxu1 %v7730_v51 }
0x1c35   :  { %v5030_v21 = vmul.f32 %v7626_v46, %v7618_v13 }
0x1c36   :  { %v5239_v30 = vpop.permute.xlu0 %5238 }
0x1c37   :  { %7243 = vmatmul.mubr.msk.f32.vlgmr.msra.gmra.mxu0 %vm700_vm5, %v5030_v21  ;;  %v5304_v49 = vsel %vm500_vm3, %v9051_v63, %v5239_v30 }
0x1c38   :  { %7245 = vmatprep.mubr.msk.f32.mxu0 %vm7732_vm2, %v7730_v51  ;;  %7267 = vmatpush3.msra.mxu0 %v5325_v4  ;;  %v9419_v4 = vld [vmem:[%s9624_s19] ss:$0 sm:$0xff] }
0x1c39   :  { %7268 = vmatprep.subr.mxu0 %v5324_v27 }
0x1c3a   :  { %7269 = vmatpush3.msra.mxu0 %v5324_v27  ;;  %v5263_v24 = vpop.permute.xlu0 %5262 }
0x1c3b   :  { %7270 = vmatprep.subr.mxu0 %v5323_v9  ;;  %v5310_v52 = vsel %vm2451_vm6, %v5304_v49, %v5263_v24 }
0x1c3c   :  { %7271 = vmatpush3.msra.mxu0 %v5323_v9 }
0x1c3d   :  { %7272 = vmatprep.subr.mxu0 %v5322_v35 }
0x1c3e   :  { %7273 = vmatpush3.msra.mxu0 %v5322_v35  ;;  %v5243_v34 = vpop.permute.xlu0 %5242 }
0x1c3f   :  { %v5306_v63 = vsel %vm500_vm3, %v9059_v17, %v5243_v34 }
0x1c42   :  { %v5267_v37 = vpop.permute.xlu0 %5266 }
0x1c43   :  { %v5312_v21 = vsel %vm2451_vm6, %v5306_v63, %v5267_v37 }
0x1c5a   :  { %v4961_v59 = vpop.f32.mrf.mxu1 }
0x1c5b   :  { %v4962_v13 = vadd.f32 %v4961_v59, %v8092_v11 }
0x1c5c   :  { %v7232_v26 = vpop.f32.mrf.mxu1 }
0x1c5d   :  { %v4982_v45 = vsel %vm700_vm5, %v4962_v13, -inf }
0x1c5e   :  { %v4966_v12 = vpop.f32.mrf.mxu1 }
0x1c5f   :  { %v5017_v20 = vpop.xlane.xlu1 %5016 }
0x1c60   :  { %7627 = vrcp.f32 %v5017_v20  ;;  %v7235_v41 = vpop.f32.mrf.mxu1 }
0x1c63   :  { %v5011_v33 = vpop.xlane.xlu1 %5010 }
0x1c64   :  { %7629 = vrcp.f32 %v5011_v33 }
0x1c65   :  { %7631 = vrcp.f32 %v5014_v55 }
0x1c67   :  { %v5135_v62 = vpop.permute.xlu1 %5134 }
0x1c68   :  { %7256 = vmatpush3.msra.mxu1 %v5135_v62 }
0x1c6d   :  { %v7628_v54 = vpop.eup %7627 }
0x1c6e   :  { %v5033_v47 = vmul.f32 %v7628_v54, %v7622_v22  ;;  %v5241_v22 = vpop.permute.xlu1 %5240 }
0x1c6f   :  { %v5305_v50 = vsel %vm500_vm3, %v9055_v7, %v5241_v22 }
0x1c70   :  { %7258 = vmatmul.mubr.msk.f32.vlgmr.msra.gmra.mxu1 %vm700_vm5, %v5033_v47 }
0x1c71   :  { %v7630_v19 = vpop.eup %7629  ;;  %7260 = vmatprep.mubr.msk.f32.mxu1 %vm7732_vm2, %v7730_v51 }
0x1c72   :  { %v5031_v6 = vmul.f32 %v7630_v19, %v7624_v57  ;;  %v7632_v39 = vpop.eup %7631  ;;  %v5265_v31 = vpop.permute.xlu1 %5264 }
0x1c73   :  { %v5032_v28 = vmul.f32 %v7632_v39, %v9343_v43  ;;  %v4967_v43 = vadd.f32 %v4966_v12, %v8092_v11  ;;  %v5311_v60 = vsel %vm2451_vm6, %v5305_v50, %v5265_v31 }
0x1c74   :  { %7246 = vmatmul.mubr.msk.f32.gmra.mxu0 %vm700_vm5, %v5031_v6 }
0x1c75   :  { %7248 = vmatprep.mubr.msk.f32.mxu0 %vm7732_vm2, %v7730_v51  ;;  %v4985_v14 = vsel %vm700_vm5, %v4967_v43, -inf }
0x1c76   :  { %v5245_v11 = vpop.permute.xlu1 %5244 }
0x1c77   :  { %v5307_v46 = vsel %vm500_vm3, %v9053_v16, %v5245_v11 }
0x1c78   :  { %7249 = vmatmul.mubr.msk.f32.gmra.mxu0 %vm700_vm5, %v5032_v28 }
0x1c7a   :  { %v5269_v57 = vpop.permute.xlu1 %5268 }
0x1c7b   :  { %v5313_v59 = vsel %vm2451_vm6, %v5307_v46, %v5269_v57 }
0x1cf7   :  { %v5120_v42 = vpop.f32.mrf.mxu0 }
0x1cf8   :  { %5286 = vrot.lane.b32.xlu0 %v5120_v42, %s7746_s22 }
0x1cf9   :  { %v7244_v58 = vpop.f32.mrf.mxu0 }
0x1d30   :  { %v5218_v18 = vpop.f32.mrf.mxu1 }
0x1d32   :  { %v7259_v36 = vpop.f32.mrf.mxu1 }
0x1d34   :  { %v5125_v40 = vpop.f32.mrf.mxu0 }
0x1d35   :  { %5288 = vrot.lane.b32.xlu1 %v5125_v40, %s7746_s22 }
0x1d36   :  { %v7247_v5 = vpop.f32.mrf.mxu0 }
0x1d38   :  { %v5130_v1 = vpop.f32.mrf.mxu0 }
0x1d39   :  { %5290 = vrot.lane.b32.xlu0 %v5130_v1, %s7746_s22  ;;  %5292 = vrot.lane.b32.xlu1 %v5218_v18, %s7746_s22 }
0x1d3a   :  { %v7250_v15 = vpop.f32.mrf.mxu0 }
0x1d58   :  { %4983 = vmax.xlane.f32.xlu0 %v4982_v45 }
0x1d5d   :  { %4986 = vmax.xlane.f32.xlu1 %v4985_v14 }
0x1d6a   :  { %v5287_v61 = vpop.permute.xlu0 %5286 }
0x1d6b   :  { %v5316_v23 = vsel %vm700_vm5, %v5310_v52, %v5287_v61 }
0x1d6c   :  { %7274 = vmatprep.mubr.msk.f32.mxu0 %vm264_vm1, %v5316_v23 }
0x1da7   :  { %v5289_v55 = vpop.permute.xlu1 %5288 }
0x1da8   :  { %v5317_v32 = vsel %vm700_vm5, %v5311_v60, %v5289_v55 }
0x1da9   :  { %7275 = vmatmul.mubr.msk.f32.vlgmr.msra.gmra.mxu0 %vm264_vm1, %v5317_v32 }
0x1dab   :  { %v5293_v26 = vpop.permute.xlu1 %5292  ;;  %v5291_v12 = vpop.permute.xlu0 %5290 }
0x1dac   :  { %v5319_v7 = vsel %vm700_vm5, %v5313_v59, %v5293_v26  ;;  %v5318_v20 = vsel %vm700_vm5, %v5312_v21, %v5291_v12 }
0x1dad   :  { %7277 = vmatprep.mubr.msk.f32.mxu0 %vm264_vm1, %v5318_v20  ;;  %v5564_v20 = vld [vmem:[%s9625_s24 + $0x10] sm:$0xff] }
0x1dae   :  { %7278 = vmatmul.mubr.msk.f32.gmra.mxu0 %vm264_vm1, %v5319_v7  ;;  %v5565_v7 = vld [vmem:[%s9625_s24 + $0x18] sm:$0xff] }
0x1daf   :  { %7283 = vmatprep.subr.mxu1 %v5565_v7 }
0x1db0   :  { %7284 = vmatpush3.msra.mxu1 %v5565_v7  ;;  %v9501_v7 = vld [vmem:[%s9629_s26] ss:$0 sm:$0xff] }
0x1db1   :  { %7285 = vmatprep.subr.mxu1 %v5564_v20 }
0x1db2   :  { %7286 = vmatpush3.msra.mxu1 %v5564_v20 }
0x1de1   :  { %v4984_v41 = vpop.xlane.xlu0 %4983 }
0x1de2   :  { %v4992_v17 = vsub.f32 %v4962_v13, %v4984_v41  ;;  %v5563_v41 = vld [vmem:[%s9625_s24 + $0x8] sm:$0xff] }
0x1de3   :  { %7287 = vmatprep.subr.mxu1 %v5563_v41 }
0x1de4   :  { %v5002_v33 = vmul.f32 1.442695, %v4992_v17  ;;  %v5562_v17 = vld [vmem:[%s9625_s24] sm:$0xff]  ;;  %7288 = vmatpush3.msra.mxu1 %v5563_v41 }
0x1de5   :  { %7289 = vmatprep.subr.mxu1 %v5562_v17 }
0x1de6   :  { %7633 = vpow2.f32 %v5002_v33  ;;  %v4987_v16 = vpop.xlane.xlu1 %4986  ;;  %7290 = vmatpush3.msra.mxu1 %v5562_v17 }
0x1de7   :  { %v4993_v62 = vsub.f32 %v4967_v43, %v4987_v16  ;;  %7325 = vmatprep.subr.mxu1 %v7730_v51 }
0x1de9   :  { %v5004_v54 = vmul.f32 1.442695, %v4993_v62 }
0x1deb   :  { %7635 = vpow2.f32 %v5004_v54 }
0x1df3   :  { %v7634_v47 = vpop.eup %7633 }
0x1df4   :  { %v5018_v19 = vsel %vm700_vm5, %v7634_v47, 0.0 }
0x1df5   :  { %5019 = vadd.xlane.f32.xlu0 %v5018_v19 }
0x1df8   :  { %v7636_v6 = vpop.eup %7635 }
0x1df9   :  { %v5021_v39 = vsel %vm700_vm5, %v7636_v6, 0.0 }
0x1dfa   :  { %5022 = vadd.xlane.f32.xlu0 %v5021_v39 }
0x1e69   :  { %v7276_v28 = vpop.f32.mrf.mxu0 }
0x1e6a   :  { %v5440_v27 = vadd.f32 %v7276_v28, %v8777_v8 }
0x1e6b   :  { %v5410_v9 = vpop.f32.mrf.mxu0 }
0x1e6c   :  { %v5453_v35 = vadd.f32 %v9419_v4, %v5440_v27  ;;  %v5439_v42 = vadd.f32 %v5410_v9, %v8780_v53 }
0x1e6e   :  { %v9425_v58 = vadd.f32 %v9419_v4, %v5439_v42  ;;  %v7279_v18 = vpop.f32.mrf.mxu0  ;;  %v5463_v36 = vsel %vm264_vm1, %v5453_v35, 0.0 }
0x1e6f   :  { %v5442_v40 = vadd.f32 %v7279_v18, %v8787_v10  ;;  %5464 = vadd.xlane.f32.xlu1 %v5463_v36  ;;  %v9465_v18 = vld [vmem:[%s9626_s30] ss:$0 sm:$0xff] }
0x1e70   :  { %v5420_v5 = vpop.f32.mrf.mxu0  ;;  %v5460_v1 = vsel %vm264_vm1, %v9425_v58, 0.0 }
0x1e71   :  { %v9432_v8 = vadd.f32 %v9419_v4, %v5442_v40  ;;  %v5441_v15 = vadd.f32 %v5420_v5, %v8790_v3  ;;  %5461 = vadd.xlane.f32.xlu0 %v5460_v1 }
0x1e73   :  { %v5454_v53 = vadd.f32 %v9419_v4, %v5441_v15  ;;  %v5469_v13 = vsel %vm264_vm1, %v9432_v8, 0.0 }
0x1e74   :  { %5470 = vadd.xlane.f32.xlu1 %v5469_v13 }
0x1e75   :  { %v5466_v30 = vsel %vm264_vm1, %v5454_v53, 0.0 }
0x1e76   :  { %5467 = vadd.xlane.f32.xlu0 %v5466_v30 }
0x1e7e   :  { %v5020_v10 = vpop.xlane.xlu0 %5019 }
0x1e7f   :  { %7637 = vrcp.f32 %v5020_v10 }
0x1e83   :  { %v5023_v45 = vpop.xlane.xlu0 %5022 }
0x1e84   :  { %7639 = vrcp.f32 %v5023_v45 }
0x1e8c   :  { %v7638_v43 = vpop.eup %7637 }
0x1e8d   :  { %v5034_v24 = vmul.f32 %v7638_v43, %v7634_v47 }
0x1e8f   :  { %7261 = vmatmul.mubr.msk.f32.gmra.mxu1 %vm700_vm5, %v5034_v24 }
0x1e90   :  { %7263 = vmatprep.mubr.msk.f32.mxu1 %vm7732_vm2, %v7730_v51 }
0x1e91   :  { %v7640_v3 = vpop.eup %7639 }
0x1e92   :  { %v5035_v14 = vmul.f32 %v7640_v3, %v7636_v6 }
0x1e94   :  { %7264 = vmatmul.mubr.msk.f32.gmra.mxu1 %vm700_vm5, %v5035_v14 }
0x1ef8   :  { %v5465_v34 = vpop.xlane.xlu1 %5464 }
0x1ef9   :  { %v5479_v37 = vmul.f32 0.03125, %v5465_v34 }
0x1efa   :  { %v5462_v49 = vpop.xlane.xlu0 %5461 }
0x1efb   :  { %v5485_v52 = vsub.f32 %v5453_v35, %v5479_v37  ;;  %v5478_v61 = vmul.f32 0.03125, %v5462_v49 }
0x1efd   :  { %v5484_v23 = vsub.f32 %v9425_v58, %v5478_v61  ;;  %v5471_v22 = vpop.xlane.xlu1 %5470  ;;  %v5491_v31 = vmul.f32 %v5485_v52, %v5485_v52 }
0x1efe   :  { %v5481_v11 = vmul.f32 0.03125, %v5471_v22 }
0x1eff   :  { %v5468_v57 = vpop.xlane.xlu0 %5467  ;;  %v5499_v50 = vsel %vm264_vm1, %v5491_v31, 0.0  ;;  %v5490_v60 = vmul.f32 %v5484_v23, %v5484_v23 }
0x1f00   :  { %v5487_v55 = vsub.f32 %v9432_v8, %v5481_v11  ;;  %v5480_v32 = vmul.f32 0.03125, %v5468_v57  ;;  %5500 = vadd.xlane.f32.xlu1 %v5499_v50 }
0x1f01   :  { %v5496_v63 = vsel %vm264_vm1, %v5490_v60, 0.0 }
0x1f02   :  { %v5486_v46 = vsub.f32 %v5454_v53, %v5480_v32  ;;  %5497 = vadd.xlane.f32.xlu0 %v5496_v63  ;;  %v5493_v21 = vmul.f32 %v5487_v55, %v5487_v55  ;;  %v9469_v53 = vld [vmem:[%s9627_s6] ss:$0 sm:$0xff]  ;;  %v5854_v63 = vld [vmem:[%s9628_s23 + $0x30] sm:$0xff] }
0x1f04   :  { %v5505_v59 = vsel %vm264_vm1, %v5493_v21, 0.0  ;;  %v5492_v26 = vmul.f32 %v5486_v46, %v5486_v46  ;;  %v5851_v21 = vld [vmem:[%s9628_s23 + $0x18] sm:$0xff] }
0x1f05   :  { %5506 = vadd.xlane.f32.xlu1 %v5505_v59  ;;  %v5850_v59 = vld [vmem:[%s9628_s23 + $0x10] sm:$0xff] }
0x1f06   :  { %v5502_v12 = vsel %vm264_vm1, %v5492_v26, 0.0  ;;  %v5849_v26 = vld [vmem:[%s9628_s23 + $0x8] sm:$0xff] }
0x1f07   :  { %5503 = vadd.xlane.f32.xlu0 %v5502_v12  ;;  %v5848_v12 = vld [vmem:[%s9628_s23] sm:$0xff] }
0x1f16   :  { %5248 = vrot.lane.b32.xlu1 %v9210_v25, %s7744_s16 }
0x1f1a   :  { %5270 = vrot.lane.b32.xlu1 %v9310_v0, %s7745_s18 }
0x1f1d   :  { %5246 = vrot.lane.b32.xlu0 %v9192_v44, %s7744_s16 }
0x1f1e   :  { %5272 = vrot.lane.b32.xlu1 %v9328_v48, %s7745_s18 }
0x1f4f   :  { %v5223_v25 = vpop.f32.mrf.mxu1 }
0x1f50   :  { %5294 = vrot.lane.b32.xlu0 %v5223_v25, %s7746_s22 }
0x1f51   :  { %v7262_v44 = vpop.f32.mrf.mxu1 }
0x1f54   :  { %v5228_v0 = vpop.f32.mrf.mxu1 }
0x1f55   :  { %5296 = vrot.lane.b32.xlu1 %v5228_v0, %s7746_s22 }
0x1f56   :  { %v7265_v48 = vpop.f32.mrf.mxu1 }
0x1f89   :  { %v5501_v33 = vpop.xlane.xlu1 %5500 }
0x1f8a   :  { %v5515_v16 = vmul.f32 0.03125, %v5501_v33 }
0x1f8b   :  { %v5498_v62 = vpop.xlane.xlu0 %5497 }
0x1f8c   :  { %v5521_v54 = vadd.f32 1e-05, %v5515_v16  ;;  %v5514_v47 = vmul.f32 0.03125, %v5498_v62 }
0x1f8e   :  { %7641 = vrsqrt.f32 %v5521_v54  ;;  %v5520_v19 = vadd.f32 1e-05, %v5514_v47  ;;  %v5507_v6 = vpop.xlane.xlu1 %5506 }
0x1f8f   :  { %v5517_v39 = vmul.f32 0.03125, %v5507_v6 }
0x1f90   :  { %7643 = vrsqrt.f32 %v5520_v19  ;;  %v5504_v28 = vpop.xlane.xlu0 %5503 }
0x1f91   :  { %v5523_v27 = vadd.f32 1e-05, %v5517_v39  ;;  %v5516_v9 = vmul.f32 0.03125, %v5504_v28 }
0x1f92   :  { %v5249_v49 = vpop.permute.xlu1 %5248 }
0x1f93   :  { %7645 = vrsqrt.f32 %v5523_v27  ;;  %v5522_v35 = vadd.f32 1e-05, %v5516_v9  ;;  %v5309_v50 = vsel %vm500_vm3, %v9075_v56, %v5249_v49  ;;  %v5852_v56 = vld [vmem:[%s9628_s23 + $0x20] sm:$0xff] }
0x1f95   :  { %7647 = vrsqrt.f32 %v5522_v35 }
0x1f96   :  { %v5271_v61 = vpop.permute.xlu1 %5270 }
0x1f9a   :  { %v5273_v11 = vpop.permute.xlu1 %5272 }
0x1f9b   :  { %v7642_v42 = vpop.eup %7641  ;;  %v5315_v60 = vsel %vm2451_vm6, %v5309_v50, %v5273_v11 }
0x1f9c   :  { %v5533_v36 = vmul.f32 %v7642_v42, %v5485_v52  ;;  %v5247_v52 = vpop.permute.xlu0 %5246 }
0x1f9d   :  { %v7644_v40 = vpop.eup %7643 }
0x1f9e   :  { %v5532_v5 = vmul.f32 %v7644_v40, %v5484_v23  ;;  %v5545_v1 = vmul.f32 %v9465_v18, %v5533_v36  ;;  %v5308_v23 = vsel %vm500_vm3, %v9057_v2, %v5247_v52  ;;  %v5855_v2 = vld [vmem:[%s9628_s23 + $0x38] sm:$0xff] }
0x1f9f   :  { %v5314_v22 = vsel %vm2451_vm6, %v5308_v23, %v5271_v61  ;;  %7300 = vmatprep.subr.mxu0 %v5855_v2 }
0x1fa0   :  { %v7646_v15 = vpop.eup %7645  ;;  %v5544_v13 = vmul.f32 %v9465_v18, %v5532_v5  ;;  %v5557_v43 = vadd.f32 %v9469_v53, %v5545_v1  ;;  %7301 = vmatpush3.msra.mxu0 %v5855_v2 }
0x1fa1   :  { %v5535_v30 = vmul.f32 %v7646_v15, %v5487_v55  ;;  %7302 = vmatprep.subr.mxu0 %v5854_v63 }
0x1fa2   :  { %v7648_v10 = vpop.eup %7647  ;;  %v5556_v45 = vadd.f32 %v9469_v53, %v5544_v13  ;;  %7303 = vmatpush3.msra.mxu0 %v5854_v63 }
0x1fa3   :  { %v5534_v24 = vmul.f32 %v7648_v10, %v5486_v46  ;;  %v5547_v3 = vmul.f32 %v9465_v18, %v5535_v30  ;;  %v5853_v46 = vld [vmem:[%s9628_s23 + $0x28] sm:$0xff] }
0x1fa4   :  { %7291 = vmatprep.mubr.msk.f32.mxu1 %vm264_vm1, %v5556_v45  ;;  %7304 = vmatprep.subr.mxu0 %v5853_v46 }
0x1fa5   :  { %7292 = vmatmul.mubr.msk.f32.vlgmr.msra.gmra.mxu1 %vm264_vm1, %v5557_v43  ;;  %v5546_v14 = vmul.f32 %v9465_v18, %v5534_v24  ;;  %v5559_v37 = vadd.f32 %v9469_v53, %v5547_v3  ;;  %7305 = vmatpush3.msra.mxu0 %v5853_v46 }
0x1fa6   :  { %7306 = vmatprep.subr.mxu0 %v5852_v56 }
0x1fa7   :  { %v5558_v34 = vadd.f32 %v9469_v53, %v5546_v14  ;;  %7307 = vmatpush3.msra.mxu0 %v5852_v56 }
0x1fa8   :  { %7308 = vmatprep.subr.mxu0 %v5851_v21 }
0x1fa9   :  { %7294 = vmatprep.mubr.msk.f32.mxu1 %vm264_vm1, %v5558_v34  ;;  %7309 = vmatpush3.msra.mxu0 %v5851_v21 }
0x1faa   :  { %7295 = vmatmul.mubr.msk.f32.gmra.mxu1 %vm264_vm1, %v5559_v37  ;;  %7310 = vmatprep.subr.mxu0 %v5850_v59 }
0x1fab   :  { %7311 = vmatpush3.msra.mxu0 %v5850_v59 }
0x1fac   :  { %7312 = vmatprep.subr.mxu0 %v5849_v26 }
0x1fad   :  { %7313 = vmatpush3.msra.mxu0 %v5849_v26 }
0x1fae   :  { %7314 = vmatprep.subr.mxu0 %v5848_v12 }
0x1faf   :  { %7315 = vmatpush3.msra.mxu0 %v5848_v12 }
0x1fc2   :  { %v5295_v31 = vpop.permute.xlu0 %5294 }
0x1fc3   :  { %v5320_v57 = vsel %vm700_vm5, %v5314_v22, %v5295_v31 }
0x1fc4   :  { %7280 = vmatprep.mubr.msk.f32.mxu0 %vm264_vm1, %v5320_v57 }
0x1fc7   :  { %v5297_v55 = vpop.permute.xlu1 %5296 }
0x1fc8   :  { %v5321_v32 = vsel %vm700_vm5, %v5315_v60, %v5297_v55  ;;  %vm5982_vm5 = vcmask 254976  }
0x1fc9   :  { %7281 = vmatmul.mubr.msk.f32.gmra.mxu0 %vm264_vm1, %v5321_v32 }
0x2065   :  { %v7293_v20 = vpop.f32.mrf.mxu1 }
0x2066   :  { %v9504_v41 = vadd.f32 %v7293_v20, %v9501_v7 }
0x2067   :  { %v5657_v17 = vpop.f32.mrf.mxu1 }
0x2068   :  { %v9507_v25 = vmul.f32 0.70710677, %v9504_v41  ;;  %v9510_v44 = vadd.f32 %v9501_v7, %v5657_v17 }
0x206a   :  { %v5699_v0 = vand.u32 2147483647, %v9507_v25  ;;  %v9514_v48 = vmul.f32 0.70710677, %v9510_v44  ;;  %v7296_v33 = vpop.f32.mrf.mxu1  ;;  %vm5819_vm14 = vcmp.ge.f32.partialorder %v9507_v25, 0.0  ;;  %v5687_v25 = vmul.f32 0.5, %v9504_v41 }
0x206b   :  { %v9517_v16 = vadd.f32 %v7296_v33, %v9501_v7 }
0x206c   :  { %v5705_v62 = vmul.f32 0.3275911, %v5699_v0  ;;  %v5698_v54 = vand.u32 2147483647, %v9514_v48  ;;  %v5667_v47 = vpop.f32.mrf.mxu1  ;;  %v5783_v15 = vsub.f32 0.0, %v5699_v0  ;;  %vm5818_vm15 = vcmp.ge.f32.partialorder %v9514_v48, 0.0 }
0x206d   :  { %v9521_v19 = vmul.f32 0.70710677, %v9517_v16  ;;  %v9524_v6 = vadd.f32 %v9501_v7, %v5667_v47 }
0x206e   :  { %v5711_v39 = vadd.f32 1.0, %v5705_v62  ;;  %v5704_v28 = vmul.f32 0.3275911, %v5698_v54  ;;  %v5782_v13 = vsub.f32 0.0, %v5698_v54  ;;  %v5789_v30 = vmul.f32 %v5783_v15, %v5699_v0 }
0x206f   :  { %v5701_v27 = vand.u32 2147483647, %v9521_v19  ;;  %v9528_v9 = vmul.f32 0.70710677, %v9524_v6  ;;  %vm5821_vm0 = vcmp.ge.f32.partialorder %v9521_v19, 0.0 }
0x2070   :  { %7649 = vrcp.f32 %v5711_v39  ;;  %v5710_v35 = vadd.f32 1.0, %v5704_v28  ;;  %v5788_v43 = vmul.f32 %v5782_v13, %v5698_v54  ;;  %v5796_v3 = vmul.f32 1.442695, %v5789_v30 }
0x2071   :  { %v5707_v42 = vmul.f32 0.3275911, %v5701_v27  ;;  %v5700_v36 = vand.u32 2147483647, %v9528_v9  ;;  %v5785_v10 = vsub.f32 0.0, %v5701_v27  ;;  %vm5820_vm3 = vcmp.ge.f32.partialorder %v9528_v9, 0.0 }
0x2072   :  { %7651 = vrcp.f32 %v5710_v35  ;;  %v5794_v61 = vmul.f32 1.442695, %v5788_v43 }
0x2073   :  { %v5713_v40 = vadd.f32 1.0, %v5707_v42  ;;  %v5706_v5 = vmul.f32 0.3275911, %v5700_v36  ;;  %v5784_v14 = vsub.f32 0.0, %v5700_v36  ;;  %v5791_v34 = vmul.f32 %v5785_v10, %v5701_v27 }
0x2075   :  { %7653 = vrcp.f32 %v5713_v40  ;;  %v5712_v1 = vadd.f32 1.0, %v5706_v5  ;;  %v5790_v31 = vmul.f32 %v5784_v14, %v5700_v36  ;;  %v5800_v50 = vmul.f32 1.442695, %v5791_v34 }
0x2077   :  { %7655 = vrcp.f32 %v5712_v1  ;;  %v5798_v56 = vmul.f32 1.442695, %v5790_v31 }
0x2078   :  { %7657 = vpow2.f32 %v5796_v3 }
0x2079   :  { %7659 = vpow2.f32 %v5794_v61 }
0x207a   :  { %7661 = vpow2.f32 %v5800_v50 }
0x207b   :  { %7663 = vpow2.f32 %v5798_v56 }
0x207d   :  { %v7650_v45 = vpop.eup %7649 }
0x207e   :  { %v5729_v24 = vmul.f32 1.0614054, %v7650_v45 }
0x207f   :  { %v7652_v37 = vpop.eup %7651 }
0x2080   :  { %v5735_v49 = vadd.f32 -1.4531521, %v5729_v24  ;;  %v5728_v52 = vmul.f32 1.0614054, %v7652_v37 }
0x2082   :  { %v7654_v23 = vpop.eup %7653  ;;  %v5741_v22 = vmul.f32 %v7650_v45, %v5735_v49  ;;  %v5734_v11 = vadd.f32 -1.4531521, %v5728_v52 }
0x2083   :  { %v5731_v57 = vmul.f32 1.0614054, %v7654_v23 }
0x2084   :  { %v5747_v60 = vadd.f32 1.4214138, %v5741_v22  ;;  %v7656_v55 = vpop.eup %7655  ;;  %v5740_v32 = vmul.f32 %v7652_v37, %v5734_v11 }
0x2085   :  { %v5737_v2 = vadd.f32 -1.4531521, %v5731_v57  ;;  %v5730_v46 = vmul.f32 1.0614054, %v7656_v55 }
0x2086   :  { %v5753_v63 = vmul.f32 %v7650_v45, %v5747_v60  ;;  %v5746_v21 = vadd.f32 1.4214138, %v5740_v32 }
0x2087   :  { %v5743_v59 = vmul.f32 %v7654_v23, %v5737_v2  ;;  %v5736_v12 = vadd.f32 -1.4531521, %v5730_v46 }
0x2088   :  { %v5759_v26 = vadd.f32 -0.28449672, %v5753_v63  ;;  %v5752_v20 = vmul.f32 %v7652_v37, %v5746_v21 }
0x2089   :  { %v5749_v17 = vadd.f32 1.4214138, %v5743_v59  ;;  %v7282_v0 = vpop.f32.mrf.mxu0  ;;  %v5742_v62 = vmul.f32 %v7656_v55, %v5736_v12 }
0x208a   :  { %v5765_v33 = vmul.f32 %v7650_v45, %v5759_v26  ;;  %v5444_v54 = vadd.f32 %v7282_v0, %v8797_v38  ;;  %v5758_v47 = vadd.f32 -0.28449672, %v5752_v20  ;;  %v7658_v38 = vpop.eup %7657 }
0x208b   :  { %v5755_v39 = vmul.f32 %v7654_v23, %v5749_v17  ;;  %v5430_v28 = vpop.f32.mrf.mxu0  ;;  %v5748_v35 = vadd.f32 1.4214138, %v5742_v62  ;;  %v5688_v62 = vmul.f32 0.5, %v9524_v6 }
0x208c   :  { %v5771_v27 = vadd.f32 0.2548296, %v5765_v33  ;;  %v9533_v42 = vadd.f32 %v9419_v4, %v5444_v54  ;;  %v5443_v36 = vadd.f32 %v5430_v28, %v8800_v29  ;;  %v5764_v40 = vmul.f32 %v7652_v37, %v5758_v47  ;;  %v7660_v29 = vpop.eup %7659 }
0x208d   :  { %v5761_v5 = vadd.f32 -0.28449672, %v5755_v39  ;;  %v5754_v15 = vmul.f32 %v7656_v55, %v5748_v35 }
0x208e   :  { %v5777_v1 = vmul.f32 %v7650_v45, %v5771_v27  ;;  %v5456_v13 = vadd.f32 %v9419_v4, %v5443_v36  ;;  %v5475_v30 = vsel %vm264_vm1, %v9533_v42, 0.0  ;;  %v5770_v10 = vadd.f32 0.2548296, %v5764_v40  ;;  %v7662_v4 = vpop.eup %7661 }
0x208f   :  { %v5767_v43 = vmul.f32 %v7654_v23, %v5761_v5  ;;  %5476 = vadd.xlane.f32.xlu1 %v5475_v30  ;;  %v5760_v3 = vadd.f32 -0.28449672, %v5754_v15  ;;  %v7664_v2 = vpop.eup %7663  ;;  %v6364_v15 = vld [vmem:[%s9630_s28] ss:$0 sm:$0xff] }
0x2090   :  { %v5807_v24 = vmul.f32 %v7658_v38, %v5777_v1  ;;  %v5472_v14 = vsel %vm264_vm1, %v5456_v13, 0.0  ;;  %v5776_v34 = vmul.f32 %v7652_v37, %v5770_v10 }
0x2091   :  { %v5773_v49 = vadd.f32 0.2548296, %v5767_v43  ;;  %5473 = vadd.xlane.f32.xlu0 %v5472_v14  ;;  %v5766_v45 = vmul.f32 %v7656_v55, %v5760_v3 }
0x2092   :  { %v5813_v52 = vsub.f32 1.0, %v5807_v24  ;;  %v5806_v61 = vmul.f32 %v7660_v29, %v5776_v34 }
0x2093   :  { %v5779_v22 = vmul.f32 %v7654_v23, %v5773_v49  ;;  %v5772_v11 = vadd.f32 0.2548296, %v5766_v45  ;;  %v5686_v23 = vmul.f32 0.5, %v9510_v44  ;;  %v5689_v44 = vmul.f32 0.5, %v9517_v16 }
0x2094   :  { %v5825_v31 = vsub.f32 0.0, %v5813_v52  ;;  %v5812_v57 = vsub.f32 1.0, %v5806_v61 }
0x2095   :  { %v5809_v50 = vmul.f32 %v7662_v4, %v5779_v22  ;;  %v5778_v32 = vmul.f32 %v7656_v55, %v5772_v11 }
0x2096   :  { %v5831_v60 = vsel %vm5819_vm14, %v5813_v52, %v5825_v31  ;;  %v5824_v63 = vsub.f32 0.0, %v5812_v57 }
0x2097   :  { %v5815_v46 = vsub.f32 1.0, %v5809_v50  ;;  %v5808_v37 = vmul.f32 %v7664_v2, %v5778_v32  ;;  %v5837_v56 = vadd.f32 1.0, %v5831_v60 }
0x2098   :  { %v5830_v21 = vsel %vm5818_vm15, %v5812_v57, %v5824_v63 }
0x2099   :  { %v5827_v59 = vsub.f32 0.0, %v5815_v46  ;;  %v5836_v26 = vadd.f32 1.0, %v5830_v21  ;;  %v5814_v12 = vsub.f32 1.0, %v5808_v37  ;;  %v5843_v0 = vmul.f32 %v5837_v56, %v5687_v25 }
0x209b   :  { %v5833_v20 = vsel %vm5821_vm0, %v5815_v46, %v5827_v59  ;;  %v5842_v17 = vmul.f32 %v5836_v26, %v5686_v23  ;;  %v5826_v55 = vsub.f32 0.0, %v5814_v12  ;;  %v6031_v59 = vld [vmem:[%s7891_s20 + $0x18] sm:$0xff]  ;;  %v6030_v23 = vld [vmem:[%s7891_s20 + $0x10] sm:$0xff]  ;;  %v6029_v26 = vld [vmem:[%s7891_s20 + $0x8] sm:$0xff] }
0x209c   :  { %v5839_v33 = vadd.f32 1.0, %v5833_v20  ;;  %7326 = vmatpush3.msra.mxu1 %v6031_v59 }
0x209d   :  { %v5832_v48 = vsel %vm5820_vm3, %v5814_v12, %v5826_v55  ;;  %7316 = vmatprep.mubr.msk.f32.mxu0 %vm3005_vm9, %v5842_v17  ;;  %7327 = vmatprep.subr.mxu1 %v7730_v51  ;;  %v6028_v12 = vld [vmem:[%s7891_s20] sm:$0xff]  ;;  %s9631_s20 = sld [smem:[#allocation16_spill]] }
0x209e   :  { %v5838_v54 = vadd.f32 1.0, %v5832_v48  ;;  %7317 = vmatmul.mubr.msk.f32.vlgmr.msra.gmra.mxu0 %vm3005_vm9, %v5843_v0  ;;  %v5845_v47 = vmul.f32 %v5839_v33, %v5689_v44  ;;  %7328 = vmatpush3.msra.mxu1 %v6030_v23 }
0x209f   :  { %7329 = vmatprep.subr.mxu1 %v7730_v51 }
0x20a0   :  { %v5844_v19 = vmul.f32 %v5838_v54, %v5688_v62  ;;  %7330 = vmatpush3.msra.mxu1 %v6029_v26 }
0x20a1   :  { %7331 = vmatprep.subr.mxu1 %v7730_v51 }
0x20a2   :  { %7319 = vmatprep.mubr.msk.f32.mxu0 %vm3005_vm9, %v5844_v19  ;;  %7332 = vmatpush3.msra.mxu1 %v6028_v12 }
0x20a3   :  { %7320 = vmatmul.mubr.msk.f32.gmra.mxu0 %vm3005_vm9, %v5845_v47 }
0x2118   :  { %v5477_v41 = vpop.xlane.xlu1 %5476 }
0x2119   :  { %v5483_v9 = vmul.f32 0.03125, %v5477_v41 }
0x211a   :  { %v5474_v39 = vpop.xlane.xlu0 %5473 }
0x211b   :  { %v5482_v28 = vmul.f32 0.03125, %v5474_v39  ;;  %v5489_v27 = vsub.f32 %v9533_v42, %v5483_v9 }
0x211d   :  { %v5488_v35 = vsub.f32 %v5456_v13, %v5482_v28  ;;  %v5495_v40 = vmul.f32 %v5489_v27, %v5489_v27 }
0x211f   :  { %v5494_v6 = vmul.f32 %v5488_v35, %v5488_v35  ;;  %v5511_v16 = vsel %vm264_vm1, %v5495_v40, 0.0 }
0x2121   :  { %v5508_v36 = vsel %vm264_vm1, %v5494_v6, 0.0 }
0x2122   :  { %5509 = vadd.xlane.f32.xlu0 %v5508_v36 }
0x2126   :  { %5512 = vadd.xlane.f32.xlu0 %v5511_v16 }
0x215e   :  { %v7318_v5 = vpop.f32.mrf.mxu0 }
0x2160   :  { %v5947_v1 = vpop.f32.mrf.mxu0 }
0x2161   :  { %v5948_v38 = vadd.f32 %v6364_v15, %v5947_v1  ;;  %v6371_v1 = vld [vmem:[%s9631_s20] ss:$0 sm:$0xff] }
0x2163   :  { %v7321_v30 = vpop.f32.mrf.mxu0  ;;  %v5972_v42 = vadd.f32 %v5948_v38, %v9425_v58 }
0x2164   :  { %v5961_v10 = vadd.f32 %v7321_v30, %v6364_v15 }
0x2165   :  { %v5956_v43 = vpop.f32.mrf.mxu0 }
0x2166   :  { %v5973_v24 = vadd.f32 %v5961_v10, %v9432_v8 }
0x2168   :  { %v5978_v13 = vrot.slane %v5973_v24, 7 }
0x216a   :  { %v5980_v3 = vsel %vm5979_vm4, %v5978_v13, %v5972_v42 }
0x216b   :  { %v5983_v14 = vsel %vm5982_vm5, %v5980_v3, 0.0  ;;  %v6372_v3 = vld [vmem:[%s7886_s12] ss:$0 sm:$0xff]  ;;  %s7747_s12 = smov [#allocation2]  }
0x216c   :  { %5984 = vadd.xlane.f32.xlu0 %v5983_v14  ;;  %s6122_s1 = sshll.u32 %s7747_s12, 4  ;;  %s6123_s1 = int_to_ptr.vmem [resolvable:$true] %s6122_s1 }
0x216d   :  { %s7679_s2 = scalar_lea.vmem %s6123_s1, 32  ;;  %p7684_p1 = scmp.lt.s32.totalorder %s6123_s1, %s6123_s1 }
0x216e   :  { %p7680_p0 = scmp.ne.s32.totalorder %s6123_s1, %s7679_s2  ;;  %p7685_p2 = scmp.lt.s32.totalorder %s7679_s2, %s7679_s2 }
0x2170   :  { %p7686_p3 = por %p7685_p2, %p7684_p1 }
0x2172   :  { %p7687_p4 = pnand %p7686_p3, %p7680_p0 }
0x21ab   :  { %v5510_v34 = vpop.xlane.xlu0 %5509 }
0x21ac   :  { %v5518_v49 = vmul.f32 0.03125, %v5510_v34 }
0x21ae   :  { %v5524_v29 = vadd.f32 1e-05, %v5518_v49 }
0x21af   :  { %v5513_v52 = vpop.xlane.xlu0 %5512 }
0x21b0   :  { %7665 = vrsqrt.f32 %v5524_v29  ;;  %v5519_v45 = vmul.f32 0.03125, %v5513_v52 }
0x21b2   :  { %v5525_v61 = vadd.f32 1e-05, %v5519_v45 }
0x21b4   :  { %7667 = vrsqrt.f32 %v5525_v61 }
0x21bd   :  { %v7666_v22 = vpop.eup %7665 }
0x21be   :  { %v5536_v8 = vmul.f32 %v7666_v22, %v5488_v35 }
0x21c0   :  { %v5548_v4 = vmul.f32 %v9465_v18, %v5536_v8 }
0x21c1   :  { %v7668_v58 = vpop.eup %7667 }
0x21c2   :  { %v5537_v31 = vmul.f32 %v7668_v58, %v5489_v27  ;;  %v5560_v11 = vadd.f32 %v9469_v53, %v5548_v4 }
0x21c4   :  { %7297 = vmatprep.mubr.msk.f32.mxu1 %vm264_vm1, %v5560_v11  ;;  %v5549_v57 = vmul.f32 %v9465_v18, %v5537_v31 }
0x21c6   :  { %v5561_v50 = vadd.f32 %v9469_v53, %v5549_v57 }
0x21c8   :  { %7298 = vmatmul.mubr.msk.f32.gmra.mxu1 %vm264_vm1, %v5561_v50 }
0x21c9   :  { %7333 = vmatprep.mubr.msk.f32.mxu1 %vm7732_vm2, %v7730_v51 }
0x21f5   :  { %v5985_v60 = vpop.xlane.xlu0 %5984 }
0x21f6   :  { %v5986_v32 = vmul.f32 0.03125, %v5985_v60 }
0x21f8   :  { %v5988_v2 = vrot.slane %v5986_v32, 1  ;;  %v5991_v63 = vsub.f32 %v5972_v42, %v5986_v32 }
0x21fa   :  { %v5992_v46 = vsub.f32 %v5973_v24, %v5988_v2  ;;  %v5993_v56 = vmul.f32 %v5991_v63, %v5991_v63 }
0x21fc   :  { %v5994_v37 = vmul.f32 %v5992_v46, %v5992_v46 }
0x21fe   :  { %v5997_v21 = vrot.slane %v5994_v37, 7 }
0x2200   :  { %v5998_v18 = vsel %vm5979_vm4, %v5997_v21, %v5993_v56 }
0x2201   :  { %v6000_v53 = vsel %vm5982_vm5, %v5998_v18, 0.0 }
0x2202   :  { %6001 = vadd.xlane.f32.xlu1 %v6000_v53 }
0x2288   :  { %v7299_v25 = vpop.f32.mrf.mxu1 }
0x2289   :  { %v9578_v20 = vadd.f32 %v7299_v25, %v9501_v7 }
0x228a   :  { %v5677_v17 = vpop.f32.mrf.mxu1 }
0x228b   :  { %v9581_v55 = vmul.f32 0.70710677, %v9578_v20  ;;  %v9584_v0 = vadd.f32 %v9501_v7, %v5677_v17  ;;  %v6002_v33 = vpop.xlane.xlu1 %6001 }
0x228c   :  { %v6003_v51 = vmul.f32 0.03125, %v6002_v33  ;;  %v5691_v33 = vmul.f32 0.5, %v9578_v20 }
0x228d   :  { %v5703_v48 = vand.u32 2147483647, %v9581_v55  ;;  %v9588_v62 = vmul.f32 0.70710677, %v9584_v0  ;;  %vm5823_vm2 = vcmp.ge.f32.partialorder %v9581_v55, 0.0  ;;  %v5690_v25 = vmul.f32 0.5, %v9584_v0 }
0x228e   :  { %v6004_v19 = vadd.f32 1e-05, %v6003_v51 }
0x228f   :  { %v5709_v54 = vmul.f32 0.3275911, %v5703_v48  ;;  %v5702_v44 = vand.u32 2147483647, %v9588_v62  ;;  %v5787_v7 = vsub.f32 0.0, %v5703_v48 }
0x2290   :  { %7669 = vrsqrt.f32 %v6004_v19 }
0x2291   :  { %v5715_v47 = vadd.f32 1.0, %v5709_v54  ;;  %v5708_v41 = vmul.f32 0.3275911, %v5702_v44  ;;  %v5786_v39 = vsub.f32 0.0, %v5702_v44  ;;  %v5793_v28 = vmul.f32 %v5787_v7, %v5703_v48  ;;  %v6373_v54 = vld [vmem:[%s7896_s27] ss:$0 sm:$0xff] }
0x2293   :  { %7671 = vrcp.f32 %v5715_v47  ;;  %v5714_v9 = vadd.f32 1.0, %v5708_v41  ;;  %v5792_v6 = vmul.f32 %v5786_v39, %v5702_v44  ;;  %v5804_v5 = vmul.f32 1.442695, %v5793_v28 }
0x2295   :  { %7673 = vrcp.f32 %v5714_v9  ;;  %v5802_v43 = vmul.f32 1.442695, %v5792_v6 }
0x2296   :  { %7675 = vpow2.f32 %v5804_v5 }
0x2297   :  { %7677 = vpow2.f32 %v5802_v43 }
0x229d   :  { %v7670_v27 = vpop.eup %7669 }
0x229e   :  { %v6007_v36 = vrot.slane %v7670_v27, 1  ;;  %v6010_v40 = vmul.f32 %v7670_v27, %v5991_v63 }
0x22a0   :  { %v7672_v35 = vpop.eup %7671  ;;  %v6011_v15 = vmul.f32 %v6007_v36, %v5992_v46  ;;  %v6018_v24 = vmul.f32 %v6371_v1, %v6010_v40 }
0x22a1   :  { %v5733_v16 = vmul.f32 1.0614054, %v7672_v35 }
0x22a2   :  { %v7674_v30 = vpop.eup %7673  ;;  %v6019_v42 = vmul.f32 %v6371_v1, %v6011_v15  ;;  %v6026_v52 = vadd.f32 %v6372_v3, %v6018_v24 }
0x22a3   :  { %v5739_v38 = vadd.f32 -1.4531521, %v5733_v16  ;;  %v5732_v10 = vmul.f32 1.0614054, %v7674_v30  ;;  %v7676_v32 = vpop.eup %7675 }
0x22a4   :  { %v6027_v34 = vadd.f32 %v6372_v3, %v6019_v42  ;;  %v7678_v37 = vpop.eup %7677 }
0x22a5   :  { %v5745_v13 = vmul.f32 %v7672_v35, %v5739_v38  ;;  %v5738_v14 = vadd.f32 -1.4531521, %v5732_v10 }
0x22a6   :  { %v6041_v45 = vrot.slane %v6027_v34, 7 }
0x22a7   :  { %v5751_v49 = vadd.f32 1.4214138, %v5745_v13  ;;  %v5744_v29 = vmul.f32 %v7674_v30, %v5738_v14 }
0x22a8   :  { %v6042_v8 = vsel %vm5979_vm4, %v6041_v45, %v6026_v52 }
0x22a9   :  { %v5757_v61 = vmul.f32 %v7672_v35, %v5751_v49  ;;  %v5750_v22 = vadd.f32 1.4214138, %v5744_v29  ;;  %7334 = vmatmul.mubr.msk.f32.vlgmr.msra.gmra.mxu1 %vm264_vm1, %v6042_v8  ;;  %vm5822_vm1 = vcmp.ge.f32.partialorder %v9588_v62, 0.0 }
0x22ab   :  { %v5763_v4 = vadd.f32 -0.28449672, %v5757_v61  ;;  %v5756_v58 = vmul.f32 %v7674_v30, %v5750_v22 }
0x22ad   :  { %v5769_v31 = vmul.f32 %v7672_v35, %v5763_v4  ;;  %v5762_v11 = vadd.f32 -0.28449672, %v5756_v58 }
0x22af   :  { %v5775_v57 = vadd.f32 0.2548296, %v5769_v31  ;;  %v5768_v50 = vmul.f32 %v7674_v30, %v5762_v11 }
0x22b1   :  { %v5781_v60 = vmul.f32 %v7672_v35, %v5775_v57  ;;  %v5774_v2 = vadd.f32 0.2548296, %v5768_v50 }
0x22b3   :  { %v5811_v63 = vmul.f32 %v7676_v32, %v5781_v60  ;;  %v5780_v46 = vmul.f32 %v7674_v30, %v5774_v2 }
0x22b5   :  { %v5817_v56 = vsub.f32 1.0, %v5811_v63  ;;  %v5810_v21 = vmul.f32 %v7678_v37, %v5780_v46 }
0x22b7   :  { %v5829_v18 = vsub.f32 0.0, %v5817_v56  ;;  %v5816_v53 = vsub.f32 1.0, %v5810_v21 }
0x22b9   :  { %v5835_v59 = vsel %vm5823_vm2, %v5817_v56, %v5829_v18  ;;  %v5828_v23 = vsub.f32 0.0, %v5816_v53 }
0x22ba   :  { %v5841_v26 = vadd.f32 1.0, %v5835_v59 }
0x22bb   :  { %v5834_v12 = vsel %vm5822_vm1, %v5816_v53, %v5828_v23 }
0x22bc   :  { %v5840_v17 = vadd.f32 1.0, %v5834_v12  ;;  %v5847_v51 = vmul.f32 %v5841_v26, %v5691_v33 }
0x22be   :  { %v5846_v48 = vmul.f32 %v5840_v17, %v5690_v25 }
0x22c0   :  { %7322 = vmatprep.mubr.msk.f32.mxu0 %vm3005_vm9, %v5846_v48 }
0x22c1   :  { %7323 = vmatmul.mubr.msk.f32.gmra.mxu0 %vm3005_vm9, %v5847_v51 }
0x2369   :  { %v6111_v55 = vpop.f32.mrf.mxu1 }
0x236a   :  { %v6112_v44 = vadd.f32 %v6373_v54, %v6111_v55 }
0x236b   :  { %v7335_v62 = vpop.f32.mrf.mxu1 }
0x236c   :  { %6115 = vst [vmem:[#allocation2] sm:$0x3] %v6112_v44 }
0x236d   :  { %7690 = shalt.err (!%p7687_p4)
}
0x236e   :  { %6125 = dma.vmem_to_hbm [thread:$0]  %s6123_s1, 32, %s7901_s4, [#allocation3]  }
0x2381   :  { %v7324_v20 = vpop.f32.mrf.mxu0 }
0x2383   :  { %v5965_v0 = vpop.f32.mrf.mxu0 }
0x2384   :  { %7699 = dma.done.wait [#allocation3], 32  }
0x2385   :  { %7700 = vsyncadd [#allocation3], 4294967264 }
0x2386   :  { %6129 = vsyncpa [#allocation3], 1 }

</bundles_post_ra>
